<compile_context>
chip_gen: v6e
topology: v6e:2x2x1
jax: 0.10.0
libtpu: 0.0.40
codegen_flags: <defaults>
</compile_context>

<pallas_src>
import jax
import jax.numpy as jnp
from jax.experimental import pallas as pl
from jax.experimental.pallas import tpu as pltpu

_BN_EPS = 1e-5
_LPAD = 8   # left pad of the conv scratch; keeps the interior store sublane-aligned


def _silu(v):
    # exp and the approximate reciprocal both lower to the EUP slot.
    return v * pl.reciprocal(1.0 + jnp.exp(-v), approx=True)


# ----------------------------------------------------------------------------
# Pallas kernel
# ----------------------------------------------------------------------------
def _make_c3_kernel(h, w, c_hidden, n, shortcut, compute_dtype):
    hw = h * w
    c_ = c_hidden
    cdt = compute_dtype

    def kernel(x_ref, w1_ref, b1_ref, w2_ref, b2_ref,
               wb1_ref, bb1_ref, wb2_ref, bb2_ref,
               w3_ref, b3_ref, o_ref, pad_ref, col_ref):
        # x_ref: (1, hw, c1)  one batch element, channels-last, spatial flattened
        # cv1 branch: 1x1 conv + folded BN + SiLU  (single MXU matmul, bf16xbf16->f32)
        y1 = _silu(jnp.dot(x_ref[0].astype(cdt), w1_ref[...],
                           preferred_element_type=jnp.float32) + b1_ref[...])

        # Zero only the halo of the padded 3x3 staging buffer: top/bottom rows
        # plus the two columns the taps read outside the interior.  The interior
        # is fully rewritten for every bottleneck, so this happens once.
        pad_ref[0:1, :, :] = jnp.zeros((1, w + _LPAD + 1, c_), jnp.float32)
        pad_ref[h + 1:h + 2, :, :] = jnp.zeros((1, w + _LPAD + 1, c_), jnp.float32)
        pad_ref[:, _LPAD - 1:_LPAD, :] = jnp.zeros((h + 2, 1, c_), jnp.float32)
        pad_ref[:, _LPAD + w:_LPAD + w + 1, :] = jnp.zeros((h + 2, 1, c_), jnp.float32)

        def bottleneck(i, cur):
            # Bottleneck cv1 (1x1 conv + BN + SiLU)
            t = _silu(jnp.dot(cur.astype(cdt), wb1_ref[i],
                              preferred_element_type=jnp.float32) + bb1_ref[i])

            # Stage t into the zero-padded scratch, then build the im2col tile:
            # col[:, tap*c_:(tap+1)*c_] = window shifted by tap (a, b).
            pad_ref[1:h + 1, _LPAD:_LPAD + w, :] = t.reshape(h, w, c_)
            for tap in range(9):
                a, b = tap // 3, tap % 3
                col_ref[:, tap * c_:(tap + 1) * c_] = (
                    pad_ref[a:a + h, _LPAD - 1 + b:_LPAD - 1 + b + w, :]
                    .reshape(hw, c_).astype(cdt))

            # Bottleneck cv2: 3x3 conv (pad=1) as ONE MXU matmul with K = 9*c_.
            acc = jnp.dot(col_ref[...], wb2_ref[i],
                          preferred_element_type=jnp.float32)
            t3 = _silu(acc + bb2_ref[i])
            return (cur + t3) if shortcut else t3      # residual stays f32

        cur = jax.lax.fori_loop(0, n, bottleneck, y1)

        # cv2 branch after the loop so y2 is not live across the bottlenecks.
        y2 = _silu(jnp.dot(x_ref[0].astype(cdt), w2_ref[...],
                           preferred_element_type=jnp.float32) + b2_ref[...])

        # cv3 on concat(cur, y2): split the weight rows instead of concatenating.
        out = (jnp.dot(cur.astype(cdt), w3_ref[0:c_, :],
                       preferred_element_type=jnp.float32)
               + jnp.dot(y2.astype(cdt), w3_ref[c_:2 * c_, :],
                         preferred_element_type=jnp.float32)
               + b3_ref[...])
        o_ref[0] = _silu(out).astype(o_ref.dtype)

    return kernel


def c3_forward(x_nhwc, folded, n, shortcut=True):
    """x_nhwc: (b, h, w, c1) float32. folded: output of fold_c3_params."""
    w1, b1, w2, b2, wb1, bb1, wb2, bb2, w3, b3 = folded
    b, h, w, c1 = x_nhwc.shape
    c_ = w1.shape[1]
    c2 = w3.shape[1]
    hw = h * w
    cdt = w1.dtype
    xf = x_nhwc.reshape(b, hw, c1)

    kernel = _make_c3_kernel(h, w, c_, n, shortcut, cdt)

    def full(arr):  # whole-array operand, same block for every grid step
        nd = arr.ndim
        return pl.BlockSpec(arr.shape, lambda i, _nd=nd: (0,) * _nd)

    out = pl.pallas_call(
        kernel,
        out_shape=jax.ShapeDtypeStruct((b, hw, c2), x_nhwc.dtype),
        grid=(b,),
        in_specs=[
            pl.BlockSpec((1, hw, c1), lambda i: (i, 0, 0)),
            full(w1), full(b1), full(w2), full(b2),
            full(wb1), full(bb1), full(wb2), full(bb2),
            full(w3), full(b3),
        ],
        out_specs=pl.BlockSpec((1, hw, c2), lambda i: (i, 0, 0)),
        scratch_shapes=[
            pltpu.VMEM((h + 2, w + _LPAD + 1, c_), jnp.float32),  # padded t
            pltpu.VMEM((hw, 9 * c_), cdt),                        # im2col tile
        ],
        compiler_params=pltpu.CompilerParams(
            dimension_semantics=("parallel",),
            vmem_limit_bytes=64 * 1024 * 1024),
    )(xf, w1, b1, w2, b2, wb1, bb1, wb2, bb2, w3, b3)
    return out.reshape(b, h, w, c2)


# ----------------------------------------------------------------------------
# Parameter construction, BN folding, and a plain-JAX reference
# ----------------------------------------------------------------------------
def _make_conv_params(key, cout, cin, ksize):
    kw, kg, kb, km, kv = jax.random.split(key, 5)
    fan_in = cin * ksize * ksize
    wshape = (cout, cin) if ksize == 1 else (cout, cin, ksize, ksize)
    return {
        "w": jax.random.normal(kw, wshape, jnp.float32) * (fan_in ** -0.5),
        "gamma": jax.random.uniform(kg, (cout,), jnp.float32, 0.5, 1.5),
        "beta": jax.random.normal(kb, (cout,), jnp.float32) * 0.1,
        "mean": jax.random.normal(km, (cout,), jnp.float32) * 0.1,
        "var": jax.random.uniform(kv, (cout,), jnp.float32, 0.5, 1.5),
    }


def _bn_scale_bias(p, eps=_BN_EPS):
    scale = p["gamma"] / jnp.sqrt(p["var"] + eps)
    return scale, p["beta"] - p["mean"] * scale


def _fold_1x1(p, dtype):
    s, t = _bn_scale_bias(p)
    wf = (p["w"].T * s[None, :]).astype(dtype)              # (cin, cout), BN folded
    return wf, t.reshape(1, -1).astype(jnp.float32)


def _fold_3x3_im2col(p, dtype):
    s, t = _bn_scale_bias(p)
    cout, cin = p["w"].shape[0], p["w"].shape[1]
    # (cout,cin,kh,kw) -> (kh,kw,cin,cout) -> row index = (kh*3+kw)*cin + cin_idx
    wt = jnp.transpose(p["w"], (2, 3, 1, 0)).reshape(9 * cin, cout)
    wf = (wt * s[None, :]).astype(dtype)
    return wf, t.reshape(1, -1).astype(jnp.float32)


def fold_c3_params(params, n, dtype=jnp.bfloat16):
    w1, b1 = _fold_1x1(params["cv1"], dtype)
    w2, b2 = _fold_1x1(params["cv2"], dtype)
    w3, b3 = _fold_1x1(params["cv3"], dtype)
    m1 = [_fold_1x1(params["m"][i]["cv1"], dtype) for i in range(n)]
    m2 = [_fold_3x3_im2col(params["m"][i]["cv2"], dtype) for i in range(n)]
    wb1 = jnp.stack([a for a, _ in m1])
    bb1 = jnp.stack([b for _, b in m1])
    wb2 = jnp.stack([a for a, _ in m2])
    bb2 = jnp.stack([b for _, b in m2])
    return (w1, b1, w2, b2, wb1, bb1, wb2, bb2, w3, b3)


def _conv1x1_bn_silu_ref(x, p):
    y = jnp.einsum("bhwc,oc->bhwo", x, p["w"])
    s, t = _bn_scale_bias(p)
    return jax.nn.silu(y * s + t)


def _conv3x3_bn_silu_ref(x, p):
    rhs = jnp.transpose(p["w"], (2, 3, 1, 0))               # HWIO
    y = jax.lax.conv_general_dilated(
        x, rhs, window_strides=(1, 1), padding=((1, 1), (1, 1)),
        dimension_numbers=("NHWC", "HWIO", "NHWC"))
    s, t = _bn_scale_bias(p)
    return jax.nn.silu(y * s + t)


def c3_reference(x_nhwc, params, n, shortcut=True):
    """Literal transcription of the PyTorch C3 forward (eval mode), plain JAX."""
    y1 = _conv1x1_bn_silu_ref(x_nhwc, params["cv1"])
    y2 = _conv1x1_bn_silu_ref(x_nhwc, params["cv2"])
    for i in range(n):
        t = _conv1x1_bn_silu_ref(y1, params["m"][i]["cv1"])
        t = _conv3x3_bn_silu_ref(t, params["m"][i]["cv2"])
        y1 = (y1 + t) if shortcut else t
    cat = jnp.concatenate([y1, y2], axis=-1)
    return _conv1x1_bn_silu_ref(cat, params["cv3"])


# ----------------------------------------------------------------------------
if __name__ == "__main__":
    b, c1, c2, h, w = 2, 16, 32, 16, 16
    n, shortcut, e = 2, True, 0.5
    c_ = int(c2 * e)

    key = jax.random.PRNGKey(0)
    kx, kc1, kc2, kc3, km = jax.random.split(key, 5)
    mkeys = jax.random.split(km, 2 * n)

    # PyTorch-style NCHW input, converted to channels-last for the TPU kernel.
    x_nchw = jax.random.normal(kx, (b, c1, h, w), dtype=jnp.float32)
    x_nhwc = jnp.transpose(x_nchw, (0, 2, 3, 1))

    params = {
        "cv1": _make_conv_params(kc1, c_, c1, 1),
        "cv2": _make_conv_params(kc2, c_, c1, 1),
        "cv3": _make_conv_params(kc3, c2, 2 * c_, 1),
        "m": [{"cv1": _make_conv_params(mkeys[2 * i], c_, c_, 1),
               "cv2": _make_conv_params(mkeys[2 * i + 1], c_, c_, 3)}
              for i in range(n)],
    }

    folded = fold_c3_params(params, n, dtype=jnp.bfloat16)
    out = c3_forward(x_nhwc, folded, n, shortcut)
    out = jax.block_until_ready(out)

    ref = c3_reference(x_nhwc, params, n, shortcut)
    assert out.shape == (b, h, w, c2)
    max_err = float(jnp.max(jnp.abs(out - ref)))
    # bf16 matmul operands + approximate-reciprocal SiLU => looser tolerance.
    assert jnp.allclose(out, ref, atol=5e-2, rtol=5e-2), max_err
    print("KERNEL_OK")
</pallas_src>

<mosaic_0001>
module attributes {stable_mosaic.version = 11 : i64} {
  func.func @kernel(%arg0: i32, %arg1: memref<1x256x16xf32, #tpu.memory_space<vmem>>, %arg2: memref<16x16xbf16, #tpu.memory_space<vmem>>, %arg3: memref<1x16xf32, #tpu.memory_space<vmem>>, %arg4: memref<16x16xbf16, #tpu.memory_space<vmem>>, %arg5: memref<1x16xf32, #tpu.memory_space<vmem>>, %arg6: memref<2x16x16xbf16, #tpu.memory_space<vmem>>, %arg7: memref<2x1x16xf32, #tpu.memory_space<vmem>>, %arg8: memref<2x144x16xbf16, #tpu.memory_space<vmem>>, %arg9: memref<2x1x16xf32, #tpu.memory_space<vmem>>, %arg10: memref<32x32xbf16, #tpu.memory_space<vmem>>, %arg11: memref<1x32xf32, #tpu.memory_space<vmem>>, %arg12: memref<1x256x32xf32, #tpu.memory_space<vmem>>, %arg13: memref<18x25x16xf32, #tpu.memory_space<vmem>>, %arg14: memref<256x144xbf16, #tpu.memory_space<vmem>>) attributes {dimension_semantics = [#tpu.dimension_semantics<parallel>], iteration_bounds = array<i64: 2>, scalar_prefetch = 0 : i64, scratch_operands = 2 : i64, tpu.core_type = #tpu.core_type<tc>, window_params = [{transform_indices = @transform_0, window_bounds = array<i64: 1, 256, 16>}, {pipeline_mode = #tpu.pipeline_mode<synchronous>, transform_indices = @transform_1, window_bounds = array<i64: 16, 16>}, {pipeline_mode = #tpu.pipeline_mode<synchronous>, transform_indices = @transform_2, window_bounds = array<i64: 1, 16>}, {pipeline_mode = #tpu.pipeline_mode<synchronous>, transform_indices = @transform_3, window_bounds = array<i64: 16, 16>}, {pipeline_mode = #tpu.pipeline_mode<synchronous>, transform_indices = @transform_4, window_bounds = array<i64: 1, 16>}, {pipeline_mode = #tpu.pipeline_mode<synchronous>, transform_indices = @transform_5, window_bounds = array<i64: 2, 16, 16>}, {pipeline_mode = #tpu.pipeline_mode<synchronous>, transform_indices = @transform_6, window_bounds = array<i64: 2, 1, 16>}, {pipeline_mode = #tpu.pipeline_mode<synchronous>, transform_indices = @transform_7, window_bounds = array<i64: 2, 144, 16>}, {pipeline_mode = #tpu.pipeline_mode<synchronous>, transform_indices = @transform_8, window_bounds = array<i64: 2, 1, 16>}, {pipeline_mode = #tpu.pipeline_mode<synchronous>, transform_indices = @transform_9, window_bounds = array<i64: 32, 32>}, {pipeline_mode = #tpu.pipeline_mode<synchronous>, transform_indices = @transform_10, window_bounds = array<i64: 1, 32>}, {transform_indices = @transform_11, window_bounds = array<i64: 1, 256, 32>}]} {
    %c0 = arith.constant 0 : index
    %c0_0 = arith.constant 0 : index
    %c0_1 = arith.constant 0 : index
    %0 = vector.load %arg1[%c0, %c0_0, %c0_1] : memref<1x256x16xf32, #tpu.memory_space<vmem>>, vector<1x256x16xf32>
    %1 = vector.shape_cast %0 : vector<1x256x16xf32> to vector<256x16xf32>
    %2 = arith.truncf %1 : vector<256x16xf32> to vector<256x16xbf16>
    %c0_2 = arith.constant 0 : index
    %c0_3 = arith.constant 0 : index
    %3 = vector.load %arg2[%c0_2, %c0_3] : memref<16x16xbf16, #tpu.memory_space<vmem>>, vector<16x16xbf16>
    %cst = arith.constant dense<0.000000e+00> : vector<256x16xf32>
    %4 = tpu.matmul %2, %3, %cst {dimension_numbers = #tpu.dot_dimension_numbers<[1], [0], [0], [1], [0, 0, 1, 1], [], []>} : vector<256x16xbf16>, vector<16x16xbf16>, vector<256x16xf32> -> vector<256x16xf32>
    %c0_4 = arith.constant 0 : index
    %c0_5 = arith.constant 0 : index
    %5 = vector.load %arg3[%c0_4, %c0_5] : memref<1x16xf32, #tpu.memory_space<vmem>>, vector<1x16xf32>
    %6 = vector.broadcast %5 : vector<1x16xf32> to vector<256x16xf32>
    %7 = arith.addf %4, %6 : vector<256x16xf32>
    %cst_6 = arith.constant 0.000000e+00 : f32
    %8 = vector.broadcast %cst_6 : f32 to vector<256x16xf32>
    %9 = arith.subf %8, %7 : vector<256x16xf32>
    %10 = math.exp %9 : vector<256x16xf32>
    %cst_7 = arith.constant 1.000000e+00 : f32
    %11 = vector.broadcast %cst_7 : f32 to vector<256x16xf32>
    %12 = arith.addf %11, %10 : vector<256x16xf32>
    %13 = tpu.reciprocal %12 {approx = true} : vector<256x16xf32> -> vector<256x16xf32>
    %14 = arith.mulf %7, %13 : vector<256x16xf32>
    %cst_8 = arith.constant 0.000000e+00 : f32
    %15 = vector.broadcast %cst_8 : f32 to vector<1x25x16xf32>
    %c0_9 = arith.constant 0 : index
    %c0_10 = arith.constant 0 : index
    %c0_11 = arith.constant 0 : index
    %16 = vector.load %arg13[%c0_9, %c0_10, %c0_11] : memref<18x25x16xf32, #tpu.memory_space<vmem>>, vector<1x25x16xf32>
    tpu.vector_store %arg13[%c0_9, %c0_10, %c0_11], %15 {strides = array<i32>} : memref<18x25x16xf32, #tpu.memory_space<vmem>>, vector<1x25x16xf32>,
    %cst_12 = arith.constant 0.000000e+00 : f32
    %17 = vector.broadcast %cst_12 : f32 to vector<1x25x16xf32>
    %c17 = arith.constant 17 : index
    %c0_13 = arith.constant 0 : index
    %c0_14 = arith.constant 0 : index
    %18 = vector.load %arg13[%c17, %c0_13, %c0_14] : memref<18x25x16xf32, #tpu.memory_space<vmem>>, vector<1x25x16xf32>
    tpu.vector_store %arg13[%c17, %c0_13, %c0_14], %17 {strides = array<i32>} : memref<18x25x16xf32, #tpu.memory_space<vmem>>, vector<1x25x16xf32>,
    %cst_15 = arith.constant 0.000000e+00 : f32
    %19 = vector.broadcast %cst_15 : f32 to vector<18x1x16xf32>
    %c0_16 = arith.constant 0 : index
    %c7 = arith.constant 7 : index
    %c0_17 = arith.constant 0 : index
    %20 = vector.load %arg13[%c0_16, %c7, %c0_17] : memref<18x25x16xf32, #tpu.memory_space<vmem>>, vector<18x1x16xf32>
    tpu.vector_store %arg13[%c0_16, %c7, %c0_17], %19 {strides = array<i32>} : memref<18x25x16xf32, #tpu.memory_space<vmem>>, vector<18x1x16xf32>,
    %cst_18 = arith.constant 0.000000e+00 : f32
    %21 = vector.broadcast %cst_18 : f32 to vector<18x1x16xf32>
    %c0_19 = arith.constant 0 : index
    %c24 = arith.constant 24 : index
    %c0_20 = arith.constant 0 : index
    %22 = vector.load %arg13[%c0_19, %c24, %c0_20] : memref<18x25x16xf32, #tpu.memory_space<vmem>>, vector<18x1x16xf32>
    tpu.vector_store %arg13[%c0_19, %c24, %c0_20], %21 {strides = array<i32>} : memref<18x25x16xf32, #tpu.memory_space<vmem>>, vector<18x1x16xf32>,
    %c0_i32 = arith.constant 0 : i32
    %c2_i32 = arith.constant 2 : i32
    %23 = arith.addi %c0_i32, %c2_i32 : i32
    %c1_i32 = arith.constant 1 : i32
    %24 = scf.for %arg15 = %c0_i32 to %23 step %c1_i32 iter_args(%arg16 = %14) -> (vector<256x16xf32>)  : i32 {
      %60 = arith.truncf %arg16 : vector<256x16xf32> to vector<256x16xbf16>
      %61 = arith.index_cast %arg15 : i32 to index
      %c0_44 = arith.constant 0 : index
      %c0_45 = arith.constant 0 : index
      %62 = vector.load %arg6[%61, %c0_44, %c0_45] : memref<2x16x16xbf16, #tpu.memory_space<vmem>>, vector<1x16x16xbf16>
      %63 = vector.shape_cast %62 : vector<1x16x16xbf16> to vector<16x16xbf16>
      %cst_46 = arith.constant dense<0.000000e+00> : vector<256x16xf32>
      %64 = tpu.matmul %60, %63, %cst_46 {dimension_numbers = #tpu.dot_dimension_numbers<[1], [0], [0], [1], [0, 0, 1, 1], [], []>} : vector<256x16xbf16>, vector<16x16xbf16>, vector<256x16xf32> -> vector<256x16xf32>
      %65 = arith.index_cast %arg15 : i32 to index
      %c0_47 = arith.constant 0 : index
      %c0_48 = arith.constant 0 : index
      %66 = vector.load %arg7[%65, %c0_47, %c0_48] : memref<2x1x16xf32, #tpu.memory_space<vmem>>, vector<1x1x16xf32>
      %67 = vector.shape_cast %66 : vector<1x1x16xf32> to vector<1x16xf32>
      %68 = vector.broadcast %67 : vector<1x16xf32> to vector<256x16xf32>
      %69 = arith.addf %64, %68 : vector<256x16xf32>
      %cst_49 = arith.constant 0.000000e+00 : f32
      %70 = vector.broadcast %cst_49 : f32 to vector<256x16xf32>
      %71 = arith.subf %70, %69 : vector<256x16xf32>
      %72 = math.exp %71 : vector<256x16xf32>
      %cst_50 = arith.constant 1.000000e+00 : f32
      %73 = vector.broadcast %cst_50 : f32 to vector<256x16xf32>
      %74 = arith.addf %73, %72 : vector<256x16xf32>
      %75 = tpu.reciprocal %74 {approx = true} : vector<256x16xf32> -> vector<256x16xf32>
      %76 = arith.mulf %69, %75 : vector<256x16xf32>
      %77 = vector.shape_cast %76 : vector<256x16xf32> to vector<16x16x16xf32>
      %c1 = arith.constant 1 : index
      %c8 = arith.constant 8 : index
      %c0_51 = arith.constant 0 : index
      %78 = vector.load %arg13[%c1, %c8, %c0_51] : memref<18x25x16xf32, #tpu.memory_space<vmem>>, vector<16x16x16xf32>
      tpu.vector_store %arg13[%c1, %c8, %c0_51], %77 {strides = array<i32>} : memref<18x25x16xf32, #tpu.memory_space<vmem>>, vector<16x16x16xf32>,
      %c0_52 = arith.constant 0 : index
      %c7_53 = arith.constant 7 : index
      %c0_54 = arith.constant 0 : index
      %79 = vector.load %arg13[%c0_52, %c7_53, %c0_54] : memref<18x25x16xf32, #tpu.memory_space<vmem>>, vector<16x16x16xf32>
      %80 = vector.shape_cast %79 : vector<16x16x16xf32> to vector<256x16xf32>
      %81 = arith.truncf %80 : vector<256x16xf32> to vector<256x16xbf16>
      %c0_55 = arith.constant 0 : index
      %c0_56 = arith.constant 0 : index
      %82 = vector.load %arg14[%c0_55, %c0_56] : memref<256x144xbf16, #tpu.memory_space<vmem>>, vector<256x16xbf16>
      tpu.vector_store %arg14[%c0_55, %c0_56], %81 {strides = array<i32>} : memref<256x144xbf16, #tpu.memory_space<vmem>>, vector<256x16xbf16>,
      %c0_57 = arith.constant 0 : index
      %c8_58 = arith.constant 8 : index
      %c0_59 = arith.constant 0 : index
      %83 = vector.load %arg13[%c0_57, %c8_58, %c0_59] : memref<18x25x16xf32, #tpu.memory_space<vmem>>, vector<16x16x16xf32>
      %84 = vector.shape_cast %83 : vector<16x16x16xf32> to vector<256x16xf32>
      %85 = arith.truncf %84 : vector<256x16xf32> to vector<256x16xbf16>
      %c0_60 = arith.constant 0 : index
      %c16_61 = arith.constant 16 : index
      %86 = vector.load %arg14[%c0_60, %c16_61] : memref<256x144xbf16, #tpu.memory_space<vmem>>, vector<256x16xbf16>
      tpu.vector_store %arg14[%c0_60, %c16_61], %85 {strides = array<i32>} : memref<256x144xbf16, #tpu.memory_space<vmem>>, vector<256x16xbf16>,
      %c0_62 = arith.constant 0 : index
      %c9 = arith.constant 9 : index
      %c0_63 = arith.constant 0 : index
      %87 = vector.load %arg13[%c0_62, %c9, %c0_63] : memref<18x25x16xf32, #tpu.memory_space<vmem>>, vector<16x16x16xf32>
      %88 = vector.shape_cast %87 : vector<16x16x16xf32> to vector<256x16xf32>
      %89 = arith.truncf %88 : vector<256x16xf32> to vector<256x16xbf16>
      %c0_64 = arith.constant 0 : index
      %c32 = arith.constant 32 : index
      %90 = vector.load %arg14[%c0_64, %c32] : memref<256x144xbf16, #tpu.memory_space<vmem>>, vector<256x16xbf16>
      tpu.vector_store %arg14[%c0_64, %c32], %89 {strides = array<i32>} : memref<256x144xbf16, #tpu.memory_space<vmem>>, vector<256x16xbf16>,
      %c1_65 = arith.constant 1 : index
      %c7_66 = arith.constant 7 : index
      %c0_67 = arith.constant 0 : index
      %91 = vector.load %arg13[%c1_65, %c7_66, %c0_67] : memref<18x25x16xf32, #tpu.memory_space<vmem>>, vector<16x16x16xf32>
      %92 = vector.shape_cast %91 : vector<16x16x16xf32> to vector<256x16xf32>
      %93 = arith.truncf %92 : vector<256x16xf32> to vector<256x16xbf16>
      %c0_68 = arith.constant 0 : index
      %c48 = arith.constant 48 : index
      %94 = vector.load %arg14[%c0_68, %c48] : memref<256x144xbf16, #tpu.memory_space<vmem>>, vector<256x16xbf16>
      tpu.vector_store %arg14[%c0_68, %c48], %93 {strides = array<i32>} : memref<256x144xbf16, #tpu.memory_space<vmem>>, vector<256x16xbf16>,
      %c1_69 = arith.constant 1 : index
      %c8_70 = arith.constant 8 : index
      %c0_71 = arith.constant 0 : index
      %95 = vector.load %arg13[%c1_69, %c8_70, %c0_71] : memref<18x25x16xf32, #tpu.memory_space<vmem>>, vector<16x16x16xf32>
      %96 = vector.shape_cast %95 : vector<16x16x16xf32> to vector<256x16xf32>
      %97 = arith.truncf %96 : vector<256x16xf32> to vector<256x16xbf16>
      %c0_72 = arith.constant 0 : index
      %c64 = arith.constant 64 : index
      %98 = vector.load %arg14[%c0_72, %c64] : memref<256x144xbf16, #tpu.memory_space<vmem>>, vector<256x16xbf16>
      tpu.vector_store %arg14[%c0_72, %c64], %97 {strides = array<i32>} : memref<256x144xbf16, #tpu.memory_space<vmem>>, vector<256x16xbf16>,
      %c1_73 = arith.constant 1 : index
      %c9_74 = arith.constant 9 : index
      %c0_75 = arith.constant 0 : index
      %99 = vector.load %arg13[%c1_73, %c9_74, %c0_75] : memref<18x25x16xf32, #tpu.memory_space<vmem>>, vector<16x16x16xf32>
      %100 = vector.shape_cast %99 : vector<16x16x16xf32> to vector<256x16xf32>
      %101 = arith.truncf %100 : vector<256x16xf32> to vector<256x16xbf16>
      %c0_76 = arith.constant 0 : index
      %c80 = arith.constant 80 : index
      %102 = vector.load %arg14[%c0_76, %c80] : memref<256x144xbf16, #tpu.memory_space<vmem>>, vector<256x16xbf16>
      tpu.vector_store %arg14[%c0_76, %c80], %101 {strides = array<i32>} : memref<256x144xbf16, #tpu.memory_space<vmem>>, vector<256x16xbf16>,
      %c2 = arith.constant 2 : index
      %c7_77 = arith.constant 7 : index
      %c0_78 = arith.constant 0 : index
      %103 = vector.load %arg13[%c2, %c7_77, %c0_78] : memref<18x25x16xf32, #tpu.memory_space<vmem>>, vector<16x16x16xf32>
      %104 = vector.shape_cast %103 : vector<16x16x16xf32> to vector<256x16xf32>
      %105 = arith.truncf %104 : vector<256x16xf32> to vector<256x16xbf16>
      %c0_79 = arith.constant 0 : index
      %c96 = arith.constant 96 : index
      %106 = vector.load %arg14[%c0_79, %c96] : memref<256x144xbf16, #tpu.memory_space<vmem>>, vector<256x16xbf16>
      tpu.vector_store %arg14[%c0_79, %c96], %105 {strides = array<i32>} : memref<256x144xbf16, #tpu.memory_space<vmem>>, vector<256x16xbf16>,
      %c2_80 = arith.constant 2 : index
      %c8_81 = arith.constant 8 : index
      %c0_82 = arith.constant 0 : index
      %107 = vector.load %arg13[%c2_80, %c8_81, %c0_82] : memref<18x25x16xf32, #tpu.memory_space<vmem>>, vector<16x16x16xf32>
      %108 = vector.shape_cast %107 : vector<16x16x16xf32> to vector<256x16xf32>
      %109 = arith.truncf %108 : vector<256x16xf32> to vector<256x16xbf16>
      %c0_83 = arith.constant 0 : index
      %c112 = arith.constant 112 : index
      %110 = vector.load %arg14[%c0_83, %c112] : memref<256x144xbf16, #tpu.memory_space<vmem>>, vector<256x16xbf16>
      tpu.vector_store %arg14[%c0_83, %c112], %109 {strides = array<i32>} : memref<256x144xbf16, #tpu.memory_space<vmem>>, vector<256x16xbf16>,
      %c2_84 = arith.constant 2 : index
      %c9_85 = arith.constant 9 : index
      %c0_86 = arith.constant 0 : index
      %111 = vector.load %arg13[%c2_84, %c9_85, %c0_86] : memref<18x25x16xf32, #tpu.memory_space<vmem>>, vector<16x16x16xf32>
      %112 = vector.shape_cast %111 : vector<16x16x16xf32> to vector<256x16xf32>
      %113 = arith.truncf %112 : vector<256x16xf32> to vector<256x16xbf16>
      %c0_87 = arith.constant 0 : index
      %c128 = arith.constant 128 : index
      %114 = vector.load %arg14[%c0_87, %c128] : memref<256x144xbf16, #tpu.memory_space<vmem>>, vector<256x16xbf16>
      tpu.vector_store %arg14[%c0_87, %c128], %113 {strides = array<i32>} : memref<256x144xbf16, #tpu.memory_space<vmem>>, vector<256x16xbf16>,
      %c0_88 = arith.constant 0 : index
      %c0_89 = arith.constant 0 : index
      %115 = vector.load %arg14[%c0_88, %c0_89] : memref<256x144xbf16, #tpu.memory_space<vmem>>, vector<256x144xbf16>
      %116 = arith.index_cast %arg15 : i32 to index
      %c0_90 = arith.constant 0 : index
      %c0_91 = arith.constant 0 : index
      %117 = vector.load %arg8[%116, %c0_90, %c0_91] : memref<2x144x16xbf16, #tpu.memory_space<vmem>>, vector<1x144x16xbf16>
      %118 = vector.shape_cast %117 : vector<1x144x16xbf16> to vector<144x16xbf16>
      %cst_92 = arith.constant dense<0.000000e+00> : vector<256x16xf32>
      %119 = tpu.matmul %115, %118, %cst_92 {dimension_numbers = #tpu.dot_dimension_numbers<[1], [0], [0], [1], [0, 0, 1, 1], [], []>} : vector<256x144xbf16>, vector<144x16xbf16>, vector<256x16xf32> -> vector<256x16xf32>
      %120 = arith.index_cast %arg15 : i32 to index
      %c0_93 = arith.constant 0 : index
      %c0_94 = arith.constant 0 : index
      %121 = vector.load %arg9[%120, %c0_93, %c0_94] : memref<2x1x16xf32, #tpu.memory_space<vmem>>, vector<1x1x16xf32>
      %122 = vector.shape_cast %121 : vector<1x1x16xf32> to vector<1x16xf32>
      %123 = vector.broadcast %122 : vector<1x16xf32> to vector<256x16xf32>
      %124 = arith.addf %119, %123 : vector<256x16xf32>
      %cst_95 = arith.constant 0.000000e+00 : f32
      %125 = vector.broadcast %cst_95 : f32 to vector<256x16xf32>
      %126 = arith.subf %125, %124 : vector<256x16xf32>
      %127 = math.exp %126 : vector<256x16xf32>
      %cst_96 = arith.constant 1.000000e+00 : f32
      %128 = vector.broadcast %cst_96 : f32 to vector<256x16xf32>
      %129 = arith.addf %128, %127 : vector<256x16xf32>
      %130 = tpu.reciprocal %129 {approx = true} : vector<256x16xf32> -> vector<256x16xf32>
      %131 = arith.mulf %124, %130 : vector<256x16xf32>
      %132 = arith.addf %arg16, %131 : vector<256x16xf32>
      scf.yield %132 : vector<256x16xf32>
    }
    %c2_i32_21 = arith.constant 2 : i32
    %c0_22 = arith.constant 0 : index
    %c0_23 = arith.constant 0 : index
    %c0_24 = arith.constant 0 : index
    %25 = vector.load %arg1[%c0_22, %c0_23, %c0_24] : memref<1x256x16xf32, #tpu.memory_space<vmem>>, vector<1x256x16xf32>
    %26 = vector.shape_cast %25 : vector<1x256x16xf32> to vector<256x16xf32>
    %27 = arith.truncf %26 : vector<256x16xf32> to vector<256x16xbf16>
    %c0_25 = arith.constant 0 : index
    %c0_26 = arith.constant 0 : index
    %28 = vector.load %arg4[%c0_25, %c0_26] : memref<16x16xbf16, #tpu.memory_space<vmem>>, vector<16x16xbf16>
    %cst_27 = arith.constant dense<0.000000e+00> : vector<256x16xf32>
    %29 = tpu.matmul %27, %28, %cst_27 {dimension_numbers = #tpu.dot_dimension_numbers<[1], [0], [0], [1], [0, 0, 1, 1], [], []>} : vector<256x16xbf16>, vector<16x16xbf16>, vector<256x16xf32> -> vector<256x16xf32>
    %c0_28 = arith.constant 0 : index
    %c0_29 = arith.constant 0 : index
    %30 = vector.load %arg5[%c0_28, %c0_29] : memref<1x16xf32, #tpu.memory_space<vmem>>, vector<1x16xf32>
    %31 = vector.broadcast %30 : vector<1x16xf32> to vector<256x16xf32>
    %32 = arith.addf %29, %31 : vector<256x16xf32>
    %cst_30 = arith.constant 0.000000e+00 : f32
    %33 = vector.broadcast %cst_30 : f32 to vector<256x16xf32>
    %34 = arith.subf %33, %32 : vector<256x16xf32>
    %35 = math.exp %34 : vector<256x16xf32>
    %cst_31 = arith.constant 1.000000e+00 : f32
    %36 = vector.broadcast %cst_31 : f32 to vector<256x16xf32>
    %37 = arith.addf %36, %35 : vector<256x16xf32>
    %38 = tpu.reciprocal %37 {approx = true} : vector<256x16xf32> -> vector<256x16xf32>
    %39 = arith.mulf %32, %38 : vector<256x16xf32>
    %40 = arith.truncf %24 : vector<256x16xf32> to vector<256x16xbf16>
    %c0_32 = arith.constant 0 : index
    %c0_33 = arith.constant 0 : index
    %41 = vector.load %arg10[%c0_32, %c0_33] : memref<32x32xbf16, #tpu.memory_space<vmem>>, vector<16x32xbf16>
    %cst_34 = arith.constant dense<0.000000e+00> : vector<256x32xf32>
    %42 = tpu.matmul %40, %41, %cst_34 {dimension_numbers = #tpu.dot_dimension_numbers<[1], [0], [0], [1], [0, 0, 1, 1], [], []>} : vector<256x16xbf16>, vector<16x32xbf16>, vector<256x32xf32> -> vector<256x32xf32>
    %43 = arith.truncf %39 : vector<256x16xf32> to vector<256x16xbf16>
    %c16 = arith.constant 16 : index
    %c0_35 = arith.constant 0 : index
    %44 = vector.load %arg10[%c16, %c0_35] : memref<32x32xbf16, #tpu.memory_space<vmem>>, vector<16x32xbf16>
    %cst_36 = arith.constant dense<0.000000e+00> : vector<256x32xf32>
    %45 = tpu.matmul %43, %44, %cst_36 {dimension_numbers = #tpu.dot_dimension_numbers<[1], [0], [0], [1], [0, 0, 1, 1], [], []>} : vector<256x16xbf16>, vector<16x32xbf16>, vector<256x32xf32> -> vector<256x32xf32>
    %46 = arith.addf %42, %45 : vector<256x32xf32>
    %c0_37 = arith.constant 0 : index
    %c0_38 = arith.constant 0 : index
    %47 = vector.load %arg11[%c0_37, %c0_38] : memref<1x32xf32, #tpu.memory_space<vmem>>, vector<1x32xf32>
    %48 = vector.broadcast %47 : vector<1x32xf32> to vector<256x32xf32>
    %49 = arith.addf %46, %48 : vector<256x32xf32>
    %cst_39 = arith.constant 0.000000e+00 : f32
    %50 = vector.broadcast %cst_39 : f32 to vector<256x32xf32>
    %51 = arith.subf %50, %49 : vector<256x32xf32>
    %52 = math.exp %51 : vector<256x32xf32>
    %cst_40 = arith.constant 1.000000e+00 : f32
    %53 = vector.broadcast %cst_40 : f32 to vector<256x32xf32>
    %54 = arith.addf %53, %52 : vector<256x32xf32>
    %55 = tpu.reciprocal %54 {approx = true} : vector<256x32xf32> -> vector<256x32xf32>
    %56 = arith.mulf %49, %55 : vector<256x32xf32>
    %c0_41 = arith.constant 0 : index
    %c0_42 = arith.constant 0 : index
    %c0_43 = arith.constant 0 : index
    %57 = vector.load %arg12[%c0_41, %c0_42, %c0_43] : memref<1x256x32xf32, #tpu.memory_space<vmem>>, vector<1x256x32xf32>
    %58 = vector.shape_cast %57 : vector<1x256x32xf32> to vector<256x32xf32>
    %59 = vector.shape_cast %56 : vector<256x32xf32> to vector<1x256x32xf32>
    tpu.vector_store %arg12[%c0_41, %c0_42, %c0_43], %59 {strides = array<i32>} : memref<1x256x32xf32, #tpu.memory_space<vmem>>, vector<1x256x32xf32>,
    return
  }
  func.func @transform_0(%arg0: i32) -> (i32, i32, i32) {
    %c0_i32 = arith.constant 0 : i32
    %c0_i32_0 = arith.constant 0 : i32
    %c0_i32_1 = arith.constant 0 : i32
    return %arg0, %c0_i32, %c0_i32_0 : i32, i32, i32
  }
  func.func @transform_1(%arg0: i32) -> (i32, i32) {
    %c0_i32 = arith.constant 0 : i32
    %c0_i32_0 = arith.constant 0 : i32
    %c0_i32_1 = arith.constant 0 : i32
    return %c0_i32, %c0_i32_0 : i32, i32
  }
  func.func @transform_2(%arg0: i32) -> (i32, i32) {
    %c0_i32 = arith.constant 0 : i32
    %c0_i32_0 = arith.constant 0 : i32
    %c0_i32_1 = arith.constant 0 : i32
    return %c0_i32, %c0_i32_0 : i32, i32
  }
  func.func @transform_3(%arg0: i32) -> (i32, i32) {
    %c0_i32 = arith.constant 0 : i32
    %c0_i32_0 = arith.constant 0 : i32
    %c0_i32_1 = arith.constant 0 : i32
    return %c0_i32, %c0_i32_0 : i32, i32
  }
  func.func @transform_4(%arg0: i32) -> (i32, i32) {
    %c0_i32 = arith.constant 0 : i32
    %c0_i32_0 = arith.constant 0 : i32
    %c0_i32_1 = arith.constant 0 : i32
    return %c0_i32, %c0_i32_0 : i32, i32
  }
  func.func @transform_5(%arg0: i32) -> (i32, i32, i32) {
    %c0_i32 = arith.constant 0 : i32
    %c0_i32_0 = arith.constant 0 : i32
    %c0_i32_1 = arith.constant 0 : i32
    %c0_i32_2 = arith.constant 0 : i32
    return %c0_i32, %c0_i32_0, %c0_i32_1 : i32, i32, i32
  }
  func.func @transform_6(%arg0: i32) -> (i32, i32, i32) {
    %c0_i32 = arith.constant 0 : i32
    %c0_i32_0 = arith.constant 0 : i32
    %c0_i32_1 = arith.constant 0 : i32
    %c0_i32_2 = arith.constant 0 : i32
    return %c0_i32, %c0_i32_0, %c0_i32_1 : i32, i32, i32
  }
  func.func @transform_7(%arg0: i32) -> (i32, i32, i32) {
    %c0_i32 = arith.constant 0 : i32
    %c0_i32_0 = arith.constant 0 : i32
    %c0_i32_1 = arith.constant 0 : i32
    %c0_i32_2 = arith.constant 0 : i32
    return %c0_i32, %c0_i32_0, %c0_i32_1 : i32, i32, i32
  }
  func.func @transform_8(%arg0: i32) -> (i32, i32, i32) {
    %c0_i32 = arith.constant 0 : i32
    %c0_i32_0 = arith.constant 0 : i32
    %c0_i32_1 = arith.constant 0 : i32
    %c0_i32_2 = arith.constant 0 : i32
    return %c0_i32, %c0_i32_0, %c0_i32_1 : i32, i32, i32
  }
  func.func @transform_9(%arg0: i32) -> (i32, i32) {
    %c0_i32 = arith.constant 0 : i32
    %c0_i32_0 = arith.constant 0 : i32
    %c0_i32_1 = arith.constant 0 : i32
    return %c0_i32, %c0_i32_0 : i32, i32
  }
  func.func @transform_10(%arg0: i32) -> (i32, i32) {
    %c0_i32 = arith.constant 0 : i32
    %c0_i32_0 = arith.constant 0 : i32
    %c0_i32_1 = arith.constant 0 : i32
    return %c0_i32, %c0_i32_0 : i32, i32
  }
  func.func @transform_11(%arg0: i32) -> (i32, i32, i32) {
    %c0_i32 = arith.constant 0 : i32
    %c0_i32_0 = arith.constant 0 : i32
    %c0_i32_1 = arith.constant 0 : i32
    return %arg0, %c0_i32, %c0_i32_0 : i32, i32, i32
  }
}

</mosaic_0001>

<bundles_post_ra>
// kernel: tpu_custom_call.1
= control target key start
LH: loop header
LB: loop body
LE: loop exit
PB: predicated region body
PF: predicated region fallthrough
CT: control target
= control target key end

     0   :  { %s7975_s17 = smov 0   ;;  %s10560_s0 = inlined_call_operand.vmem [shape: f32[2,256,16], index: 0, kind: input, shape index: {}]   ;;  %s10561_s1 = inlined_call_operand.vmem [shape: bf16[16,16], index: 1, kind: input, shape index: {}]   ;;  %s10562_s2 = inlined_call_operand.vmem [shape: f32[1,16], index: 2, kind: input, shape index: {}]   ;;  %s10563_s3 = inlined_call_operand.vmem [shape: bf16[16,16], index: 3, kind: input, shape index: {}]   ;;  %s10564_s4 = inlined_call_operand.vmem [shape: f32[1,16], index: 4, kind: input, shape index: {}]   ;;  %s10565_s5 = inlined_call_operand.vmem [shape: bf16[2,16,16], index: 5, kind: input, shape index: {}]   ;;  %s10566_s6 = inlined_call_operand.vmem [shape: f32[2,1,16], index: 6, kind: input, shape index: {}]   ;;  %s10567_s7 = inlined_call_operand.vmem [shape: bf16[2,144,16], index: 7, kind: input, shape index: {}]   ;;  %s10568_s8 = inlined_call_operand.vmem [shape: f32[2,1,16], index: 8, kind: input, shape index: {}]   ;;  %s10569_s9 = inlined_call_operand.vmem [shape: bf16[32,32], index: 9, kind: input, shape index: {}]   ;;  %s10570_s10 = inlined_call_operand.vmem [shape: f32[1,32], index: 10, kind: input, shape index: {}]   ;;  %s10571_s11 = inlined_call_operand.vmem [shape: f32[2,256,32], index: 11, kind: output, shape index: {}]  }
   0x1 LB: > { %s5639_s18 = sadd.s32 4294967295, %s7772_s17   ;;  %p5643_p0 = scmp.ge.s32.totalorder %s7772_s17, 1  ;;  %s7772_s17 = sphi %s7975_s17, %s21_s17  }
   0x2   : > { %p337_p1 = scmp.lt.s32.totalorder %s7772_s17, 3 }
   0x4   : > { %p338_p2 = pnand %p5643_p0, %p337_p1 }
   0x6   : > { %341 = sbr.rel (%p338_p2) target bundleno = 1899 (0x76b), region = 64 }
   0xb   : > { %v6938_v0 = vld [vmem:[%s10561_s1] sm:$0xff]   ;;  %p377_p3 = scmp.lt.s32.totalorder %s5639_s18, 1  ;;  %vm451_vm0 = vcmask 130048   ;;  %vm856_vm1 = vcmask 122880   ;;  %v7906_v1 = vmov 0.0   ;;  %s8368_s30 = smov 0  }
   0xc   : > { %6465 = vmatprep.subr.bf16.mxu0 %v6938_v0  ;;  %6635 = vmatprep.subr.bf16.mxu1 %v6938_v0  ;;  %853 = vst.msk [vmem:[#allocation2] sm:$0xff] %vm451_vm0, %v7906_v1  ;;  %854 = vst.msk [vmem:[#allocation2 + $0x8] sm:$0xff] %vm451_vm0, %v7906_v1  ;;  %v8094_v50 = vld [vmem:[%s10562_s2] ss:$0 sm:$0xff] }
   0xd   : > { %s10690_s18 = smov (!%p377_p3, %s5639_s18), 1  ;;  %855 = vst.msk [vmem:[#allocation2 + $0x10] sm:$0xff] %vm451_vm0, %v7906_v1  ;;  %859 = vst.msk [vmem:[#allocation2 + $0x220] sm:$0xff] %vm451_vm0, %v7906_v1  ;;  %6466 = vmatpush3.bf16.msra.mxu0 %v6938_v0  ;;  %6636 = vmatpush3.bf16.msra.mxu1 %v6938_v0 }
   0xe   : > { %857 = vst.msk [vmem:[#allocation2 + $0x18] sm:$0x1] %vm856_vm1, %v7906_v1  ;;  %862 = vst.msk [vmem:[#allocation2 + $0x238] sm:$0x1] %vm856_vm1, %v7906_v1  ;;  %s6088_s21 = sshll.u32 %s10690_s18, 8 }
   0xf   : > { %860 = vst.msk [vmem:[#allocation2 + $0x228] sm:$0xff] %vm451_vm0, %v7906_v1  ;;  %861 = vst.msk [vmem:[#allocation2 + $0x230] sm:$0xff] %vm451_vm0, %v7906_v1  ;;  %s8036_s24 = scalar_lea.vmem %s10560_s0, %s6088_s21  ;;  %s8041_s27 = scalar_lea.vmem %s10571_s11, %s6088_s21 }
  0x10   : > { %864 = vst.msk [vmem:[#allocation2 + $0x27] sm:$0x1] %vm856_vm1, %v7906_v1  ;;  %865 = vst.msk [vmem:[#allocation2 + $0x47] sm:$0x1] %vm856_vm1, %v7906_v1  ;;  %v388_v2 = vld [vmem:[%s8036_s24] sm:$0xff]  ;;  %v389_v3 = vld [vmem:[%s8036_s24 + $0x8] sm:$0xff] }
  0x11   : > { %866 = vst.msk [vmem:[#allocation2 + $0x67] sm:$0x1] %vm856_vm1, %v7906_v1  ;;  %867 = vst.msk [vmem:[#allocation2 + $0x87] sm:$0x1] %vm856_vm1, %v7906_v1  ;;  %v404_v4 = vld [vmem:[%s8036_s24 + $0x80] sm:$0xff]  ;;  %v420_v5 = vpack.c.bf16 %v389_v3, %v388_v2  ;;  %v405_v6 = vld [vmem:[%s8036_s24 + $0x88] sm:$0xff] }
  0x12   : > { %868 = vst.msk [vmem:[#allocation2 + $0xa7] sm:$0x1] %vm856_vm1, %v7906_v1  ;;  %869 = vst.msk [vmem:[#allocation2 + $0xc7] sm:$0x1] %vm856_vm1, %v7906_v1  ;;  %v390_v7 = vld [vmem:[%s8036_s24 + $0x10] sm:$0xff]  ;;  %v391_v8 = vld [vmem:[%s8036_s24 + $0x18] sm:$0xff]  ;;  %v428_v9 = vpack.c.bf16 %v405_v6, %v404_v4 }
  0x13   : > { %870 = vst.msk [vmem:[#allocation2 + $0xe7] sm:$0x1] %vm856_vm1, %v7906_v1  ;;  %871 = vst.msk [vmem:[#allocation2 + $0x107] sm:$0x1] %vm856_vm1, %v7906_v1  ;;  %v421_v10 = vpack.c.bf16 %v391_v8, %v390_v7  ;;  %v406_v11 = vld [vmem:[%s8036_s24 + $0x90] sm:$0xff]  ;;  %v407_v12 = vld [vmem:[%s8036_s24 + $0x98] sm:$0xff]  ;;  %6467 = vmatprep.mubr.msk.bf16.mxu0 %vm451_vm0, %v420_v5 }
  0x14   : > { %872 = vst.msk [vmem:[#allocation2 + $0x127] sm:$0x1] %vm856_vm1, %v7906_v1  ;;  %873 = vst.msk [vmem:[#allocation2 + $0x147] sm:$0x1] %vm856_vm1, %v7906_v1  ;;  %v392_v13 = vld [vmem:[%s8036_s24 + $0x20] sm:$0xff]  ;;  %v429_v14 = vpack.c.bf16 %v407_v12, %v406_v11  ;;  %v393_v15 = vld [vmem:[%s8036_s24 + $0x28] sm:$0xff]  ;;  %6483 = vmatprep.mubr.msk.bf16.mxu1 %vm451_vm0, %v428_v9 }
  0x15   : > { %874 = vst.msk [vmem:[#allocation2 + $0x167] sm:$0x1] %vm856_vm1, %v7906_v1  ;;  %875 = vst.msk [vmem:[#allocation2 + $0x187] sm:$0x1] %vm856_vm1, %v7906_v1  ;;  %v408_v16 = vld [vmem:[%s8036_s24 + $0xa0] sm:$0xff]  ;;  %v409_v17 = vld [vmem:[%s8036_s24 + $0xa8] sm:$0xff]  ;;  %6468 = vmatmul.mubr.msk.bf16.vlgmr.msra.gmra.mxu0 %vm451_vm0, %v421_v10  ;;  %v422_v18 = vpack.c.bf16 %v393_v15, %v392_v13 }
  0x16   : > { %876 = vst.msk [vmem:[#allocation2 + $0x1a7] sm:$0x1] %vm856_vm1, %v7906_v1  ;;  %877 = vst.msk [vmem:[#allocation2 + $0x1c7] sm:$0x1] %vm856_vm1, %v7906_v1  ;;  %v430_v19 = vpack.c.bf16 %v409_v17, %v408_v16  ;;  %6484 = vmatmul.mubr.msk.bf16.vlgmr.msra.gmra.mxu1 %vm451_vm0, %v429_v14  ;;  %v394_v20 = vld [vmem:[%s8036_s24 + $0x30] sm:$0xff]  ;;  %v395_v21 = vld [vmem:[%s8036_s24 + $0x38] sm:$0xff] }
  0x17   : > { %878 = vst.msk [vmem:[#allocation2 + $0x1e7] sm:$0x1] %vm856_vm1, %v7906_v1  ;;  %879 = vst.msk [vmem:[#allocation2 + $0x207] sm:$0x1] %vm856_vm1, %v7906_v1  ;;  %v410_v22 = vld [vmem:[%s8036_s24 + $0xb0] sm:$0xff]  ;;  %6471 = vmatprep.mubr.msk.bf16.mxu0 %vm451_vm0, %v422_v18  ;;  %v411_v23 = vld [vmem:[%s8036_s24 + $0xb8] sm:$0xff]  ;;  %v423_v28 = vpack.c.bf16 %v395_v21, %v394_v20 }
  0x18   : > { %882 = vst.msk [vmem:[#allocation2 + $0x38] sm:$0x1] %vm856_vm1, %v7906_v1  ;;  %883 = vst.msk [vmem:[#allocation2 + $0x58] sm:$0x1] %vm856_vm1, %v7906_v1  ;;  %6487 = vmatprep.mubr.msk.bf16.mxu1 %vm451_vm0, %v430_v19  ;;  %v396_v24 = vld [vmem:[%s8036_s24 + $0x40] sm:$0xff]  ;;  %v397_v25 = vld [vmem:[%s8036_s24 + $0x48] sm:$0xff]  ;;  %v431_v29 = vpack.c.bf16 %v411_v23, %v410_v22 }
  0x19   : > { %884 = vst.msk [vmem:[#allocation2 + $0x78] sm:$0x1] %vm856_vm1, %v7906_v1  ;;  %885 = vst.msk [vmem:[#allocation2 + $0x98] sm:$0x1] %vm856_vm1, %v7906_v1  ;;  %v412_v26 = vld [vmem:[%s8036_s24 + $0xc0] sm:$0xff]  ;;  %v413_v27 = vld [vmem:[%s8036_s24 + $0xc8] sm:$0xff]  ;;  %v424_v30 = vpack.c.bf16 %v397_v25, %v396_v24 }
  0x1a   : > { %886 = vst.msk [vmem:[#allocation2 + $0xb8] sm:$0x1] %vm856_vm1, %v7906_v1  ;;  %887 = vst.msk [vmem:[#allocation2 + $0xd8] sm:$0x1] %vm856_vm1, %v7906_v1  ;;  %v432_v31 = vpack.c.bf16 %v413_v27, %v412_v26  ;;  %v398_v32 = vld [vmem:[%s8036_s24 + $0x50] sm:$0xff]  ;;  %v399_v33 = vld [vmem:[%s8036_s24 + $0x58] sm:$0xff] }
  0x1b   : > { %888 = vst.msk [vmem:[#allocation2 + $0xf8] sm:$0x1] %vm856_vm1, %v7906_v1  ;;  %889 = vst.msk [vmem:[#allocation2 + $0x118] sm:$0x1] %vm856_vm1, %v7906_v1  ;;  %v414_v34 = vld [vmem:[%s8036_s24 + $0xd0] sm:$0xff]  ;;  %v415_v35 = vld [vmem:[%s8036_s24 + $0xd8] sm:$0xff]  ;;  %v425_v40 = vpack.c.bf16 %v399_v33, %v398_v32 }
  0x1c   : > { %890 = vst.msk [vmem:[#allocation2 + $0x138] sm:$0x1] %vm856_vm1, %v7906_v1  ;;  %891 = vst.msk [vmem:[#allocation2 + $0x158] sm:$0x1] %vm856_vm1, %v7906_v1  ;;  %v400_v36 = vld [vmem:[%s8036_s24 + $0x60] sm:$0xff]  ;;  %v401_v37 = vld [vmem:[%s8036_s24 + $0x68] sm:$0xff]  ;;  %v433_v41 = vpack.c.bf16 %v415_v35, %v414_v34 }
  0x1d   : > { %892 = vst.msk [vmem:[#allocation2 + $0x178] sm:$0x1] %vm856_vm1, %v7906_v1  ;;  %893 = vst.msk [vmem:[#allocation2 + $0x198] sm:$0x1] %vm856_vm1, %v7906_v1  ;;  %6472 = vmatmul.mubr.msk.bf16.gmra.mxu0 %vm451_vm0, %v423_v28  ;;  %v416_v38 = vld [vmem:[%s8036_s24 + $0xe0] sm:$0xff]  ;;  %v417_v39 = vld [vmem:[%s8036_s24 + $0xe8] sm:$0xff]  ;;  %v426_v42 = vpack.c.bf16 %v401_v37, %v400_v36 }
  0x1e   : > { %894 = vst.msk [vmem:[#allocation2 + $0x1b8] sm:$0x1] %vm856_vm1, %v7906_v1  ;;  %895 = vst.msk [vmem:[#allocation2 + $0x1d8] sm:$0x1] %vm856_vm1, %v7906_v1  ;;  %6488 = vmatmul.mubr.msk.bf16.gmra.mxu1 %vm451_vm0, %v431_v29  ;;  %6475 = vmatprep.mubr.msk.bf16.mxu0 %vm451_vm0, %v424_v30  ;;  %v434_v43 = vpack.c.bf16 %v417_v39, %v416_v38  ;;  %v402_v44 = vld [vmem:[%s8036_s24 + $0x70] sm:$0xff]  ;;  %v403_v45 = vld [vmem:[%s8036_s24 + $0x78] sm:$0xff] }
  0x1f   : > { %896 = vst.msk [vmem:[#allocation2 + $0x1f8] sm:$0x1] %vm856_vm1, %v7906_v1  ;;  %897 = vst.msk [vmem:[#allocation2 + $0x218] sm:$0x1] %vm856_vm1, %v7906_v1  ;;  %6491 = vmatprep.mubr.msk.bf16.mxu1 %vm451_vm0, %v432_v31  ;;  %v418_v46 = vld [vmem:[%s8036_s24 + $0xf0] sm:$0xff]  ;;  %v419_v47 = vld [vmem:[%s8036_s24 + $0xf8] sm:$0xff]  ;;  %v427_v48 = vpack.c.bf16 %v403_v45, %v402_v44 }
  0x20   : > { %863 = vst.msk [vmem:[#allocation2 + $0x7] sm:$0x1] %vm856_vm1, %v7906_v1  ;;  %880 = vst.msk [vmem:[#allocation2 + $0x227] sm:$0x1] %vm856_vm1, %v7906_v1  ;;  %v435_v49 = vpack.c.bf16 %v419_v47, %v418_v46 }
  0x21   : > { %881 = vst.msk [vmem:[#allocation2 + $0x18] sm:$0x1] %vm856_vm1, %v7906_v1  ;;  %898 = vst.msk [vmem:[#allocation2 + $0x238] sm:$0x1] %vm856_vm1, %v7906_v1 }
  0x25   : > { %6476 = vmatmul.mubr.msk.bf16.gmra.mxu0 %vm451_vm0, %v425_v40 }
  0x26   : > { %6492 = vmatmul.mubr.msk.bf16.gmra.mxu1 %vm451_vm0, %v433_v41  ;;  %6479 = vmatprep.mubr.msk.bf16.mxu0 %vm451_vm0, %v426_v42 }
  0x27   : > { %6495 = vmatprep.mubr.msk.bf16.mxu1 %vm451_vm0, %v434_v43 }
  0x2d   : > { %6480 = vmatmul.mubr.msk.bf16.gmra.mxu0 %vm451_vm0, %v427_v48 }
  0x2e   : > { %6496 = vmatmul.mubr.msk.bf16.gmra.mxu1 %vm451_vm0, %v435_v49 }
  0xd5   : > { %v6469_v51 = vpop.f32.mrf.mxu0 }
  0xd6   : > { %v8097_v52 = vadd.f32 %v6469_v51, %v8094_v50  ;;  %v6485_v53 = vpop.f32.mrf.mxu1 }
  0xd7   : > { %v8100_v54 = vadd.f32 %v6485_v53, %v8094_v50  ;;  %v534_v55 = vpop.f32.mrf.mxu0 }
  0xd8   : > { %v663_v56 = vsub.f32 0.0, %v8097_v52  ;;  %v8104_v57 = vadd.f32 %v8094_v50, %v534_v55  ;;  %v598_v58 = vpop.f32.mrf.mxu1 }
  0xd9   : > { %v679_v59 = vsub.f32 0.0, %v8100_v54  ;;  %v8108_v60 = vadd.f32 %v8094_v50, %v598_v58  ;;  %v6470_v61 = vpop.f32.mrf.mxu0 }
  0xda   : > { %v697_v62 = vmul.f32 1.442695, %v663_v56  ;;  %v661_v63 = vsub.f32 0.0, %v8104_v57  ;;  %v8112_v0 = vadd.f32 %v6470_v61, %v8094_v50  ;;  %v6486_v1 = vpop.f32.mrf.mxu1 }
  0xdb   : > { %v729_v2 = vmul.f32 1.442695, %v679_v59  ;;  %v677_v3 = vsub.f32 0.0, %v8108_v60  ;;  %v8116_v4 = vadd.f32 %v6486_v1, %v8094_v50  ;;  %v537_v5 = vpop.f32.mrf.mxu0 }
  0xdc   : > { %6939 = vpow2.f32 %v697_v62  ;;  %v693_v6 = vmul.f32 1.442695, %v661_v63  ;;  %v664_v7 = vsub.f32 0.0, %v8112_v0  ;;  %v8120_v8 = vadd.f32 %v8094_v50, %v537_v5  ;;  %v601_v9 = vpop.f32.mrf.mxu1 }
  0xdd   : > { %6941 = vpow2.f32 %v729_v2  ;;  %v725_v10 = vmul.f32 1.442695, %v677_v3  ;;  %v680_v11 = vsub.f32 0.0, %v8116_v4  ;;  %v8124_v12 = vadd.f32 %v8094_v50, %v601_v9  ;;  %v6473_v13 = vpop.f32.mrf.mxu0 }
  0xde   : > { %6943 = vpow2.f32 %v693_v6  ;;  %v699_v14 = vmul.f32 1.442695, %v664_v7  ;;  %v662_v15 = vsub.f32 0.0, %v8120_v8  ;;  %v8128_v16 = vadd.f32 %v6473_v13, %v8094_v50  ;;  %v6489_v17 = vpop.f32.mrf.mxu1 }
  0xdf   : > { %6945 = vpow2.f32 %v725_v10  ;;  %v731_v18 = vmul.f32 1.442695, %v680_v11  ;;  %v678_v19 = vsub.f32 0.0, %v8124_v12  ;;  %v8132_v20 = vadd.f32 %v6489_v17, %v8094_v50  ;;  %v550_v21 = vpop.f32.mrf.mxu0 }
  0xe0   : > { %6947 = vpow2.f32 %v699_v14  ;;  %v695_v22 = vmul.f32 1.442695, %v662_v15  ;;  %v667_v23 = vsub.f32 0.0, %v8128_v16  ;;  %v8136_v24 = vadd.f32 %v8094_v50, %v550_v21  ;;  %v614_v25 = vpop.f32.mrf.mxu1 }
  0xe1   : > { %6949 = vpow2.f32 %v731_v18  ;;  %v727_v26 = vmul.f32 1.442695, %v678_v19  ;;  %v683_v27 = vsub.f32 0.0, %v8132_v20  ;;  %v8140_v28 = vadd.f32 %v8094_v50, %v614_v25  ;;  %v6474_v29 = vpop.f32.mrf.mxu0 }
  0xe2   : > { %6951 = vpow2.f32 %v695_v22  ;;  %v705_v30 = vmul.f32 1.442695, %v667_v23  ;;  %v665_v31 = vsub.f32 0.0, %v8136_v24  ;;  %v8144_v32 = vadd.f32 %v6474_v29, %v8094_v50  ;;  %v6490_v33 = vpop.f32.mrf.mxu1 }
  0xe3   : > { %6953 = vpow2.f32 %v727_v26  ;;  %v737_v34 = vmul.f32 1.442695, %v683_v27  ;;  %v681_v35 = vsub.f32 0.0, %v8140_v28  ;;  %v8148_v36 = vadd.f32 %v6490_v33, %v8094_v50  ;;  %v553_v37 = vpop.f32.mrf.mxu0 }
  0xe4   : > { %6955 = vpow2.f32 %v705_v30  ;;  %v701_v38 = vmul.f32 1.442695, %v665_v31  ;;  %v668_v39 = vsub.f32 0.0, %v8144_v32  ;;  %v8152_v40 = vadd.f32 %v8094_v50, %v553_v37  ;;  %v617_v41 = vpop.f32.mrf.mxu1 }
  0xe5   : > { %6957 = vpow2.f32 %v737_v34  ;;  %v733_v42 = vmul.f32 1.442695, %v681_v35  ;;  %v684_v43 = vsub.f32 0.0, %v8148_v36  ;;  %v8156_v44 = vadd.f32 %v8094_v50, %v617_v41  ;;  %v6477_v45 = vpop.f32.mrf.mxu0 }
  0xe6   : > { %6959 = vpow2.f32 %v701_v38  ;;  %v707_v46 = vmul.f32 1.442695, %v668_v39  ;;  %v666_v47 = vsub.f32 0.0, %v8152_v40  ;;  %v6493_v48 = vpop.f32.mrf.mxu1  ;;  %v8161_v9 = vadd.f32 %v6477_v45, %v8094_v50 }
  0xe7   : > { %6961 = vpow2.f32 %v733_v42  ;;  %v739_v49 = vmul.f32 1.442695, %v684_v43  ;;  %v682_v51 = vsub.f32 0.0, %v8156_v44  ;;  %v566_v53 = vpop.f32.mrf.mxu0  ;;  %v8164_v14 = vadd.f32 %v6493_v48, %v8094_v50 }
  0xe8   : > { %6963 = vpow2.f32 %v707_v46  ;;  %v703_v55 = vmul.f32 1.442695, %v666_v47  ;;  %v630_v56 = vpop.f32.mrf.mxu1  ;;  %v8167_v18 = vadd.f32 %v8094_v50, %v566_v53  ;;  %v671_v27 = vsub.f32 0.0, %v8161_v9 }
  0xe9   : > { %v6940_v58 = vpop.eup %6939  ;;  %6965 = vpow2.f32 %v739_v49  ;;  %v735_v59 = vmul.f32 1.442695, %v682_v51  ;;  %v6478_v61 = vpop.f32.mrf.mxu0  ;;  %v8170_v22 = vadd.f32 %v8094_v50, %v630_v56  ;;  %v687_v34 = vsub.f32 0.0, %v8164_v14 }
  0xea   : > { %v6942_v62 = vpop.eup %6941  ;;  %v759_v63 = vadd.f32 1.0, %v6940_v58  ;;  %6967 = vpow2.f32 %v703_v55  ;;  %v6494_v1 = vpop.f32.mrf.mxu1  ;;  %v8174_v29 = vadd.f32 %v6478_v61, %v8094_v50  ;;  %v669_v39 = vsub.f32 0.0, %v8167_v18 }
  0xeb   : > { %v6944_v2 = vpop.eup %6943  ;;  %v775_v3 = vadd.f32 1.0, %v6942_v62  ;;  %6969 = vpow2.f32 %v735_v59  ;;  %v569_v5 = vpop.f32.mrf.mxu0  ;;  %v8178_v35 = vadd.f32 %v6494_v1, %v8094_v50  ;;  %v685_v45 = vsub.f32 0.0, %v8170_v22 }
  0xec   : > { %v6946_v6 = vpop.eup %6945  ;;  %6971 = vrcp.f32 %v759_v63  ;;  %v757_v7 = vadd.f32 1.0, %v6944_v2  ;;  %v633_v10 = vpop.f32.mrf.mxu1  ;;  %v8182_v41 = vadd.f32 %v8094_v50, %v569_v5  ;;  %v713_v51 = vmul.f32 1.442695, %v671_v27 }
  0xed   : > { %v6948_v11 = vpop.eup %6947  ;;  %6973 = vrcp.f32 %v775_v3  ;;  %v773_v13 = vadd.f32 1.0, %v6946_v6  ;;  %v6481_v23 = vpop.f32.mrf.mxu0  ;;  %v8186_v46 = vadd.f32 %v8094_v50, %v633_v10  ;;  %v672_v53 = vsub.f32 0.0, %v8174_v29 }
  0xee   : > { %v6950_v15 = vpop.eup %6949  ;;  %6975 = vrcp.f32 %v757_v7  ;;  %v760_v17 = vadd.f32 1.0, %v6948_v11  ;;  %v6497_v30 = vpop.f32.mrf.mxu1  ;;  %v745_v59 = vmul.f32 1.442695, %v687_v34  ;;  %v688_v61 = vsub.f32 0.0, %v8178_v35 }
  0xef   : > { %v6952_v19 = vpop.eup %6951  ;;  %6977 = vrcp.f32 %v773_v13  ;;  %v776_v21 = vadd.f32 1.0, %v6950_v15  ;;  %v582_v47 = vpop.f32.mrf.mxu0  ;;  %v709_v1 = vmul.f32 1.442695, %v669_v39  ;;  %v670_v2 = vsub.f32 0.0, %v8182_v41 }
  0xf0   : > { %v6954_v25 = vpop.eup %6953  ;;  %6979 = vrcp.f32 %v760_v17  ;;  %v758_v26 = vadd.f32 1.0, %v6952_v19  ;;  %v646_v55 = vpop.f32.mrf.mxu1  ;;  %v741_v6 = vmul.f32 1.442695, %v685_v45  ;;  %v686_v7 = vsub.f32 0.0, %v8186_v46 }
  0xf1   : > { %v6956_v31 = vpop.eup %6955  ;;  %6981 = vrcp.f32 %v776_v21  ;;  %v774_v33 = vadd.f32 1.0, %v6954_v25  ;;  %v6482_v10 = vpop.f32.mrf.mxu0  ;;  %v715_v15 = vmul.f32 1.442695, %v672_v53  ;;  %v8193_v17 = vadd.f32 %v6481_v23, %v8094_v50 }
  0xf2   : > { %v6958_v37 = vpop.eup %6957  ;;  %6983 = vrcp.f32 %v758_v26  ;;  %v763_v38 = vadd.f32 1.0, %v6956_v31  ;;  %v6498_v19 = vpop.f32.mrf.mxu1  ;;  %v747_v26 = vmul.f32 1.442695, %v688_v61  ;;  %v8196_v27 = vadd.f32 %v6497_v30, %v8094_v50 }
  0xf3   : > { %v6960_v42 = vpop.eup %6959  ;;  %6985 = vrcp.f32 %v774_v33  ;;  %v779_v43 = vadd.f32 1.0, %v6958_v37  ;;  %v711_v34 = vmul.f32 1.442695, %v670_v2  ;;  %v8202_v37 = vadd.f32 %v8094_v50, %v582_v47  ;;  %v585_v30 = vpop.f32.mrf.mxu0 }
  0xf4   : > { %v6962_v48 = vpop.eup %6961  ;;  %6987 = vrcp.f32 %v763_v38  ;;  %v761_v49 = vadd.f32 1.0, %v6960_v42  ;;  %v743_v39 = vmul.f32 1.442695, %v686_v7  ;;  %v8208_v42 = vadd.f32 %v8094_v50, %v646_v55 }
  0xf5   : > { %v6964_v56 = vpop.eup %6963  ;;  %6989 = vrcp.f32 %v779_v43  ;;  %v777_v58 = vadd.f32 1.0, %v6962_v48  ;;  %v8215_v47 = vadd.f32 %v6482_v10, %v8094_v50  ;;  %v649_v48 = vpop.f32.mrf.mxu1  ;;  %v691_v53 = vsub.f32 0.0, %v8196_v27 }
  0xf6   : > { %v6966_v62 = vpop.eup %6965  ;;  %6991 = vrcp.f32 %v761_v49  ;;  %v764_v63 = vadd.f32 1.0, %v6964_v56  ;;  %v8222_v55 = vadd.f32 %v6498_v19, %v8094_v50 }
  0xf7   : > { %v6968_v3 = vpop.eup %6967  ;;  %6993 = vrcp.f32 %v777_v58  ;;  %v780_v5 = vadd.f32 1.0, %v6966_v62  ;;  %v8229_v58 = vadd.f32 %v8094_v50, %v585_v30  ;;  %v8236_v62 = vadd.f32 %v8094_v50, %v649_v48 }
  0xf8   : > { %v6970_v11 = vpop.eup %6969  ;;  %6995 = vrcp.f32 %v764_v63  ;;  %v762_v13 = vadd.f32 1.0, %v6968_v3  ;;  %v676_v2 = vsub.f32 0.0, %v8215_v47 }
  0xf9   : > { %v6972_v21 = vpop.eup %6971  ;;  %6997 = vrcp.f32 %v780_v5  ;;  %v778_v25 = vadd.f32 1.0, %v6970_v11 }
  0xfa   : > { %v6974_v31 = vpop.eup %6973  ;;  %v8199_v33 = vmul.f32 %v6972_v21, %v8097_v52   ;;  %6999 = vrcp.f32 %v762_v13  ;;  %v675_v52 = vsub.f32 0.0, %v8193_v17 }
  0xfb   : > { %v6976_v38 = vpop.eup %6975  ;;  %v8205_v23 = vmul.f32 %v6974_v31, %v8100_v54   ;;  %7001 = vrcp.f32 %v778_v25  ;;  %v723_v25 = vmul.f32 1.442695, %v676_v2 }
  0xfc   : > { %v6978_v43 = vpop.eup %6977  ;;  %v8211_v45 = vmul.f32 %v6976_v38, %v8104_v57   ;;  %7003 = vpow2.f32 %v713_v51  ;;  %v673_v51 = vsub.f32 0.0, %v8202_v37 }
  0xfd   : > { %v6980_v49 = vpop.eup %6979  ;;  %v8218_v54 = vmul.f32 %v6978_v43, %v8108_v60   ;;  %7005 = vpow2.f32 %v745_v59  ;;  %v689_v59 = vsub.f32 0.0, %v8208_v42 }
  0xfe   : > { %v6982_v56 = vpop.eup %6981  ;;  %v8225_v57 = vmul.f32 %v6980_v49, %v8112_v0   ;;  %7007 = vpow2.f32 %v709_v1  ;;  %v721_v1 = vmul.f32 1.442695, %v675_v52  ;;  %v717_v10 = vmul.f32 1.442695, %v673_v51 }
  0xff   : > { %v6984_v61 = vpop.eup %6983  ;;  %v8232_v60 = vmul.f32 %v6982_v56, %v8116_v4   ;;  %7009 = vpow2.f32 %v741_v6  ;;  %v753_v4 = vmul.f32 1.442695, %v691_v53  ;;  %v692_v6 = vsub.f32 0.0, %v8222_v55 }
 0x100   : > { %v6986_v63 = vpop.eup %6985  ;;  %v8239_v0 = vmul.f32 %v6984_v61, %v8120_v8   ;;  %7011 = vpow2.f32 %v715_v15  ;;  %v674_v8 = vsub.f32 0.0, %v8229_v58  ;;  %v749_v15 = vmul.f32 1.442695, %v689_v59 }
 0x101   : > { %v6988_v3 = vpop.eup %6987  ;;  %v8243_v5 = vmul.f32 %v6986_v63, %v8124_v12   ;;  %7013 = vpow2.f32 %v747_v26  ;;  %v690_v12 = vsub.f32 0.0, %v8236_v62  ;;  %v755_v31 = vmul.f32 1.442695, %v692_v6 }
 0x102   : > { %v6990_v7 = vpop.eup %6989  ;;  %v8247_v50 = vmul.f32 %v6988_v3, %v8128_v16   ;;  %7015 = vpow2.f32 %v711_v34  ;;  %v719_v38 = vmul.f32 1.442695, %v674_v8 }
 0x103   : > { %v6992_v11 = vpop.eup %6991  ;;  %v8251_v13 = vmul.f32 %v6990_v7, %v8132_v20   ;;  %7017 = vpow2.f32 %v743_v39 }
 0x104   : > { %v6994_v19 = vpop.eup %6993  ;;  %v8255_v21 = vmul.f32 %v6992_v11, %v8136_v24   ;;  %7019 = vpow2.f32 %v721_v1  ;;  %v751_v24 = vmul.f32 1.442695, %v690_v12 }
 0x105   : > { %v6996_v16 = vpop.eup %6995  ;;  %v8258_v26 = vmul.f32 %v6994_v19, %v8140_v28   ;;  %7021 = vpow2.f32 %v753_v4 }
 0x106   : > { %v6998_v34 = vpop.eup %6997  ;;  %v8261_v20 = vmul.f32 %v6996_v16, %v8144_v32   ;;  %7023 = vpow2.f32 %v717_v10 }
 0x107   : > { %v7000_v39 = vpop.eup %6999  ;;  %v8264_v30 = vmul.f32 %v6998_v34, %v8148_v36   ;;  %7025 = vpow2.f32 %v749_v15 }
 0x108   : > { %v7002_v43 = vpop.eup %7001  ;;  %v8267_v52 = vmul.f32 %v7000_v39, %v8152_v40   ;;  %7027 = vpow2.f32 %v723_v25 }
 0x109   : > { %v7004_v28 = vpop.eup %7003  ;;  %v8270_v48 = vmul.f32 %v7002_v43, %v8156_v44   ;;  %7029 = vpow2.f32 %v755_v31 }
 0x10a   : > { %v7006_v32 = vpop.eup %7005  ;;  %v767_v49 = vadd.f32 1.0, %v7004_v28  ;;  %7031 = vpow2.f32 %v719_v38 }
 0x10b   : > { %v7008_v53 = vpop.eup %7007  ;;  %v783_v56 = vadd.f32 1.0, %v7006_v32  ;;  %7033 = vpow2.f32 %v751_v24 }
 0x10c   : > { %v7010_v36 = vpop.eup %7009  ;;  %7035 = vrcp.f32 %v767_v49  ;;  %v765_v51 = vadd.f32 1.0, %v7008_v53 }
 0x10d   : > { %v7012_v61 = vpop.eup %7011  ;;  %7037 = vrcp.f32 %v783_v56  ;;  %v781_v59 = vadd.f32 1.0, %v7010_v36 }
 0x10e   : > { %v7014_v40 = vpop.eup %7013  ;;  %7039 = vrcp.f32 %v765_v51  ;;  %v768_v63 = vadd.f32 1.0, %v7012_v61 }
 0x10f   : > { %v7016_v1 = vpop.eup %7015  ;;  %7041 = vrcp.f32 %v781_v59  ;;  %v784_v44 = vadd.f32 1.0, %v7014_v40 }
 0x110   : > { %v7018_v2 = vpop.eup %7017  ;;  %7043 = vrcp.f32 %v768_v63  ;;  %v766_v3 = vadd.f32 1.0, %v7016_v1 }
 0x111   : > { %v7020_v4 = vpop.eup %7019  ;;  %7045 = vrcp.f32 %v784_v44  ;;  %v782_v6 = vadd.f32 1.0, %v7018_v2 }
 0x112   : > { %v7022_v7 = vpop.eup %7021  ;;  %7047 = vrcp.f32 %v766_v3  ;;  %v771_v10 = vadd.f32 1.0, %v7020_v4 }
 0x113   : > { %v7024_v8 = vpop.eup %7023  ;;  %7049 = vrcp.f32 %v782_v6  ;;  %v787_v11 = vadd.f32 1.0, %v7022_v7 }
 0x114   : > { %v7026_v15 = vpop.eup %7025  ;;  %7051 = vrcp.f32 %v771_v10  ;;  %v769_v12 = vadd.f32 1.0, %v7024_v8 }
 0x115   : > { %v7028_v19 = vpop.eup %7027  ;;  %7053 = vrcp.f32 %v787_v11  ;;  %v785_v25 = vadd.f32 1.0, %v7026_v15 }
 0x116   : > { %v7030_v16 = vpop.eup %7029  ;;  %7055 = vrcp.f32 %v769_v12  ;;  %v772_v31 = vadd.f32 1.0, %v7028_v19 }
 0x117   : > { %v7032_v34 = vpop.eup %7031  ;;  %7057 = vrcp.f32 %v785_v25  ;;  %v788_v38 = vadd.f32 1.0, %v7030_v16 }
 0x118   : > { %v7034_v39 = vpop.eup %7033  ;;  %7059 = vrcp.f32 %v772_v31  ;;  %v770_v24 = vadd.f32 1.0, %v7032_v34 }
 0x119   : > { %v7036_v43 = vpop.eup %7035  ;;  %7061 = vrcp.f32 %v788_v38  ;;  %v786_v28 = vadd.f32 1.0, %v7034_v39 }
 0x11a   : > { %v7038_v32 = vpop.eup %7037  ;;  %v831_v49 = vmul.f32 %v7036_v43, %v8161_v9   ;;  %7063 = vrcp.f32 %v770_v24 }
 0x11b   : > { %v7040_v53 = vpop.eup %7039  ;;  %v847_v56 = vmul.f32 %v7038_v32, %v8164_v14   ;;  %7065 = vrcp.f32 %v786_v28 }
 0x11c   : > { %v7042_v36 = vpop.eup %7041  ;;  %v829_v51 = vmul.f32 %v7040_v53, %v8167_v18  }
 0x11d   : > { %v7044_v61 = vpop.eup %7043  ;;  %v845_v59 = vmul.f32 %v7042_v36, %v8170_v22  }
 0x11e   : > { %v7046_v40 = vpop.eup %7045  ;;  %v832_v63 = vmul.f32 %v7044_v61, %v8174_v29  }
 0x11f   : > { %v7048_v1 = vpop.eup %7047  ;;  %v848_v44 = vmul.f32 %v7046_v40, %v8178_v35  }
 0x120   : > { %v7050_v2 = vpop.eup %7049  ;;  %v830_v9 = vmul.f32 %v7048_v1, %v8182_v41  }
 0x121   : > { %v7052_v3 = vpop.eup %7051  ;;  %v846_v4 = vmul.f32 %v7050_v2, %v8186_v46  }
 0x122   : > { %v7054_v14 = vpop.eup %7053  ;;  %v835_v6 = vmul.f32 %v7052_v3, %v8193_v17  }
 0x123   : > { %v7056_v7 = vpop.eup %7055  ;;  %v851_v18 = vmul.f32 %v7054_v14, %v8196_v27  }
 0x124   : > { %v7058_v10 = vpop.eup %7057  ;;  %v833_v22 = vmul.f32 %v7056_v7, %v8202_v37  }
 0x125   : > { %v7060_v8 = vpop.eup %7059  ;;  %v849_v29 = vmul.f32 %v7058_v10, %v8208_v42  }
 0x126   : > { %v7062_v11 = vpop.eup %7061  ;;  %v836_v35 = vmul.f32 %v7060_v8, %v8215_v47  }
 0x127   : > { %v7064_v15 = vpop.eup %7063  ;;  %v852_v41 = vmul.f32 %v7062_v11, %v8222_v55  }
 0x128   : > { %v7066_v12 = vpop.eup %7065  ;;  %v834_v46 = vmul.f32 %v7064_v15, %v8229_v58  }
 0x129   : > { %v850_v17 = vmul.f32 %v7066_v12, %v8236_v62  }
 0x12a LB: >> { %10588 = vst [vmem:[#allocation4_spill] sm:$0xff] %v7776_v41  ;;  %10589 = vst [vmem:[#allocation5_spill] sm:$0xff] %v7780_v18  ;;  %s6090_s12 = sshll.u32 %s7904_s30, 3  ;;  %v937_v27 = vpack.c.bf16 %v7896_v0, %v7900_v45  ;;  %s6379_s16 = smul.u32 72, %s7904_s30  ;;  %v938_v42 = vpack.c.bf16 %v7888_v57, %v7892_v33  ;;  %v939_v47 = vpack.c.bf16 %v7880_v52, %v7884_v21  ;;  %v1599_v43 = vld [vmem:[#allocation2 + $0x8] sm:$0xff]  ;;  %v1600_v32 = vld [vmem:[#allocation2 + $0x10] sm:$0xff]  ;;  %s7904_s30 = sphi %s8368_s30, %s10685_s30   ;;  %v7900_v45 = vphi %v8211_v45, %v10684_v45   ;;  %v7896_v0 = vphi %v8239_v0, %v10683_v0   ;;  %v7892_v33 = vphi %v8199_v33, %v10682_v33   ;;  %v7888_v57 = vphi %v8225_v57, %v10681_v57   ;;  %v7884_v21 = vphi %v8255_v21, %v10680_v21   ;;  %v7880_v52 = vphi %v8267_v52, %v10679_v52   ;;  %v7876_v50 = vphi %v8247_v50, %v10678_v50   ;;  %v7872_v20 = vphi %v8261_v20, %v10677_v20   ;;  %v7868_v51 = vphi %v829_v51, %v10676_v51   ;;  %v7864_v9 = vphi %v830_v9, %v10675_v9   ;;  %v7860_v49 = vphi %v831_v49, %v10674_v49   ;;  %v7856_v63 = vphi %v832_v63, %v10673_v63   ;;  %v7852_v22 = vphi %v833_v22, %v10672_v22   ;;  %v7848_v46 = vphi %v834_v46, %v10671_v46   ;;  %v7844_v6 = vphi %v835_v6, %v10670_v6   ;;  %v7840_v35 = vphi %v836_v35, %v10669_v35   ;;  %v7836_v54 = vphi %v8218_v54, %v10668_v54   ;;  %v7832_v5 = vphi %v8243_v5, %v10667_v5   ;;  %v7828_v23 = vphi %v8205_v23, %v10666_v23   ;;  %v7824_v60 = vphi %v8232_v60, %v10665_v60   ;;  %v7820_v26 = vphi %v8258_v26, %v10664_v26   ;;  %v7816_v48 = vphi %v8270_v48, %v10663_v48   ;;  %v7812_v13 = vphi %v8251_v13, %v10662_v13   ;;  %v7808_v30 = vphi %v8264_v30, %v10661_v30   ;;  %v7804_v59 = vphi %v845_v59, %v10660_v59   ;;  %v7800_v4 = vphi %v846_v4, %v10659_v4   ;;  %v7796_v56 = vphi %v847_v56, %v10658_v56   ;;  %v7792_v44 = vphi %v848_v44, %v10657_v44   ;;  %v7788_v29 = vphi %v849_v29, %v10656_v29   ;;  %v7784_v17 = vphi %v850_v17, %v10655_v17   ;;  %v7780_v18 = vphi %v851_v18, %v10654_v18   ;;  %v7776_v41 = vphi %v852_v41, %v10653_v41  }
 0x12b   : >> { %10590 = vst [vmem:[#allocation6_spill] sm:$0xff] %v7784_v17  ;;  %10591 = vst [vmem:[#allocation7_spill] sm:$0xff] %v7788_v29  ;;  %s955_s15 = scalar_lea.vmem %s10565_s5, %s6090_s12  ;;  %v940_v55 = vpack.c.bf16 %v7872_v20, %v7876_v50  ;;  %v941_v58 = vpack.c.bf16 %v7864_v9, %v7868_v51  ;;  %v942_v62 = vpack.c.bf16 %v7856_v63, %v7860_v49  ;;  %s7907_s21 = smov 16   ;;  %v1856_v36 = vld [vmem:[#allocation2 + $0x9] sm:$0xff]  ;;  %v1857_v40 = vld [vmem:[#allocation2 + $0x11] sm:$0xff]  ;;  %vm1823_vm2 = vcmask 257152  }
 0x12c   : >> { %10592 = vst [vmem:[#allocation8_spill] sm:$0xff] %v7792_v44  ;;  %10593 = vst [vmem:[#allocation9_spill] sm:$0xff] %v7796_v56  ;;  %v7067_v37 = vld [vmem:[%s955_s15] sm:$0xff]   ;;  %6501 = vmatprep.mubr.msk.bf16.mxu0 %vm451_vm0, %v937_v27  ;;  %s8480_s20 = scalar_lea.vmem %s10567_s7, %s6379_s16  ;;  %v943_v19 = vpack.c.bf16 %v7848_v46, %v7852_v22  ;;  %v944_v25 = vpack.c.bf16 %v7840_v35, %v7844_v6  ;;  %v945_v16 = vpack.c.bf16 %v7832_v5, %v7836_v54  ;;  %s7908_s22 = smov 32   ;;  %vm1566_vm3 = vcmask 125952  }
 0x12d   : >> { %10594 = vst [vmem:[#allocation10_spill] sm:$0xff] %v7800_v4  ;;  %10595 = vst [vmem:[#allocation11_spill] sm:$0xff] %v7804_v59  ;;  %6499 = vmatprep.subr.bf16.mxu0 %v7067_v37  ;;  %v946_v31 = vpack.c.bf16 %v7824_v60, %v7828_v23  ;;  %v947_v34 = vpack.c.bf16 %v7816_v48, %v7820_v26  ;;  %v948_v38 = vpack.c.bf16 %v7808_v30, %v7812_v13  ;;  %s8535_s26 = scalar_lea.vmem %s10566_s6, %s7904_s30  ;;  %vm2080_vm4 = vcmask 388352   ;;  %s7909_s28 = smov 96  }
 0x12e   : >> { %10596 = vst [vmem:[#allocation12_spill] sm:$0xff] %v7808_v30  ;;  %10597 = vst [vmem:[#allocation13_spill] sm:$0xff] %v7856_v63  ;;  %6500 = vmatpush3.bf16.msra.mxu0 %v7067_v37  ;;  %v949_v39 = vpack.c.bf16 %v7800_v4, %v7804_v59  ;;  %v950_v24 = vpack.c.bf16 %v7792_v44, %v7796_v56  ;;  %v6123_v28 = vpack.c.bf16 %v1599_v43, %v1599_v43  ;;  %v8538_v14 = vld [vmem:[%s8535_s26] ss:$0 sm:$0xff]  ;;  %s7910_s29 = smov 112   ;;  %s7912_s12 = smov 48  }
 0x12f   : >> { %10598 = vst [vmem:[#allocation14_spill] sm:$0xff] %v7860_v49  ;;  %10599 = vst [vmem:[#allocation15_spill] sm:$0xff] %v7864_v9  ;;  %v6124_v53 = vpack.c.bf16 %v1600_v32, %v1600_v32  ;;  %v6155_v61 = vpack.c.bf16 %v1856_v36, %v1856_v36  ;;  %v6156_v1 = vpack.c.bf16 %v1857_v40, %v1857_v40  ;;  %s7913_s13 = smov 64   ;;  %s7914_s14 = smov 80   ;;  %vm2337_vm5 = vcmask 519552  }
 0x130   : >> { %10600 = vst [vmem:[#allocation16_spill] sm:$0xff] %v7868_v51  ;;  %10601 = vst [vmem:[#allocation17_spill] sm:$0xff] %v7872_v20  ;;  %1727 = vrot.lane.b32.xlu0 %v6123_v28, %s7907_s21  ;;  %v951_v2 = vpack.c.bf16 %v7784_v17, %v7788_v29  ;;  %v952_v3 = vpack.c.bf16 %v7776_v41, %v7780_v18  ;;  %vm2594_vm6 = vcmask 650752   ;;  %vm2851_vm7 = vcmask 781952   ;;  %s9456_s18 = scalar_lea.vmem %s10568_s8, %s7904_s30  ;;  %s904_s19 = sadd.s32 1, %s7904_s30  }
 0x131   : >> { %10602 = vst [vmem:[#allocation18_spill] sm:$0xff] %v7876_v50  ;;  %6502 = vmatmul.mubr.msk.bf16.vlgmr.msra.gmra.mxu0 %vm451_vm0, %v938_v42  ;;  %1986 = vrot.lane.b32.xlu1 %v6156_v1, %s7908_s22  ;;  %vm3109_vm8 = vcmask 913152   ;;  %vm3366_vm9 = vcmask 1044352   ;;  %p9852_p4 = scmp.ge.s32.totalorder %s904_s19, 2   ;;  %s10685_s30 = smov %s904_s19 }
 0x132   : >> { %6505 = vmatprep.mubr.msk.bf16.mxu0 %vm451_vm0, %v939_v47  ;;  %vm5444_vm10 = vcmask (%p9852_p4), 261120  }
 0x134   : >> { %1729 = vrot.lane.b32.xlu0 %v6124_v53, %s7907_s21 }
 0x138   : >> { %1984 = vrot.lane.b32.xlu0 %v6155_v61, %s7908_s22 }
 0x139   : >> { %6506 = vmatmul.mubr.msk.bf16.gmra.mxu0 %vm451_vm0, %v940_v55 }
 0x13a   : >> { %6509 = vmatprep.mubr.msk.bf16.mxu0 %vm451_vm0, %v941_v58 }
 0x141   : >> { %6510 = vmatmul.mubr.msk.bf16.gmra.mxu0 %vm451_vm0, %v942_v62 }
 0x142   : >> { %6513 = vmatprep.mubr.msk.bf16.mxu0 %vm451_vm0, %v943_v19 }
 0x149   : >> { %6514 = vmatmul.mubr.msk.bf16.gmra.mxu0 %vm451_vm0, %v944_v25 }
 0x14a   : >> { %6517 = vmatprep.mubr.msk.bf16.mxu0 %vm451_vm0, %v945_v16 }
 0x151   : >> { %6518 = vmatmul.mubr.msk.bf16.gmra.mxu0 %vm451_vm0, %v946_v31 }
 0x152   : >> { %6521 = vmatprep.mubr.msk.bf16.mxu0 %vm451_vm0, %v947_v34 }
 0x159   : >> { %6522 = vmatmul.mubr.msk.bf16.gmra.mxu0 %vm451_vm0, %v948_v38 }
 0x15a   : >> { %6525 = vmatprep.mubr.msk.bf16.mxu0 %vm451_vm0, %v949_v39 }
 0x161   : >> { %6526 = vmatmul.mubr.msk.bf16.gmra.mxu0 %vm451_vm0, %v950_v24 }
 0x162   : >> { %6529 = vmatprep.mubr.msk.bf16.mxu0 %vm451_vm0, %v951_v2 }
 0x169   : >> { %6530 = vmatmul.mubr.msk.bf16.gmra.mxu0 %vm451_vm0, %v952_v3 }
 0x1f1   : >> { %v6503_v7 = vpop.f32.mrf.mxu0 }
 0x1f2   : >> { %v8541_v10 = vadd.f32 %v6503_v7, %v8538_v14 }
 0x1f3   : >> { %v1054_v8 = vpop.f32.mrf.mxu0 }
 0x1f4   : >> { %v1183_v11 = vsub.f32 0.0, %v8541_v10  ;;  %v8545_v15 = vadd.f32 %v8538_v14, %v1054_v8 }
 0x1f5   : >> { %v6504_v12 = vpop.f32.mrf.mxu0 }
 0x1f6   : >> { %v1217_v27 = vmul.f32 1.442695, %v1183_v11  ;;  %v1181_v37 = vsub.f32 0.0, %v8545_v15  ;;  %v8549_v42 = vadd.f32 %v6504_v12, %v8538_v14 }
 0x1f7   : >> { %v1057_v47 = vpop.f32.mrf.mxu0 }
 0x1f8   : >> { %7117 = vpow2.f32 %v1217_v27  ;;  %v1213_v55 = vmul.f32 1.442695, %v1181_v37  ;;  %v1184_v58 = vsub.f32 0.0, %v8549_v42  ;;  %v8553_v62 = vadd.f32 %v8538_v14, %v1057_v47 }
 0x1f9   : >> { %v6507_v19 = vpop.f32.mrf.mxu0 }
 0x1fa   : >> { %7119 = vpow2.f32 %v1213_v55  ;;  %v1219_v25 = vmul.f32 1.442695, %v1184_v58  ;;  %v1182_v16 = vsub.f32 0.0, %v8553_v62  ;;  %v8557_v31 = vadd.f32 %v6507_v19, %v8538_v14 }
 0x1fb   : >> { %v1070_v34 = vpop.f32.mrf.mxu0 }
 0x1fc   : >> { %7121 = vpow2.f32 %v1219_v25  ;;  %v1215_v38 = vmul.f32 1.442695, %v1182_v16  ;;  %v1187_v39 = vsub.f32 0.0, %v8557_v31  ;;  %v8561_v24 = vadd.f32 %v8538_v14, %v1070_v34  ;;  %v1406_v16 = vld [vmem:[#allocation2 + $0x7] sm:$0xff] }
 0x1fd   : >> { %v6508_v43 = vpop.f32.mrf.mxu0 }
 0x1fe   : >> { %7123 = vpow2.f32 %v1215_v38  ;;  %v1225_v28 = vmul.f32 1.442695, %v1187_v39  ;;  %v1185_v32 = vsub.f32 0.0, %v8561_v24  ;;  %v8565_v53 = vadd.f32 %v6508_v43, %v8538_v14 }
 0x1ff   : >> { %v1073_v36 = vpop.f32.mrf.mxu0  ;;  %v6091_v43 = vpack.c.bf16 %v1406_v16, %v1406_v16 }
 0x200   : >> { %7125 = vpow2.f32 %v1225_v28  ;;  %v1221_v61 = vmul.f32 1.442695, %v1185_v32  ;;  %v1188_v40 = vsub.f32 0.0, %v8565_v53  ;;  %v8569_v1 = vadd.f32 %v8538_v14, %v1073_v36 }
 0x201   : >> { %v6511_v2 = vpop.f32.mrf.mxu0  ;;  %1567 = vst.msk [vmem:[#allocation3] sm:$0xf] %vm1566_vm3, %v6091_v43 }
 0x202   : >> { %7127 = vpow2.f32 %v1221_v61  ;;  %v1227_v3 = vmul.f32 1.442695, %v1188_v40  ;;  %v1186_v7 = vsub.f32 0.0, %v8569_v1  ;;  %v8573_v8 = vadd.f32 %v6511_v2, %v8538_v14  ;;  %v1728_v61 = vpop.permute.xlu0 %1727 }
 0x203   : >> { %v1086_v11 = vpop.f32.mrf.mxu0  ;;  %1824 = vst.msk [vmem:[#allocation3] sm:$0xf] %vm1823_vm2, %v1728_v61 }
 0x204   : >> { %7129 = vpow2.f32 %v1227_v3  ;;  %v1223_v12 = vmul.f32 1.442695, %v1186_v7  ;;  %v1191_v27 = vsub.f32 0.0, %v8573_v8  ;;  %v8577_v37 = vadd.f32 %v8538_v14, %v1086_v11 }
 0x205   : >> { %v7118_v47 = vpop.eup %7117  ;;  %v6512_v55 = vpop.f32.mrf.mxu0 }
 0x206   : >> { %v1279_v58 = vadd.f32 1.0, %v7118_v47  ;;  %7131 = vpow2.f32 %v1223_v12  ;;  %v1233_v19 = vmul.f32 1.442695, %v1191_v27  ;;  %v1189_v25 = vsub.f32 0.0, %v8577_v37  ;;  %v1407_v27 = vld [vmem:[#allocation2 + $0xf] sm:$0xff] }
 0x207   : >> { %v7120_v34 = vpop.eup %7119  ;;  %v8581_v38 = vadd.f32 %v6512_v55, %v8538_v14  ;;  %v1089_v39 = vpop.f32.mrf.mxu0 }
 0x208   : >> { %7133 = vrcp.f32 %v1279_v58  ;;  %v1277_v28 = vadd.f32 1.0, %v7120_v34  ;;  %v1229_v32 = vmul.f32 1.442695, %v1189_v25  ;;  %v8584_v36 = vadd.f32 %v8538_v14, %v1089_v39  ;;  %v1730_v39 = vpop.permute.xlu0 %1729 }
 0x209   : >> { %v7122_v40 = vpop.eup %7121  ;;  %7135 = vpow2.f32 %v1233_v19  ;;  %v1192_v2 = vsub.f32 0.0, %v8581_v38  ;;  %v6515_v3 = vpop.f32.mrf.mxu0  ;;  %v6092_v19 = vpack.c.bf16 %v1407_v27, %v1407_v27 }
 0x20a   : >> { %7137 = vrcp.f32 %v1277_v28  ;;  %v1280_v7 = vadd.f32 1.0, %v7122_v40  ;;  %v1190_v11 = vsub.f32 0.0, %v8584_v36  ;;  %v8590_v12 = vadd.f32 %v6515_v3, %v8538_v14 }
 0x20b   : >> { %v7124_v47 = vpop.eup %7123  ;;  %7139 = vpow2.f32 %v1229_v32  ;;  %v1235_v55 = vmul.f32 1.442695, %v1192_v2  ;;  %v1102_v58 = vpop.f32.mrf.mxu0  ;;  %1568 = vst.msk [vmem:[#allocation3 + $0x8] sm:$0xf] %vm1566_vm3, %v6092_v19 }
 0x20c   : >> { %7141 = vrcp.f32 %v1280_v7  ;;  %v1278_v25 = vadd.f32 1.0, %v7124_v47  ;;  %v1231_v16 = vmul.f32 1.442695, %v1190_v11  ;;  %v1195_v34 = vsub.f32 0.0, %v8590_v12  ;;  %1825 = vst.msk [vmem:[#allocation3 + $0x8] sm:$0xf] %vm1823_vm2, %v1730_v39 }
 0x20d   : >> { %v7126_v43 = vpop.eup %7125  ;;  %7143 = vpow2.f32 %v1235_v55  ;;  %v8595_v28 = vadd.f32 %v8538_v14, %v1102_v58  ;;  %v6516_v40 = vpop.f32.mrf.mxu0 }
 0x20e   : >> { %7145 = vrcp.f32 %v1278_v25  ;;  %v1283_v61 = vadd.f32 1.0, %v7126_v43  ;;  %v1241_v32 = vmul.f32 1.442695, %v1195_v34  ;;  %v8599_v2 = vadd.f32 %v6516_v40, %v8538_v14  ;;  %v1985_v58 = vpop.permute.xlu0 %1984  ;;  %v1987_v40 = vpop.permute.xlu1 %1986 }
 0x20f   : >> { %v7128_v3 = vpop.eup %7127  ;;  %7147 = vpow2.f32 %v1231_v16  ;;  %v1193_v7 = vsub.f32 0.0, %v8595_v28  ;;  %v1105_v11 = vpop.f32.mrf.mxu0  ;;  %2081 = vst.msk [vmem:[#allocation3] sm:$0xf] %vm2080_vm4, %v1985_v58  ;;  %2082 = vst.msk [vmem:[#allocation3 + $0x8] sm:$0xf] %vm2080_vm4, %v1987_v40 }
 0x210   : >> { %7149 = vrcp.f32 %v1283_v61  ;;  %v1281_v27 = vadd.f32 1.0, %v7128_v3  ;;  %v1196_v47 = vsub.f32 0.0, %v8599_v2  ;;  %v8605_v55 = vadd.f32 %v8538_v14, %v1105_v11 }
 0x211   : >> { %v7130_v19 = vpop.eup %7129  ;;  %7151 = vpow2.f32 %v1241_v32  ;;  %v1237_v25 = vmul.f32 1.442695, %v1193_v7  ;;  %v6519_v34 = vpop.f32.mrf.mxu0 }
 0x212   : >> { %7153 = vrcp.f32 %v1281_v27  ;;  %v1284_v16 = vadd.f32 1.0, %v7130_v19  ;;  %v1243_v39 = vmul.f32 1.442695, %v1196_v47  ;;  %v1194_v43 = vsub.f32 0.0, %v8605_v55 }
 0x213   : >> { %v7132_v61 = vpop.eup %7131  ;;  %7155 = vpow2.f32 %v1237_v25  ;;  %v8610_v3 = vadd.f32 %v6519_v34, %v8538_v14  ;;  %v1118_v11 = vpop.f32.mrf.mxu0 }
 0x214   : >> { %7157 = vrcp.f32 %v1284_v16  ;;  %v1282_v32 = vadd.f32 1.0, %v7132_v61  ;;  %v1239_v7 = vmul.f32 1.442695, %v1194_v43  ;;  %v8614_v41 = vadd.f32 %v8538_v14, %v1118_v11 }
 0x215   : >> { %v7134_v27 = vpop.eup %7133  ;;  %7159 = vpow2.f32 %v1243_v39  ;;  %v1199_v47 = vsub.f32 0.0, %v8610_v3  ;;  %v6520_v58 = vpop.f32.mrf.mxu0 }
 0x216   : >> { %v7136_v19 = vpop.eup %7135  ;;  %v1343_v25 = vmul.f32 %v7134_v27, %v8541_v10  ;;  %7161 = vrcp.f32 %v1282_v32  ;;  %v1197_v34 = vsub.f32 0.0, %v8614_v41  ;;  %v8620_v18 = vadd.f32 %v6520_v58, %v8538_v14 }
 0x217   : >> { %v7138_v16 = vpop.eup %7137  ;;  %v1287_v40 = vadd.f32 1.0, %v7136_v19  ;;  %7163 = vpow2.f32 %v1239_v7  ;;  %v1249_v43 = vmul.f32 1.442695, %v1199_v47  ;;  %v1121_v61 = vpop.f32.mrf.mxu0 }
 0x218   : >> { %v7140_v11 = vpop.eup %7139  ;;  %1376 = vst.msk [vmem:[#allocation2 + $0x48] sm:$0xff] %vm451_vm0, %v1343_v25  ;;  %v1341_v39 = vmul.f32 %v7138_v16, %v8545_v15  ;;  %v1245_v63 = vmul.f32 1.442695, %v1197_v34  ;;  %v1200_v49 = vsub.f32 0.0, %v8620_v18  ;;  %v8626_v10 = vadd.f32 %v8538_v14, %v1121_v61 }
 0x219   : >> { %v7142_v32 = vpop.eup %7141  ;;  %7165 = vrcp.f32 %v1287_v40  ;;  %v1285_v27 = vadd.f32 1.0, %v7140_v11  ;;  %v6523_v58 = vpop.f32.mrf.mxu0 }
 0x21a   : >> { %v7144_v17 = vpop.eup %7143  ;;  %1374 = vst.msk [vmem:[#allocation2 + $0x28] sm:$0xff] %vm451_vm0, %v1341_v39  ;;  %v1344_v7 = vmul.f32 %v7142_v32, %v8549_v42  ;;  %7167 = vpow2.f32 %v1249_v43  ;;  %v1251_v47 = vmul.f32 1.442695, %v1200_v49  ;;  %v1198_v19 = vsub.f32 0.0, %v8626_v10 }
 0x21b   : >> { %v7146_v15 = vpop.eup %7145  ;;  %7169 = vrcp.f32 %v1285_v27  ;;  %v1288_v25 = vadd.f32 1.0, %v7144_v17  ;;  %v8632_v34 = vadd.f32 %v6523_v58, %v8538_v14  ;;  %v1134_v16 = vpop.f32.mrf.mxu0 }
 0x21c   : >> { %v7148_v61 = vpop.eup %7147  ;;  %1377 = vst.msk [vmem:[#allocation2 + $0x50] sm:$0xff] %vm451_vm0, %v1344_v7  ;;  %v1342_v40 = vmul.f32 %v7146_v15, %v8553_v62  ;;  %7171 = vpow2.f32 %v1245_v63  ;;  %v1247_v11 = vmul.f32 1.442695, %v1198_v19  ;;  %v8637_v42 = vadd.f32 %v8538_v14, %v1134_v16 }
 0x21d   : >> { %v7150_v49 = vpop.eup %7149  ;;  %7173 = vrcp.f32 %v1288_v25  ;;  %v1286_v43 = vadd.f32 1.0, %v7148_v61  ;;  %v1203_v39 = vsub.f32 0.0, %v8632_v34  ;;  %v6524_v17 = vpop.f32.mrf.mxu0 }
 0x21e   : >> { %v7152_v32 = vpop.eup %7151  ;;  %1375 = vst.msk [vmem:[#allocation2 + $0x30] sm:$0xff] %vm451_vm0, %v1342_v40  ;;  %v1347_v27 = vmul.f32 %v7150_v49, %v8557_v31  ;;  %7175 = vpow2.f32 %v1251_v47  ;;  %v1201_v58 = vsub.f32 0.0, %v8637_v42  ;;  %v8644_v63 = vadd.f32 %v6524_v17, %v8538_v14 }
 0x21f   : >> { %v7154_v62 = vpop.eup %7153  ;;  %v1603_v7 = vld [vmem:[#allocation2 + $0x48] sm:$0xff]  ;;  %7177 = vrcp.f32 %v1286_v43  ;;  %v1291_v15 = vadd.f32 1.0, %v7152_v32  ;;  %v1257_v25 = vmul.f32 1.442695, %v1203_v39  ;;  %v1137_v47 = vpop.f32.mrf.mxu0 }
 0x220   : >> { %v2885_v19 = vld [vmem:[#allocation2 + $0x47] sm:$0xff]  ;;  %v7156_v16 = vpop.eup %7155  ;;  %1380 = vst.msk [vmem:[#allocation2 + $0x88] sm:$0xff] %vm451_vm0, %v1347_v27  ;;  %v1345_v61 = vmul.f32 %v7154_v62, %v8561_v24  ;;  %v8648_v40 = vpack.c.bf16 %v1603_v7, %v1603_v7  ;;  %7179 = vpow2.f32 %v1247_v11  ;;  %v1253_v51 = vmul.f32 1.442695, %v1201_v58 }
 0x221   : >> { %v8650_v31 = vpack.c.bf16 %v2885_v19, %v2885_v19  ;;  %v7158_v49 = vpop.eup %7157  ;;  %v1601_v17 = vld [vmem:[#allocation2 + $0x28] sm:$0xff]  ;;  %7181 = vrcp.f32 %v1291_v15  ;;  %v1289_v29 = vadd.f32 1.0, %v7156_v16  ;;  %v1204_v43 = vsub.f32 0.0, %v8644_v63 }
 0x222   : >> { %v2113_v9 = vld [vmem:[#allocation2 + $0x27] sm:$0xff]  ;;  %v7160_v39 = vpop.eup %7159  ;;  %1378 = vst.msk [vmem:[#allocation2 + $0x68] sm:$0xff] %vm451_vm0, %v1345_v61  ;;  %v1348_v32 = vmul.f32 %v7158_v49, %v8565_v53  ;;  %1735 = vrot.lane.b32.xlu0 %v8648_v40, %s7907_s21  ;;  %v8657_v24 = vpack.c.bf16 %v1601_v17, %v1601_v17  ;;  %7183 = vpow2.f32 %v1257_v25  ;;  %v8664_v15 = vadd.f32 %v8538_v14, %v1137_v47 }
 0x223   : >> { %v8659_v11 = vpack.c.bf16 %v2113_v9, %v2113_v9  ;;  %1571 = vst.msk [vmem:[#allocation3 + $0x20] sm:$0xf] %vm1566_vm3, %v8650_v31  ;;  %v7162_v27 = vpop.eup %7161  ;;  %v3399_v58 = vld [vmem:[#allocation2 + $0x49] sm:$0xff]  ;;  %v3400_v62 = vld [vmem:[#allocation2 + $0x51] sm:$0xff]  ;;  %7185 = vrcp.f32 %v1289_v29  ;;  %v1292_v19 = vadd.f32 1.0, %v7160_v39 }
 0x224   : >> { %v1604_v7 = vld [vmem:[#allocation2 + $0x50] sm:$0xff]  ;;  %v7164_v53 = vpop.eup %7163  ;;  %v8666_v16 = vpack.c.bf16 %v3399_v58, %v3399_v58  ;;  %v8668_v61 = vpack.c.bf16 %v3400_v62, %v3400_v62  ;;  %1381 = vst.msk [vmem:[#allocation2 + $0x90] sm:$0xff] %vm451_vm0, %v1348_v32  ;;  %v1346_v9 = vmul.f32 %v7162_v27, %v8569_v1  ;;  %1731 = vrot.lane.b32.xlu1 %v8657_v24, %s7907_s21  ;;  %v1259_v29 = vmul.f32 1.442695, %v1204_v43 }
 0x225   : >> { %v2886_v25 = vld [vmem:[#allocation2 + $0x4f] sm:$0xff]  ;;  %1569 = vst.msk [vmem:[#allocation3 + $0x10] sm:$0xf] %vm1566_vm3, %v8659_v11  ;;  %7187 = vrcp.f32 %v1292_v19  ;;  %v1290_v47 = vadd.f32 1.0, %v7164_v53  ;;  %v1202_v39 = vsub.f32 0.0, %v8664_v15  ;;  %v8682_v1 = vpack.c.bf16 %v1604_v7, %v1604_v7 }
 0x226   : >> { %v8676_v49 = vpack.c.bf16 %v2886_v25, %v2886_v25  ;;  %v2114_v17 = vld [vmem:[#allocation2 + $0x2f] sm:$0xff]  ;;  %v7166_v58 = vpop.eup %7165  ;;  %1379 = vst.msk [vmem:[#allocation2 + $0x70] sm:$0xff] %vm451_vm0, %v1346_v9  ;;  %3013 = vrot.lane.b32.xlu0 %v8650_v31, %s7909_s28  ;;  %7189 = vpow2.f32 %v1253_v51 }
 0x227   : >> { %v8684_v32 = vpack.c.bf16 %v2114_v17, %v2114_v17  ;;  %3559 = vst.msk [vmem:[#allocation3 + $0x4] sm:$0xf] %vm1566_vm3, %v8666_v16  ;;  %3560 = vst.msk [vmem:[#allocation3 + $0xc] sm:$0xf] %vm1566_vm3, %v8668_v61  ;;  %v7168_v43 = vpop.eup %7167  ;;  %v1351_v27 = vmul.f32 %v7166_v58, %v8573_v8  ;;  %7191 = vrcp.f32 %v1290_v47  ;;  %v2889_v62 = vld [vmem:[#allocation2 + $0x87] sm:$0xff] }
 0x228   : >> { %1572 = vst.msk [vmem:[#allocation3 + $0x28] sm:$0xf] %vm1566_vm3, %v8676_v49  ;;  %v1255_v19 = vmul.f32 1.442695, %v1202_v39  ;;  %v7170_v7 = vpop.eup %7169  ;;  %1737 = vrot.lane.b32.xlu1 %v8682_v1, %s7907_s21  ;;  %v8695_v53 = vpack.c.bf16 %v2889_v62, %v2889_v62  ;;  %v1295_v9 = vadd.f32 1.0, %v7168_v43  ;;  %7193 = vpow2.f32 %v1259_v29 }
 0x229   : >> { %1570 = vst.msk [vmem:[#allocation3 + $0x18] sm:$0xf] %vm1566_vm3, %v8684_v32  ;;  %v7172_v51 = vpop.eup %7171  ;;  %v1349_v8 = vmul.f32 %v7170_v7, %v8577_v37  ;;  %v2887_v25 = vld [vmem:[#allocation2 + $0x67] sm:$0xff] }
 0x22a   : >> { %1384 = vst.msk [vmem:[#allocation2 + $0xc8] sm:$0xff] %vm451_vm0, %v1351_v27  ;;  %7195 = vpow2.f32 %v1255_v19  ;;  %v7174_v47 = vpop.eup %7173  ;;  %3270 = vrot.lane.b32.xlu0 %v8648_v40, %s7910_s29  ;;  %v8703_v17 = vpack.c.bf16 %v2887_v25, %v2887_v25  ;;  %v1293_v29 = vadd.f32 1.0, %v7172_v51  ;;  %v7068_v51 = vld [vmem:[%s8480_s20 + $0x38] sm:$0xff]  }
 0x22b   : >> { %7197 = vrcp.f32 %v1295_v9  ;;  %1575 = vst.msk [vmem:[#allocation3 + $0x40] sm:$0xf] %vm1566_vm3, %v8695_v53  ;;  %v7176_v39 = vpop.eup %7175  ;;  %v3403_v58 = vld [vmem:[#allocation2 + $0x89] sm:$0xff]  ;;  %v3404_v43 = vld [vmem:[#allocation2 + $0x91] sm:$0xff]  ;;  %v1352_v37 = vmul.f32 %v7174_v47, %v8581_v38  ;;  %v7911_v9 = vmov 0  }
 0x22c   : >> { %1382 = vst.msk [vmem:[#allocation2 + $0xa8] sm:$0xff] %vm451_vm0, %v1349_v8  ;;  %v7178_v27 = vpop.eup %7177  ;;  %v6351_v62 = vpack.c.bf16 %v3403_v58, %v3403_v58  ;;  %v6352_v19 = vpack.c.bf16 %v3404_v43, %v3404_v43  ;;  %3015 = vrot.lane.b32.xlu1 %v8676_v49, %s7909_s28  ;;  %v2890_v7 = vld [vmem:[#allocation2 + $0x8f] sm:$0xff]  ;;  %7199 = vrcp.f32 %v1293_v29  ;;  %3898 = vmatprep.subr.bf16.mxu0 %v7911_v9  ;;  %v1296_v58 = vadd.f32 1.0, %v7176_v39 }
 0x22d   : >> { %1573 = vst.msk [vmem:[#allocation3 + $0x30] sm:$0xf] %vm1566_vm3, %v8703_v17  ;;  %v7180_v25 = vpop.eup %7179  ;;  %v3401_v44 = vld [vmem:[#allocation2 + $0x69] sm:$0xff]  ;;  %v3402_v8 = vld [vmem:[#allocation2 + $0x71] sm:$0xff]  ;;  %v1350_v38 = vmul.f32 %v7178_v27, %v8584_v36  ;;  %v8717_v47 = vpack.c.bf16 %v2890_v7, %v2890_v7  ;;  %6637 = vmatprep.subr.bf16.mxu1 %v7911_v9  ;;  %3899 = vmatpush1.bf16.msra.mxu0 %v7068_v51 }
 0x22e   : >> { %1385 = vst.msk [vmem:[#allocation2 + $0xd0] sm:$0xff] %vm451_vm0, %v1352_v37  ;;  %v7182_v29 = vpop.eup %7181  ;;  %v8720_v43 = vpack.c.bf16 %v3401_v44, %v3401_v44  ;;  %v8722_v56 = vpack.c.bf16 %v3402_v8, %v3402_v8  ;;  %2245 = vrot.lane.b32.xlu0 %v8650_v31, %s7912_s12  ;;  %v1294_v20 = vadd.f32 1.0, %v7180_v25  ;;  %v2888_v50 = vld [vmem:[#allocation2 + $0x6f] sm:$0xff]  ;;  %7201 = vrcp.f32 %v1296_v58  ;;  %3900 = vmatprep.subr.bf16.mxu0 %v7911_v9 }
 0x22f   : >> { %3563 = vst.msk [vmem:[#allocation3 + $0x24] sm:$0xf] %vm1566_vm3, %v6351_v62  ;;  %3564 = vst.msk [vmem:[#allocation3 + $0x2c] sm:$0xf] %vm1566_vm3, %v6352_v19  ;;  %v7184_v36 = vpop.eup %7183  ;;  %v1355_v39 = vmul.f32 %v7182_v29, %v8590_v12  ;;  %v8730_v44 = vpack.c.bf16 %v2888_v50, %v2888_v50  ;;  %v7069_v37 = vld [vmem:[%s8480_s20 + $0x30] sm:$0xff]   ;;  %6646 = vmatpush1.bf16.msra.mxu1 %v7068_v51 }
 0x230   : >> { %1383 = vst.msk [vmem:[#allocation2 + $0xb0] sm:$0xff] %vm451_vm0, %v1350_v38  ;;  %v7186_v31 = vpop.eup %7185  ;;  %3272 = vrot.lane.b32.xlu1 %v8682_v1, %s7910_s29  ;;  %7203 = vrcp.f32 %v1294_v20  ;;  %v1299_v50 = vadd.f32 1.0, %v7184_v36  ;;  %6638 = vmatprep.subr.bf16.mxu1 %v7911_v9 }
 0x231   : >> { %1576 = vst.msk [vmem:[#allocation3 + $0x48] sm:$0xf] %vm1566_vm3, %v8717_v47  ;;  %3561 = vst.msk [vmem:[#allocation3 + $0x14] sm:$0xf] %vm1566_vm3, %v8720_v43  ;;  %v1418_v12 = vld [vmem:[#allocation2 + $0xc7] sm:$0xff]  ;;  %v1353_v27 = vmul.f32 %v7186_v31, %v8595_v28  ;;  %3901 = vmatpush1.bf16.msra.mxu0 %v7069_v37 }
 0x232   : >> { %3562 = vst.msk [vmem:[#allocation3 + $0x1c] sm:$0xf] %vm1566_vm3, %v8722_v56  ;;  %1574 = vst.msk [vmem:[#allocation3 + $0x38] sm:$0xf] %vm1566_vm3, %v8730_v44  ;;  %v6103_v62 = vpack.c.bf16 %v1418_v12, %v1418_v12  ;;  %v7188_v20 = vpop.eup %7187  ;;  %2502 = vrot.lane.b32.xlu0 %v8648_v40, %s7913_s13  ;;  %7205 = vrcp.f32 %v1299_v50  ;;  %3902 = vmatprep.subr.bf16.mxu0 %v7911_v9  ;;  %v7070_v28 = vld [vmem:[%s8480_s20 + $0x28] sm:$0xff]  }
 0x233   : >> { %1388 = vst.msk [vmem:[#allocation2 + $0x108] sm:$0xff] %vm451_vm0, %v1355_v39  ;;  %v1416_v19 = vld [vmem:[#allocation2 + $0xa7] sm:$0xff]  ;;  %v7190_v7 = vpop.eup %7189  ;;  %1386 = vst.msk [vmem:[#allocation2 + $0xe8] sm:$0xff] %vm451_vm0, %v1353_v27  ;;  %v1356_v51 = vmul.f32 %v7188_v20, %v8599_v2  ;;  %6647 = vmatpush1.bf16.msra.mxu1 %v7069_v37 }
 0x234   : >> { %1579 = vst.msk [vmem:[#allocation3 + $0x60] sm:$0xf] %vm1566_vm3, %v6103_v62  ;;  %v8754_v25 = vpack.c.bf16 %v1416_v19, %v1416_v19  ;;  %v7192_v8 = vpop.eup %7191  ;;  %2247 = vrot.lane.b32.xlu1 %v8676_v49, %s7912_s12  ;;  %v1297_v40 = vadd.f32 1.0, %v7190_v7  ;;  %6639 = vmatprep.subr.bf16.mxu1 %v7911_v9  ;;  %v7071_v7 = vld [vmem:[%s8480_s20 + $0x20] sm:$0xff]  }
 0x235   : >> { %v3407_v38 = vld [vmem:[#allocation2 + $0xc9] sm:$0xff]  ;;  %v3408_v58 = vld [vmem:[#allocation2 + $0xd1] sm:$0xff]  ;;  %v7194_v29 = vpop.eup %7193  ;;  %1389 = vst.msk [vmem:[#allocation2 + $0x110] sm:$0xff] %vm451_vm0, %v1356_v51  ;;  %v1354_v39 = vmul.f32 %v7192_v8, %v8605_v55  ;;  %3903 = vmatpush1.bf16.msra.mxu0 %v7070_v28 }
 0x236   : >> { %v8759_v36 = vpack.c.bf16 %v3407_v38, %v3407_v38  ;;  %v8761_v2 = vpack.c.bf16 %v3408_v58, %v3408_v58  ;;  %1577 = vst.msk [vmem:[#allocation3 + $0x50] sm:$0xf] %vm1566_vm3, %v8754_v25  ;;  %v1419_v37 = vld [vmem:[#allocation2 + $0xcf] sm:$0xff]  ;;  %2241 = vrot.lane.b32.xlu0 %v8659_v11, %s7912_s12  ;;  %7207 = vrcp.f32 %v1297_v40  ;;  %v1300_v12 = vadd.f32 1.0, %v7194_v29  ;;  %3904 = vmatprep.subr.bf16.mxu0 %v7911_v9  ;;  %v7072_v29 = vld [vmem:[%s8480_s20 + $0x18] sm:$0xff]  }
 0x237   : >> { %v7196_v31 = vpop.eup %7195  ;;  %v3405_v50 = vld [vmem:[#allocation2 + $0xa9] sm:$0xff]  ;;  %v3406_v49 = vld [vmem:[#allocation2 + $0xb1] sm:$0xff]  ;;  %v6104_v27 = vpack.c.bf16 %v1419_v37, %v1419_v37  ;;  %1387 = vst.msk [vmem:[#allocation2 + $0xf0] sm:$0xff] %vm451_vm0, %v1354_v39  ;;  %6648 = vmatpush1.bf16.msra.mxu1 %v7070_v28 }
 0x238   : >> { %v7198_v62 = vpop.eup %7197  ;;  %v6353_v20 = vpack.c.bf16 %v3405_v50, %v3405_v50  ;;  %v6354_v19 = vpack.c.bf16 %v3406_v49, %v3406_v49  ;;  %3567 = vst.msk [vmem:[#allocation3 + $0x44] sm:$0xf] %vm1566_vm3, %v8759_v36  ;;  %3568 = vst.msk [vmem:[#allocation3 + $0x4c] sm:$0xf] %vm1566_vm3, %v8761_v2  ;;  %v1298_v55 = vadd.f32 1.0, %v7196_v31  ;;  %v1417_v11 = vld [vmem:[#allocation2 + $0xaf] sm:$0xff]  ;;  %2504 = vrot.lane.b32.xlu1 %v8682_v1, %s7913_s13  ;;  %7209 = vrcp.f32 %v1300_v12 }
 0x239   : >> { %v1359_v51 = vmul.f32 %v7198_v62, %v8610_v3  ;;  %1580 = vst.msk [vmem:[#allocation3 + $0x68] sm:$0xf] %vm1566_vm3, %v6104_v27  ;;  %6640 = vmatprep.subr.bf16.mxu1 %v7911_v9  ;;  %v7200_v38 = vpop.eup %7199  ;;  %3905 = vmatpush1.bf16.msra.mxu0 %v7071_v7  ;;  %v8789_v28 = vpack.c.bf16 %v1417_v11, %v1417_v11 }
 0x23a   : >> { %v2897_v8 = vld [vmem:[#allocation2 + $0x107] sm:$0xff]  ;;  %3565 = vst.msk [vmem:[#allocation3 + $0x34] sm:$0xf] %vm1566_vm3, %v6353_v20  ;;  %3566 = vst.msk [vmem:[#allocation3 + $0x3c] sm:$0xf] %vm1566_vm3, %v6354_v19  ;;  %7211 = vrcp.f32 %v1298_v55  ;;  %2498 = vrot.lane.b32.xlu0 %v8657_v24, %s7913_s13  ;;  %v1357_v3 = vmul.f32 %v7200_v38, %v8614_v41  ;;  %3906 = vmatprep.subr.bf16.mxu0 %v7911_v9 }
 0x23b   : >> { %v8781_v58 = vpack.c.bf16 %v2897_v8, %v2897_v8  ;;  %1392 = vst.msk [vmem:[#allocation2 + $0x148] sm:$0xff] %vm451_vm0, %v1359_v51  ;;  %v2125_v1 = vld [vmem:[#allocation2 + $0xe7] sm:$0xff]  ;;  %6649 = vmatpush1.bf16.msra.mxu1 %v7071_v7  ;;  %v7202_v39 = vpop.eup %7201  ;;  %v1602_v7 = vld [vmem:[#allocation2 + $0x30] sm:$0xff] }
 0x23c   : >> { %v8791_v40 = vpack.c.bf16 %v2125_v1, %v2125_v1  ;;  %v3411_v37 = vld [vmem:[#allocation2 + $0x109] sm:$0xff]  ;;  %2761 = vrot.lane.b32.xlu1 %v8668_v61, %s7914_s14  ;;  %1390 = vst.msk [vmem:[#allocation2 + $0x128] sm:$0xff] %vm451_vm0, %v1357_v3  ;;  %6641 = vmatprep.subr.bf16.mxu1 %v7911_v9  ;;  %v3412_v24 = vld [vmem:[#allocation2 + $0x111] sm:$0xff]  ;;  %v1360_v31 = vmul.f32 %v7202_v39, %v8620_v18 }
 0x23d   : >> { %1583 = vst.msk [vmem:[#allocation3 + $0x80] sm:$0xf] %vm1566_vm3, %v8781_v58  ;;  %1578 = vst.msk [vmem:[#allocation3 + $0x58] sm:$0xf] %vm1566_vm3, %v8789_v28  ;;  %v7204_v41 = vpop.eup %7203  ;;  %v2898_v50 = vld [vmem:[#allocation2 + $0x10f] sm:$0xff]  ;;  %3907 = vmatpush1.bf16.msra.mxu0 %v7072_v29  ;;  %v8811_v20 = vpack.c.bf16 %v3411_v37, %v3411_v37  ;;  %v8829_v38 = vpack.c.bf16 %v3412_v24, %v3412_v24 }
 0x23e   : >> { %1581 = vst.msk [vmem:[#allocation3 + $0x70] sm:$0xf] %vm1566_vm3, %v8791_v40  ;;  %v3409_v49 = vld [vmem:[#allocation2 + $0xe9] sm:$0xff]  ;;  %v3410_v12 = vld [vmem:[#allocation2 + $0xf1] sm:$0xff]  ;;  %2759 = vrot.lane.b32.xlu0 %v8666_v16, %s7914_s14  ;;  %v1358_v27 = vmul.f32 %v7204_v41, %v8626_v10  ;;  %v8809_v62 = vpack.c.bf16 %v2898_v50, %v2898_v50  ;;  %3908 = vmatprep.subr.bf16.mxu0 %v7911_v9 }
 0x23f   : >> { %v7206_v19 = vpop.eup %7205  ;;  %v8813_v55 = vpack.c.bf16 %v3409_v49, %v3409_v49  ;;  %v8815_v18 = vpack.c.bf16 %v3410_v12, %v3410_v12  ;;  %1393 = vst.msk [vmem:[#allocation2 + $0x150] sm:$0xff] %vm451_vm0, %v1360_v31  ;;  %v2126_v11 = vld [vmem:[#allocation2 + $0xef] sm:$0xff]  ;;  %6650 = vmatpush1.bf16.msra.mxu1 %v7072_v29 }
 0x240   : >> { %v7073_v51 = vld [vmem:[%s8480_s20 + $0x10] sm:$0xff]   ;;  %1994 = vrot.lane.b32.xlu1 %v8668_v61, %s7908_s22  ;;  %1391 = vst.msk [vmem:[#allocation2 + $0x130] sm:$0xff] %vm451_vm0, %v1358_v27  ;;  %v1363_v10 = vmul.f32 %v7206_v19, %v8632_v34  ;;  %v8824_v8 = vpack.c.bf16 %v2126_v11, %v2126_v11  ;;  %6642 = vmatprep.subr.bf16.mxu1 %v7911_v9  ;;  %v7074_v39 = vld [vmem:[%s8480_s20 + $0x8] sm:$0xff]  }
 0x241   : >> { %1584 = vst.msk [vmem:[#allocation3 + $0x88] sm:$0xf] %vm1566_vm3, %v8809_v62  ;;  %3571 = vst.msk [vmem:[#allocation3 + $0x64] sm:$0xf] %vm1566_vm3, %v8811_v20  ;;  %v2627_v3 = vld [vmem:[#allocation2 + $0x29] sm:$0xff]  ;;  %v6126_v61 = vpack.c.bf16 %v1602_v7, %v1602_v7  ;;  %3909 = vmatpush1.bf16.msra.mxu0 %v7073_v51 }
 0x242   : >> { %3569 = vst.msk [vmem:[#allocation3 + $0x54] sm:$0xf] %vm1566_vm3, %v8813_v55  ;;  %3570 = vst.msk [vmem:[#allocation3 + $0x5c] sm:$0xf] %vm1566_vm3, %v8815_v18  ;;  %v2901_v34 = vld [vmem:[#allocation2 + $0x147] sm:$0xff]  ;;  %1992 = vrot.lane.b32.xlu0 %v8666_v16, %s7908_s22  ;;  %3910 = vmatprep.subr.bf16.mxu0 %v7911_v9  ;;  %v6251_v16 = vpack.c.bf16 %v2627_v3, %v2627_v3 }
 0x243   : >> { %1396 = vst.msk [vmem:[#allocation2 + $0x188] sm:$0xff] %vm451_vm0, %v1363_v10  ;;  %v8840_v1 = vpack.c.bf16 %v2901_v34, %v2901_v34  ;;  %v7208_v29 = vpop.eup %7207  ;;  %v2899_v37 = vld [vmem:[#allocation2 + $0x127] sm:$0xff]  ;;  %6651 = vmatpush1.bf16.msra.mxu1 %v7073_v51 }
 0x244   : >> { %1582 = vst.msk [vmem:[#allocation3 + $0x78] sm:$0xf] %vm1566_vm3, %v8824_v8  ;;  %3572 = vst.msk [vmem:[#allocation3 + $0x6c] sm:$0xf] %vm1566_vm3, %v8829_v38  ;;  %1733 = vrot.lane.b32.xlu1 %v6126_v61, %s7907_s21  ;;  %v1361_v41 = vmul.f32 %v7208_v29, %v8637_v42  ;;  %v8850_v24 = vpack.c.bf16 %v2899_v37, %v2899_v37  ;;  %6643 = vmatprep.subr.bf16.mxu1 %v7911_v9  ;;  %v7075_v29 = vld [vmem:[%s8480_s20] sm:$0xff]  }
 0x245   : >> { %1587 = vst.msk [vmem:[#allocation3 + $0xa0] sm:$0xf] %vm1566_vm3, %v8840_v1  ;;  %v7210_v31 = vpop.eup %7209  ;;  %3911 = vmatpush1.bf16.msra.mxu0 %v7074_v39 }
 0x246   : >> { %2755 = vrot.lane.b32.xlu0 %v6251_v16, %s7914_s14  ;;  %v3415_v49 = vld [vmem:[#allocation2 + $0x149] sm:$0xff]  ;;  %v3416_v12 = vld [vmem:[#allocation2 + $0x151] sm:$0xff]  ;;  %1394 = vst.msk [vmem:[#allocation2 + $0x168] sm:$0xff] %vm451_vm0, %v1361_v41  ;;  %v1364_v27 = vmul.f32 %v7210_v31, %v8644_v63  ;;  %3912 = vmatprep.subr.bf16.mxu0 %v7911_v9 }
 0x247   : >> { %v7212_v50 = vpop.eup %7211  ;;  %1585 = vst.msk [vmem:[#allocation3 + $0x90] sm:$0xf] %vm1566_vm3, %v8850_v24  ;;  %v8860_v42 = vpack.c.bf16 %v3415_v49, %v3415_v49  ;;  %v8862_v19 = vpack.c.bf16 %v3416_v12, %v3416_v12  ;;  %v3413_v7 = vld [vmem:[#allocation2 + $0x129] sm:$0xff]  ;;  %v3414_v11 = vld [vmem:[#allocation2 + $0x131] sm:$0xff]  ;;  %6652 = vmatpush1.bf16.msra.mxu1 %v7074_v39  ;;  %v7076_v39 = vld [vmem:[%s8480_s20 + $0x40] sm:$0xff]  }
 0x248   : >> { %v1362_v51 = vmul.f32 %v7212_v50, %v8664_v15  ;;  %v2902_v10 = vld [vmem:[#allocation2 + $0x14f] sm:$0xff]  ;;  %2243 = vrot.lane.b32.xlu1 %v8684_v32, %s7912_s12  ;;  %v8868_v3 = vpack.c.bf16 %v3413_v7, %v3413_v7  ;;  %v6362_v63 = vpack.c.bf16 %v3414_v11, %v3414_v11  ;;  %1397 = vst.msk [vmem:[#allocation2 + $0x190] sm:$0xff] %vm451_vm0, %v1364_v27 }
 0x249   : >> { %v8871_v34 = vpack.c.bf16 %v2902_v10, %v2902_v10  ;;  %v2900_v37 = vld [vmem:[#allocation2 + $0x12f] sm:$0xff]  ;;  %3575 = vst.msk [vmem:[#allocation3 + $0x84] sm:$0xf] %vm1566_vm3, %v8860_v42  ;;  %3576 = vst.msk [vmem:[#allocation3 + $0x8c] sm:$0xf] %vm1566_vm3, %v8862_v19  ;;  %6644 = vmatprep.subr.bf16.mxu1 %v7911_v9  ;;  %3913 = vmatpush1.bf16.msra.mxu0 %v7075_v29 }
 0x24a   : >> { %v1607_v41 = vld [vmem:[#allocation2 + $0x88] sm:$0xff]  ;;  %1395 = vst.msk [vmem:[#allocation2 + $0x170] sm:$0xff] %vm451_vm0, %v1362_v51  ;;  %v8879_v15 = vpack.c.bf16 %v2900_v37, %v2900_v37  ;;  %1988 = vrot.lane.b32.xlu0 %v6251_v16, %s7908_s22  ;;  %v2628_v32 = vld [vmem:[#allocation2 + $0x31] sm:$0xff]  ;;  %3928 = vmatprep.subr.bf16.mxu0 %v7911_v9  ;;  %v6527_v51 = vpop.f32.mrf.mxu0 }
 0x24b   : >> { %3573 = vst.msk [vmem:[#allocation3 + $0x74] sm:$0xf] %vm1566_vm3, %v8868_v3  ;;  %3574 = vst.msk [vmem:[#allocation3 + $0x7c] sm:$0xf] %vm1566_vm3, %v6362_v63  ;;  %v6131_v31 = vpack.c.bf16 %v1607_v41, %v1607_v41  ;;  %v2905_v16 = vld [vmem:[#allocation2 + $0x187] sm:$0xff]  ;;  %6653 = vmatpush1.bf16.msra.mxu1 %v7075_v29  ;;  %v6252_v12 = vpack.c.bf16 %v2628_v32, %v2628_v32 }
 0x24c   : >> { %1588 = vst.msk [vmem:[#allocation3 + $0xa8] sm:$0xf] %vm1566_vm3, %v8871_v34  ;;  %1586 = vst.msk [vmem:[#allocation3 + $0x98] sm:$0xf] %vm1566_vm3, %v8879_v15  ;;  %2500 = vrot.lane.b32.xlu1 %v6126_v61, %s7913_s13  ;;  %v8893_v50 = vpack.c.bf16 %v2905_v16, %v2905_v16  ;;  %6645 = vmatprep.subr.bf16.mxu1 %v7911_v9  ;;  %v8905_v9 = vadd.f32 %v6527_v51, %v8538_v14  ;;  %v1150_v16 = vpop.f32.mrf.mxu0 }
 0x24d   : >> { %v2903_v49 = vld [vmem:[#allocation2 + $0x167] sm:$0xff]  ;;  %3929 = vmatpush2.bf16.msra.mxu0 %v7076_v39  ;;  %v8918_v51 = vadd.f32 %v8538_v14, %v1150_v16 }
 0x24e   : >> { %1743 = vrot.lane.b32.xlu0 %v6131_v31, %s7907_s21  ;;  %v8897_v27 = vpack.c.bf16 %v2903_v49, %v2903_v49  ;;  %1591 = vst.msk [vmem:[#allocation3 + $0xc0] sm:$0xf] %vm1566_vm3, %v8893_v50  ;;  %v1605_v16 = vld [vmem:[#allocation2 + $0x68] sm:$0xff] }
 0x24f   : >> { %v3419_v7 = vld [vmem:[#allocation2 + $0x189] sm:$0xff]  ;;  %v3420_v11 = vld [vmem:[#allocation2 + $0x191] sm:$0xff]  ;;  %6654 = vmatpush2.bf16.msra.mxu1 %v7076_v39 }
 0x250   : >> { %2757 = vrot.lane.b32.xlu1 %v6252_v12, %s7914_s14  ;;  %v6367_v61 = vpack.c.bf16 %v3419_v7, %v3419_v7  ;;  %v8902_v10 = vpack.c.bf16 %v3420_v11, %v3420_v11  ;;  %v2906_v37 = vld [vmem:[#allocation2 + $0x18f] sm:$0xff]  ;;  %1589 = vst.msk [vmem:[#allocation3 + $0xb0] sm:$0xf] %vm1566_vm3, %v8897_v27  ;;  %v1207_v11 = vsub.f32 0.0, %v8905_v9 }
 0x251   : >> { %v3417_v63 = vld [vmem:[#allocation2 + $0x169] sm:$0xff]  ;;  %v3418_v29 = vld [vmem:[#allocation2 + $0x171] sm:$0xff]  ;;  %v8909_v49 = vpack.c.bf16 %v2906_v37, %v2906_v37 }
 0x252   : >> { %v6365_v41 = vpack.c.bf16 %v3417_v63, %v3417_v63  ;;  %v6366_v32 = vpack.c.bf16 %v3418_v29, %v3418_v29  ;;  %v2904_v4 = vld [vmem:[#allocation2 + $0x16f] sm:$0xff]  ;;  %3021 = vrot.lane.b32.xlu0 %v8695_v53, %s7909_s28  ;;  %3579 = vst.msk [vmem:[#allocation3 + $0xa4] sm:$0xf] %vm1566_vm3, %v6367_v61  ;;  %3580 = vst.msk [vmem:[#allocation3 + $0xac] sm:$0xf] %vm1566_vm3, %v8902_v10  ;;  %v6528_v63 = vpop.f32.mrf.mxu0  ;;  %v1205_v61 = vsub.f32 0.0, %v8918_v51 }
 0x253   : >> { %v1608_v7 = vld [vmem:[#allocation2 + $0x90] sm:$0xff]  ;;  %v8922_v39 = vpack.c.bf16 %v2904_v4, %v2904_v4  ;;  %1592 = vst.msk [vmem:[#allocation3 + $0xc8] sm:$0xf] %vm1566_vm3, %v8909_v49  ;;  %v1265_v53 = vmul.f32 1.442695, %v1207_v11  ;;  %v6129_v11 = vpack.c.bf16 %v1605_v16, %v1605_v16 }
 0x254   : >> { %3577 = vst.msk [vmem:[#allocation3 + $0x94] sm:$0xf] %vm1566_vm3, %v6365_v41  ;;  %3578 = vst.msk [vmem:[#allocation3 + $0x9c] sm:$0xf] %vm1566_vm3, %v6366_v32  ;;  %1990 = vrot.lane.b32.xlu1 %v6252_v12, %s7908_s22  ;;  %v8929_v29 = vld [vmem:[%s8535_s26] ss:$0 sm:$0xff]  ;;  %v6132_v37 = vpack.c.bf16 %v1608_v7, %v1608_v7  ;;  %v1153_v41 = vpop.f32.mrf.mxu0 }
 0x255   : >> { %v1162_v14 = vadd.f32 %v8929_v29, %v6528_v63  ;;  %1590 = vst.msk [vmem:[#allocation3 + $0xb8] sm:$0xf] %vm1566_vm3, %v8922_v39  ;;  %7213 = vpow2.f32 %v1265_v53  ;;  %v1261_v4 = vmul.f32 1.442695, %v1205_v61  ;;  %v1154_v12 = vadd.f32 %v8929_v29, %v1153_v41 }
 0x256   : >> { %3278 = vrot.lane.b32.xlu0 %v6131_v31, %s7910_s29  ;;  %v1606_v31 = vld [vmem:[#allocation2 + $0x70] sm:$0xff] }
 0x257   : >> { %v1208_v32 = vsub.f32 0.0, %v1162_v14  ;;  %7215 = vpow2.f32 %v1261_v4  ;;  %v1206_v30 = vsub.f32 0.0, %v1154_v12  ;;  %v6130_v63 = vpack.c.bf16 %v1606_v31, %v1606_v31  ;;  %v1609_v31 = vld [vmem:[#allocation2 + $0xa8] sm:$0xff] }
 0x258   : >> { %1745 = vrot.lane.b32.xlu1 %v6132_v37, %s7907_s21 }
 0x259   : >> { %v1267_v59 = vmul.f32 1.442695, %v1208_v32  ;;  %v1263_v7 = vmul.f32 1.442695, %v1206_v30 }
 0x25a   : >> { %1739 = vrot.lane.b32.xlu0 %v6129_v11, %s7907_s21 }
 0x25b   : >> { %7217 = vpow2.f32 %v1267_v59 }
 0x25c   : >> { %3023 = vrot.lane.b32.xlu1 %v8717_v47, %s7909_s28  ;;  %7219 = vpow2.f32 %v1263_v7 }
 0x25e   : >> { %3017 = vrot.lane.b32.xlu0 %v8703_v17, %s7909_s28 }
 0x260   : >> { %3280 = vrot.lane.b32.xlu1 %v6132_v37, %s7910_s29 }
 0x262   : >> { %3274 = vrot.lane.b32.xlu0 %v6129_v11, %s7910_s29  ;;  %v7214_v53 = vpop.eup %7213 }
 0x263   : >> { %v1303_v61 = vadd.f32 1.0, %v7214_v53 }
 0x264   : >> { %1741 = vrot.lane.b32.xlu1 %v6130_v63, %s7907_s21  ;;  %v7216_v16 = vpop.eup %7215 }
 0x265   : >> { %7221 = vrcp.f32 %v1303_v61  ;;  %v1301_v30 = vadd.f32 1.0, %v7216_v16  ;;  %v6531_v16 = vpop.f32.mrf.mxu0 }
 0x266   : >> { %2249 = vrot.lane.b32.xlu0 %v8703_v17, %s7912_s12  ;;  %v1611_v17 = vld [vmem:[#allocation2 + $0xc8] sm:$0xff] }
 0x267   : >> { %7223 = vrcp.f32 %v1301_v30  ;;  %v6135_v32 = vpack.c.bf16 %v1611_v17, %v1611_v17  ;;  %v1612_v30 = vld [vmem:[#allocation2 + $0xd0] sm:$0xff] }
 0x268   : >> { %v7218_v59 = vpop.eup %7217  ;;  %3019 = vrot.lane.b32.xlu1 %v8730_v44, %s7909_s28 }
 0x269   : >> { %v1304_v47 = vadd.f32 1.0, %v7218_v59  ;;  %v7220_v37 = vpop.eup %7219  ;;  %v8968_v59 = vadd.f32 %v8929_v29, %v6531_v16 }
 0x26a   : >> { %2506 = vrot.lane.b32.xlu0 %v6129_v11, %s7913_s13  ;;  %v1302_v41 = vadd.f32 1.0, %v7220_v37 }
 0x26b   : >> { %7225 = vrcp.f32 %v1304_v47  ;;  %v1615_v47 = vld [vmem:[#allocation2 + $0x108] sm:$0xff] }
 0x26c   : >> { %3276 = vrot.lane.b32.xlu1 %v6130_v63, %s7910_s29  ;;  %7227 = vrcp.f32 %v1302_v41 }
 0x26e   : >> { %2763 = vrot.lane.b32.xlu0 %v8720_v43, %s7914_s14 }
 0x270   : >> { %2251 = vrot.lane.b32.xlu1 %v8730_v44, %s7912_s12  ;;  %v6133_v44 = vpack.c.bf16 %v1609_v31, %v1609_v31 }
 0x272   : >> { %1996 = vrot.lane.b32.xlu0 %v8720_v43, %s7908_s22  ;;  %v7222_v4 = vpop.eup %7221 }
 0x273   : >> { %v1367_v11 = vmul.f32 %v7222_v4, %v8905_v9 }
 0x274   : >> { %2508 = vrot.lane.b32.xlu1 %v6130_v63, %s7913_s13  ;;  %v7224_v7 = vpop.eup %7223 }
 0x275   : >> { %1400 = vst.msk [vmem:[#allocation2 + $0x1c8] sm:$0xff] %vm451_vm0, %v1367_v11  ;;  %v1365_v53 = vmul.f32 %v7224_v7, %v8918_v51  ;;  %v1166_v51 = vpop.f32.mrf.mxu0 }
 0x276   : >> { %1751 = vrot.lane.b32.xlu0 %v6135_v32, %s7907_s21  ;;  %v8975_v37 = vadd.f32 %v8929_v29, %v1166_v51 }
 0x277   : >> { %1398 = vst.msk [vmem:[#allocation2 + $0x1a8] sm:$0xff] %vm451_vm0, %v1365_v53  ;;  %v6532_v41 = vpop.f32.mrf.mxu0 }
 0x278   : >> { %v7226_v61 = vpop.eup %7225  ;;  %2765 = vrot.lane.b32.xlu1 %v8722_v56, %s7914_s14  ;;  %v1209_v4 = vsub.f32 0.0, %v8975_v37  ;;  %v8981_v32 = vadd.f32 %v8929_v29, %v6532_v41 }
 0x279   : >> { %v1368_v43 = vmul.f32 %v7226_v61, %v1162_v14  ;;  %v7228_v63 = vpop.eup %7227  ;;  %v1211_v14 = vsub.f32 0.0, %v8968_v59  ;;  %v1169_v11 = vpop.f32.mrf.mxu0 }
 0x27a   : >> { %1747 = vrot.lane.b32.xlu0 %v6133_v44, %s7907_s21  ;;  %v1366_v9 = vmul.f32 %v7228_v63, %v1154_v12  ;;  %v6136_v12 = vpack.c.bf16 %v1612_v30, %v1612_v30  ;;  %v1269_v53 = vmul.f32 1.442695, %v1209_v4  ;;  %v1212_v61 = vsub.f32 0.0, %v8981_v32  ;;  %v1610_v63 = vld [vmem:[#allocation2 + $0xb0] sm:$0xff] }
 0x27b   : >> { %1401 = vst.msk [vmem:[#allocation2 + $0x1d0] sm:$0xff] %vm451_vm0, %v1368_v43  ;;  %v1273_v17 = vmul.f32 1.442695, %v1211_v14 }
 0x27c   : >> { %1998 = vrot.lane.b32.xlu1 %v8722_v56, %s7908_s22  ;;  %1399 = vst.msk [vmem:[#allocation2 + $0x1b0] sm:$0xff] %vm451_vm0, %v1366_v9  ;;  %v6139_v56 = vpack.c.bf16 %v1615_v47, %v1615_v47  ;;  %v1275_v30 = vmul.f32 1.442695, %v1212_v61  ;;  %v2909_v14 = vld [vmem:[#allocation2 + $0x1c7] sm:$0xff] }
 0x27d   : >> { %7229 = vpow2.f32 %v1273_v17  ;;  %v8998_v41 = vpack.c.bf16 %v2909_v14, %v2909_v14 }
 0x27e   : >> { %2008 = vrot.lane.b32.xlu0 %v8759_v36, %s7908_s22  ;;  %v8986_v36 = vadd.f32 %v8929_v29, %v1169_v11  ;;  %7231 = vpow2.f32 %v1269_v53  ;;  %v2907_v4 = vld [vmem:[#allocation2 + $0x1a7] sm:$0xff]  ;;  %v6134_v11 = vpack.c.bf16 %v1610_v63, %v1610_v63  ;;  %v1616_v53 = vld [vmem:[#allocation2 + $0x110] sm:$0xff] }
 0x27f   : >> { %7233 = vpow2.f32 %v1275_v30  ;;  %1595 = vst.msk [vmem:[#allocation3 + $0xe0] sm:$0xf] %vm1566_vm3, %v8998_v41 }
 0x280   : >> { %1753 = vrot.lane.b32.xlu1 %v6136_v12, %s7907_s21  ;;  %v1210_v51 = vsub.f32 0.0, %v8986_v36 }
 0x282   : >> { %v3423_v7 = vld [vmem:[#allocation2 + $0x1c9] sm:$0xff]  ;;  %v3424_v31 = vld [vmem:[#allocation2 + $0x1d1] sm:$0xff]  ;;  %1759 = vrot.lane.b32.xlu0 %v6139_v56, %s7907_s21  ;;  %v1271_v12 = vmul.f32 1.442695, %v1210_v51 }
 0x283   : >> { %v6371_v44 = vpack.c.bf16 %v3423_v7, %v3423_v7  ;;  %v6372_v43 = vpack.c.bf16 %v3424_v31, %v3424_v31  ;;  %v3421_v9 = vld [vmem:[#allocation2 + $0x1a9] sm:$0xff]  ;;  %v3422_v16 = vld [vmem:[#allocation2 + $0x1b1] sm:$0xff]  ;;  %v9008_v7 = vpack.c.bf16 %v2907_v4, %v2907_v4 }
 0x284   : >> { %2010 = vrot.lane.b32.xlu1 %v8761_v2, %s7908_s22  ;;  %v8994_v29 = vpack.c.bf16 %v3421_v9, %v3421_v9  ;;  %v8996_v47 = vpack.c.bf16 %v3422_v16, %v3422_v16  ;;  %v2910_v17 = vld [vmem:[#allocation2 + $0x1cf] sm:$0xff]  ;;  %7235 = vpow2.f32 %v1271_v12 }
 0x285   : >> { %3583 = vst.msk [vmem:[#allocation3 + $0xc4] sm:$0xf] %vm1566_vm3, %v6371_v44  ;;  %3584 = vst.msk [vmem:[#allocation3 + $0xcc] sm:$0xf] %vm1566_vm3, %v6372_v43  ;;  %v9006_v2 = vpack.c.bf16 %v2910_v17, %v2910_v17  ;;  %v2908_v31 = vld [vmem:[#allocation2 + $0x1af] sm:$0xff]  ;;  %v6140_v44 = vpack.c.bf16 %v1616_v53, %v1616_v53 }
 0x286   : >> { %3037 = vrot.lane.b32.xlu0 %v8781_v58, %s7909_s28  ;;  %3581 = vst.msk [vmem:[#allocation3 + $0xb4] sm:$0xf] %vm1566_vm3, %v8994_v29  ;;  %3582 = vst.msk [vmem:[#allocation3 + $0xbc] sm:$0xf] %vm1566_vm3, %v8996_v47  ;;  %v9010_v61 = vpack.c.bf16 %v2908_v31, %v2908_v31  ;;  %v1613_v16 = vld [vmem:[#allocation2 + $0xe8] sm:$0xff] }
 0x287   : >> { %1596 = vst.msk [vmem:[#allocation3 + $0xe8] sm:$0xf] %vm1566_vm3, %v9006_v2  ;;  %1593 = vst.msk [vmem:[#allocation3 + $0xd0] sm:$0xf] %vm1566_vm3, %v9008_v7  ;;  %v6137_v4 = vpack.c.bf16 %v1613_v16, %v1613_v16 }
 0x288   : >> { %1749 = vrot.lane.b32.xlu1 %v6134_v11, %s7907_s21  ;;  %1594 = vst.msk [vmem:[#allocation3 + $0xd8] sm:$0xf] %vm1566_vm3, %v9010_v61 }
 0x28a   : >> { %3294 = vrot.lane.b32.xlu0 %v6139_v56, %s7910_s29  ;;  %v7230_v43 = vpop.eup %7229 }
 0x28b   : >> { %v1307_v63 = vadd.f32 1.0, %v7230_v43  ;;  %v7232_v9 = vpop.eup %7231 }
 0x28c   : >> { %1761 = vrot.lane.b32.xlu1 %v6140_v44, %s7907_s21  ;;  %v1305_v30 = vadd.f32 1.0, %v7232_v9  ;;  %v7234_v51 = vpop.eup %7233 }
 0x28d   : >> { %7237 = vrcp.f32 %v1307_v63  ;;  %v1308_v14 = vadd.f32 1.0, %v7234_v51 }
 0x28e   : >> { %2269 = vrot.lane.b32.xlu0 %v8781_v58, %s7912_s12  ;;  %7239 = vrcp.f32 %v1305_v30 }
 0x28f   : >> { %7241 = vrcp.f32 %v1308_v14 }
 0x290   : >> { %3039 = vrot.lane.b32.xlu1 %v8809_v62, %s7909_s28 }
 0x291   : >> { %v7236_v12 = vpop.eup %7235 }
 0x292   : >> { %2526 = vrot.lane.b32.xlu0 %v6139_v56, %s7913_s13  ;;  %v1306_v58 = vadd.f32 1.0, %v7236_v12 }
 0x294   : >> { %v1736_v17 = vpop.permute.xlu0 %1735  ;;  %3296 = vrot.lane.b32.xlu1 %v6140_v44, %s7910_s29  ;;  %7243 = vrcp.f32 %v1306_v58 }
 0x295   : >> { %1828 = vst.msk [vmem:[#allocation3 + $0x20] sm:$0xf] %vm1823_vm2, %v1736_v17 }
 0x296   : >> { %v1732_v11 = vpop.permute.xlu1 %1731  ;;  %1755 = vrot.lane.b32.xlu0 %v6137_v4, %s7907_s21 }
 0x297   : >> { %1826 = vst.msk [vmem:[#allocation3 + $0x10] sm:$0xf] %vm1823_vm2, %v1732_v11  ;;  %v1619_v11 = vld [vmem:[#allocation2 + $0x148] sm:$0xff] }
 0x298   : >> { %v9032_v31 = vpop.permute.xlu0 %3013  ;;  %2271 = vrot.lane.b32.xlu1 %v8809_v62, %s7912_s12 }
 0x29a   : >> { %v1738_v56 = vpop.permute.xlu1 %1737  ;;  %2265 = vrot.lane.b32.xlu0 %v8791_v40, %s7912_s12  ;;  %v7238_v43 = vpop.eup %7237 }
 0x29b   : >> { %1829 = vst.msk [vmem:[#allocation3 + $0x28] sm:$0xf] %vm1823_vm2, %v1738_v56  ;;  %v1371_v9 = vmul.f32 %v7238_v43, %v8968_v59  ;;  %v7240_v16 = vpop.eup %7239 }
 0x29c   : >> { %v9039_v53 = vpop.permute.xlu0 %3270  ;;  %2528 = vrot.lane.b32.xlu1 %v6140_v44, %s7913_s13  ;;  %v1369_v40 = vmul.f32 %v7240_v16, %v8975_v37  ;;  %v7242_v62 = vpop.eup %7241  ;;  %v1614_v44 = vld [vmem:[#allocation2 + $0xf0] sm:$0xff] }
 0x29d   : >> { %1404 = vst.msk [vmem:[#allocation2 + $0x208] sm:$0xff] %vm451_vm0, %v1371_v9  ;;  %v1372_v59 = vmul.f32 %v7242_v62, %v8981_v32 }
 0x29e   : >> { %v9042_v63 = vpop.permute.xlu1 %3015  ;;  %2522 = vrot.lane.b32.xlu0 %v6137_v4, %s7913_s13  ;;  %1402 = vst.msk [vmem:[#allocation2 + $0x1e8] sm:$0xff] %vm451_vm0, %v1369_v40  ;;  %v6138_v4 = vpack.c.bf16 %v1614_v44, %v1614_v44 }
 0x29f   : >> { %1405 = vst.msk [vmem:[#allocation2 + $0x210] sm:$0xff] %vm451_vm0, %v1372_v59 }
 0x2a0   : >> { %v9046_v30 = vpop.permute.xlu0 %2245  ;;  %2785 = vrot.lane.b32.xlu1 %v8829_v38, %s7914_s14 }
 0x2a1   : >> { %v7244_v14 = vpop.eup %7243 }
 0x2a2   : >> { %v9052_v51 = vpop.permute.xlu1 %3272  ;;  %2783 = vrot.lane.b32.xlu0 %v8811_v20, %s7914_s14  ;;  %v1370_v37 = vmul.f32 %v7244_v14, %v8986_v36 }
 0x2a4   : >> { %v9058_v12 = vpop.permute.xlu0 %2502  ;;  %2018 = vrot.lane.b32.xlu1 %v8829_v38, %s7908_s22  ;;  %1403 = vst.msk [vmem:[#allocation2 + $0x1f0] sm:$0xff] %vm451_vm0, %v1370_v37  ;;  %v6143_v37 = vpack.c.bf16 %v1619_v11, %v1619_v11 }
 0x2a5   : >> { %v2911_v44 = vld [vmem:[#allocation2 + $0x1e7] sm:$0xff] }
 0x2a6   : >> { %v9064_v17 = vpop.permute.xlu1 %2247  ;;  %2016 = vrot.lane.b32.xlu0 %v8811_v20, %s7908_s22  ;;  %v3427_v20 = vld [vmem:[#allocation2 + $0x209] sm:$0xff]  ;;  %v3428_v36 = vld [vmem:[#allocation2 + $0x211] sm:$0xff] }
 0x2a7   : >> { %v6375_v56 = vpack.c.bf16 %v3427_v20, %v3427_v20  ;;  %v6376_v43 = vpack.c.bf16 %v3428_v36, %v3428_v36  ;;  %v1620_v36 = vld [vmem:[#allocation2 + $0x150] sm:$0xff] }
 0x2a8   : >> { %v2242_v32 = vpop.permute.xlu0 %2241  ;;  %1757 = vrot.lane.b32.xlu1 %v6138_v4, %s7907_s21 }
 0x2a9   : >> { %2338 = vst.msk [vmem:[#allocation3] sm:$0xf] %vm2337_vm5, %v2242_v32  ;;  %v9089_v32 = vpack.c.bf16 %v2911_v44, %v2911_v44 }
 0x2aa   : >> { %v9071_v58 = vpop.permute.xlu1 %2504  ;;  %2779 = vrot.lane.b32.xlu0 %v8813_v55, %s7914_s14  ;;  %3587 = vst.msk [vmem:[#allocation3 + $0xe4] sm:$0xf] %vm1566_vm3, %v6375_v56  ;;  %3588 = vst.msk [vmem:[#allocation3 + $0xec] sm:$0xf] %vm1566_vm3, %v6376_v43  ;;  %v6144_v43 = vpack.c.bf16 %v1620_v36, %v1620_v36 }
 0x2ab   : >> { %v3425_v16 = vld [vmem:[#allocation2 + $0x1e9] sm:$0xff]  ;;  %v3426_v40 = vld [vmem:[#allocation2 + $0x1f1] sm:$0xff]  ;;  %1597 = vst.msk [vmem:[#allocation3 + $0xf0] sm:$0xf] %vm1566_vm3, %v9089_v32 }
 0x2ac   : >> { %v2499_v38 = vpop.permute.xlu0 %2498  ;;  %2267 = vrot.lane.b32.xlu1 %v8824_v8, %s7912_s12  ;;  %v9084_v62 = vpack.c.bf16 %v3425_v16, %v3425_v16  ;;  %v9086_v8 = vpack.c.bf16 %v3426_v40, %v3426_v40  ;;  %v2912_v59 = vld [vmem:[#allocation2 + $0x1ef] sm:$0xff] }
 0x2ad   : >> { %2595 = vst.msk [vmem:[#allocation3] sm:$0xf] %vm2594_vm6, %v2499_v38  ;;  %v9091_v38 = vpack.c.bf16 %v2912_v59, %v2912_v59  ;;  %v7079_v59 = vld [vmem:[#allocation3 + $0x4] ss:$8 sps:$4 sm:$0xff]  }
 0x2ae   : >> { %v9078_v9 = vpop.permute.xlu1 %2761  ;;  %2012 = vrot.lane.b32.xlu0 %v8813_v55, %s7908_s22  ;;  %3585 = vst.msk [vmem:[#allocation3 + $0xd4] sm:$0xf] %vm1566_vm3, %v9084_v62  ;;  %3586 = vst.msk [vmem:[#allocation3 + $0xdc] sm:$0xf] %vm1566_vm3, %v9086_v8  ;;  %6017 = vmatprep.mubr.msk.bf16.mxu0 %vm451_vm0, %v7079_v59 }
 0x2af   : >> { %1598 = vst.msk [vmem:[#allocation3 + $0xf8] sm:$0xf] %vm1566_vm3, %v9091_v38 }
 0x2b0   : >> { %v2760_v14 = vpop.permute.xlu0 %2759  ;;  %2524 = vrot.lane.b32.xlu1 %v6138_v4, %s7913_s13 }
 0x2b2   : >> { %v1995_v55 = vpop.permute.xlu1 %1994  ;;  %1767 = vrot.lane.b32.xlu0 %v6143_v37, %s7907_s21 }
 0x2b3   : >> { %2086 = vst.msk [vmem:[#allocation3 + $0x28] sm:$0xf] %vm2080_vm4, %v1995_v55 }
 0x2b4   : >> { %v1993_v4 = vpop.permute.xlu0 %1992  ;;  %2781 = vrot.lane.b32.xlu1 %v8815_v18, %s7914_s14 }
 0x2b5   : >> { %2085 = vst.msk [vmem:[#allocation3 + $0x20] sm:$0xf] %vm2080_vm4, %v1993_v4 }
 0x2b6   : >> { %v1734_v20 = vpop.permute.xlu1 %1733  ;;  %3045 = vrot.lane.b32.xlu0 %v8840_v1, %s7909_s28 }
 0x2b7   : >> { %1827 = vst.msk [vmem:[#allocation3 + $0x18] sm:$0xf] %vm1823_vm2, %v1734_v20 }
 0x2b8   : >> { %v2756_v11 = vpop.permute.xlu0 %2755  ;;  %2014 = vrot.lane.b32.xlu1 %v8815_v18, %s7908_s22 }
 0x2b9   : >> { %2852 = vst.msk [vmem:[#allocation3] sm:$0xf] %vm2851_vm7, %v2756_v11 }
 0x2ba   : >> { %3110 = vst.msk [vmem:[#allocation3] sm:$0xf] %vm3109_vm8, %v9032_v31  ;;  %v2244_v56 = vpop.permute.xlu1 %2243  ;;  %3302 = vrot.lane.b32.xlu0 %v6143_v37, %s7910_s29 }
 0x2bb   : >> { %3367 = vst.msk [vmem:[#allocation3] sm:$0xf] %vm3366_vm9, %v9039_v53  ;;  %v1617_v53 = vld [vmem:[#allocation2 + $0x128] sm:$0xff] }
 0x2bc   : >> { %2339 = vst.msk [vmem:[#allocation3 + $0x8] sm:$0xf] %vm2337_vm5, %v2244_v56  ;;  %v1989_v16 = vpop.permute.xlu0 %1988  ;;  %1769 = vrot.lane.b32.xlu1 %v6144_v43, %s7907_s21 }
 0x2bd   : >> { %2083 = vst.msk [vmem:[#allocation3 + $0x10] sm:$0xf] %vm2080_vm4, %v1989_v16 }
 0x2be   : >> { %2340 = vst.msk [vmem:[#allocation3 + $0x10] sm:$0xf] %vm2337_vm5, %v9046_v30  ;;  %v2501_v18 = vpop.permute.xlu1 %2500  ;;  %2277 = vrot.lane.b32.xlu0 %v8840_v1, %s7912_s12  ;;  %v6141_v30 = vpack.c.bf16 %v1617_v53, %v1617_v53  ;;  %v7080_v53 = vld [vmem:[#allocation3 + $0x14] ss:$8 sps:$4 sm:$0xff]  }
 0x2bf   : >> { %2597 = vst.msk [vmem:[#allocation3 + $0x10] sm:$0xf] %vm2594_vm6, %v9058_v12  ;;  %2596 = vst.msk [vmem:[#allocation3 + $0x8] sm:$0xf] %vm2594_vm6, %v2501_v18 }
 0x2c0   : >> { %2854 = vst.msk [vmem:[#allocation3 + $0x10] sm:$0xf] %vm2851_vm7, %v2760_v14  ;;  %v1744_v31 = vpop.permute.xlu0 %1743  ;;  %3047 = vrot.lane.b32.xlu1 %v8871_v34, %s7909_s28  ;;  %v1618_v14 = vld [vmem:[#allocation2 + $0x130] sm:$0xff] }
 0x2c1   : >> { %1832 = vst.msk [vmem:[#allocation3 + $0x40] sm:$0xf] %vm1823_vm2, %v1744_v31  ;;  %v6142_v4 = vpack.c.bf16 %v1618_v14, %v1618_v14 }
 0x2c2   : >> { %v2758_v40 = vpop.permute.xlu1 %2757  ;;  %2534 = vrot.lane.b32.xlu0 %v6143_v37, %s7913_s13 }
 0x2c3   : >> { %2853 = vst.msk [vmem:[#allocation3 + $0x8] sm:$0xf] %vm2851_vm7, %v2758_v40 }
 0x2c4   : >> { %3111 = vst.msk [vmem:[#allocation3 + $0x8] sm:$0xf] %vm3109_vm8, %v9042_v63  ;;  %v3022_v1 = vpop.permute.xlu0 %3021  ;;  %3304 = vrot.lane.b32.xlu1 %v6144_v43, %s7910_s29 }
 0x2c5   : >> { %3368 = vst.msk [vmem:[#allocation3 + $0x8] sm:$0xf] %vm3366_vm9, %v9052_v51 }
 0x2c6   : >> { %v1991_v12 = vpop.permute.xlu1 %1990  ;;  %1763 = vrot.lane.b32.xlu0 %v6141_v30, %s7907_s21 }
 0x2c7   : >> { %2084 = vst.msk [vmem:[#allocation3 + $0x18] sm:$0xf] %vm2080_vm4, %v1991_v12 }
 0x2c8   : >> { %2341 = vst.msk [vmem:[#allocation3 + $0x18] sm:$0xf] %vm2337_vm5, %v9064_v17  ;;  %v3279_v44 = vpop.permute.xlu0 %3278  ;;  %2279 = vrot.lane.b32.xlu1 %v8871_v34, %s7912_s12 }
 0x2c9   : >> { %2598 = vst.msk [vmem:[#allocation3 + $0x18] sm:$0xf] %vm2594_vm6, %v9071_v58 }
 0x2ca   : >> { %2855 = vst.msk [vmem:[#allocation3 + $0x18] sm:$0xf] %vm2851_vm7, %v9078_v9  ;;  %v1746_v63 = vpop.permute.xlu1 %1745  ;;  %3041 = vrot.lane.b32.xlu0 %v8850_v24, %s7909_s28 }
 0x2cb   : >> { %1833 = vst.msk [vmem:[#allocation3 + $0x48] sm:$0xf] %vm1823_vm2, %v1746_v63 }
 0x2cc   : >> { %v1740_v51 = vpop.permute.xlu0 %1739  ;;  %2536 = vrot.lane.b32.xlu1 %v6144_v43, %s7913_s13  ;;  %v7077_v17 = vld [vmem:[#allocation3] ss:$8 sps:$4 sm:$0xff]  }
 0x2cd   : >> { %1830 = vst.msk [vmem:[#allocation3 + $0x30] sm:$0xf] %vm1823_vm2, %v1740_v51  ;;  %3931 = vmatmul.mubr.bf16.vlgmr.msra.gmra.mxu0 %v7077_v17  ;;  %v1624_v51 = vld [vmem:[#allocation2 + $0x190] sm:$0xff] }
 0x2ce   : >> { %v3024_v34 = vpop.permute.xlu1 %3023  ;;  %3298 = vrot.lane.b32.xlu0 %v6141_v30, %s7910_s29  ;;  %6018 = vmatprep.mubr.msk.bf16.mxu0 %vm451_vm0, %v7080_v53 }
 0x2d0   : >> { %v3018_v58 = vpop.permute.xlu0 %3017  ;;  %2793 = vrot.lane.b32.xlu1 %v8862_v19, %s7914_s14 }
 0x2d1   : >> { %3112 = vst.msk [vmem:[#allocation3 + $0x10] sm:$0xf] %vm3109_vm8, %v3018_v58 }
 0x2d2   : >> { %v3281_v9 = vpop.permute.xlu1 %3280  ;;  %2273 = vrot.lane.b32.xlu0 %v8850_v24, %s7912_s12 }
 0x2d4   : >> { %v3275_v37 = vpop.permute.xlu0 %3274  ;;  %2026 = vrot.lane.b32.xlu1 %v8862_v19, %s7908_s22 }
 0x2d5   : >> { %3369 = vst.msk [vmem:[#allocation3 + $0x10] sm:$0xf] %vm3366_vm9, %v3275_v37 }
 0x2d6   : >> { %v1742_v55 = vpop.permute.xlu1 %1741  ;;  %2530 = vrot.lane.b32.xlu0 %v6141_v30, %s7913_s13 }
 0x2d7   : >> { %1831 = vst.msk [vmem:[#allocation3 + $0x38] sm:$0xf] %vm1823_vm2, %v1742_v55 }
 0x2d8   : >> { %v2250_v20 = vpop.permute.xlu0 %2249  ;;  %1765 = vrot.lane.b32.xlu1 %v6142_v4, %s7907_s21 }
 0x2d9   : >> { %2342 = vst.msk [vmem:[#allocation3 + $0x20] sm:$0xf] %vm2337_vm5, %v2250_v20 }
 0x2da   : >> { %v3020_v36 = vpop.permute.xlu1 %3019  ;;  %2791 = vrot.lane.b32.xlu0 %v8860_v42, %s7914_s14 }
 0x2db   : >> { %3113 = vst.msk [vmem:[#allocation3 + $0x18] sm:$0xf] %vm3109_vm8, %v3020_v36 }
 0x2dc   : >> { %v2507_v24 = vpop.permute.xlu0 %2506  ;;  %3043 = vrot.lane.b32.xlu1 %v8879_v15, %s7909_s28  ;;  %v3593_v18 = vld [vmem:[#allocation3 + $0x10] sm:$0xff] }
 0x2dd   : >> { %2599 = vst.msk [vmem:[#allocation3 + $0x20] sm:$0xf] %vm2594_vm6, %v2507_v24 }
 0x2de   : >> { %v3277_v19 = vpop.permute.xlu1 %3276  ;;  %2024 = vrot.lane.b32.xlu0 %v8860_v42, %s7908_s22  ;;  %v1623_v42 = vld [vmem:[#allocation2 + $0x188] sm:$0xff] }
 0x2df   : >> { %3370 = vst.msk [vmem:[#allocation3 + $0x18] sm:$0xf] %vm3366_vm9, %v3277_v19 }
 0x2e0   : >> { %v2764_v11 = vpop.permute.xlu0 %2763  ;;  %3300 = vrot.lane.b32.xlu1 %v6142_v4, %s7910_s29 }
 0x2e1   : >> { %2856 = vst.msk [vmem:[#allocation3 + $0x20] sm:$0xf] %vm2851_vm7, %v2764_v11 }
 0x2e2   : >> { %3114 = vst.msk [vmem:[#allocation3 + $0x20] sm:$0xf] %vm3109_vm8, %v3022_v1  ;;  %v2252_v56 = vpop.permute.xlu1 %2251  ;;  %2787 = vrot.lane.b32.xlu0 %v8868_v3, %s7914_s14  ;;  %v2644_v1 = vld [vmem:[#allocation2 + $0x131] sm:$0xff] }
 0x2e3   : >> { %3371 = vst.msk [vmem:[#allocation3 + $0x20] sm:$0xf] %vm3366_vm9, %v3279_v44 }
 0x2e4   : >> { %2343 = vst.msk [vmem:[#allocation3 + $0x28] sm:$0xf] %vm2337_vm5, %v2252_v56  ;;  %v1997_v43 = vpop.permute.xlu0 %1996  ;;  %2275 = vrot.lane.b32.xlu1 %v8879_v15, %s7912_s12  ;;  %v6147_v15 = vpack.c.bf16 %v1623_v42, %v1623_v42 }
 0x2e5   : >> { %2087 = vst.msk [vmem:[#allocation3 + $0x30] sm:$0xf] %vm2080_vm4, %v1997_v43 }
 0x2e6   : >> { %v2509_v16 = vpop.permute.xlu1 %2508  ;;  %2020 = vrot.lane.b32.xlu0 %v8868_v3, %s7908_s22  ;;  %v3594_v31 = vld [vmem:[#allocation3 + $0x18] sm:$0xff]  ;;  %v6268_v3 = vpack.c.bf16 %v2644_v1, %v2644_v1 }
 0x2e7   : >> { %2600 = vst.msk [vmem:[#allocation3 + $0x28] sm:$0xf] %vm2594_vm6, %v2509_v16  ;;  %v5978_v40 = vcombine.low %v3593_v18, %v3594_v31  ;;  %v2649_v31 = vld [vmem:[#allocation2 + $0x189] sm:$0xff] }
 0x2e8   : >> { %v1752_v30 = vpop.permute.xlu0 %1751  ;;  %2532 = vrot.lane.b32.xlu1 %v6142_v4, %s7913_s13  ;;  %v1621_v4 = vld [vmem:[#allocation2 + $0x168] sm:$0xff] }
 0x2e9   : >> { %1836 = vst.msk [vmem:[#allocation3 + $0x60] sm:$0xf] %vm1823_vm2, %v1752_v30  ;;  %3939 = vmatmul.mubr.bf16.gmra.mxu0 %v5978_v40  ;;  %v6145_v24 = vpack.c.bf16 %v1621_v4, %v1621_v4  ;;  %v6273_v30 = vpack.c.bf16 %v2649_v31, %v2649_v31  ;;  %v1628_v4 = vld [vmem:[#allocation2 + $0x1d0] sm:$0xff] }
 0x2ea   : >> { %v2766_v12 = vpop.permute.xlu1 %2765  ;;  %1775 = vrot.lane.b32.xlu0 %v6147_v15, %s7907_s21 }
 0x2eb   : >> { %2857 = vst.msk [vmem:[#allocation3 + $0x28] sm:$0xf] %vm2851_vm7, %v2766_v12 }
 0x2ec   : >> { %3115 = vst.msk [vmem:[#allocation3 + $0x28] sm:$0xf] %vm3109_vm8, %v3024_v34  ;;  %v1748_v44 = vpop.permute.xlu0 %1747  ;;  %2789 = vrot.lane.b32.xlu1 %v6268_v3, %s7914_s14  ;;  %v6148_v34 = vpack.c.bf16 %v1624_v51, %v1624_v51 }
 0x2ed   : >> { %3372 = vst.msk [vmem:[#allocation3 + $0x28] sm:$0xf] %vm3366_vm9, %v3281_v9  ;;  %v7082_v9 = vld [vmem:[#allocation3 + $0x24] ss:$8 sps:$4 sm:$0xff]  }
 0x2ee   : >> { %1834 = vst.msk [vmem:[#allocation3 + $0x50] sm:$0xf] %vm1823_vm2, %v1748_v44  ;;  %v1999_v63 = vpop.permute.xlu1 %1998  ;;  %3053 = vrot.lane.b32.xlu0 %v8893_v50, %s7909_s28  ;;  %6019 = vmatprep.mubr.msk.bf16.mxu0 %vm451_vm0, %v7082_v9 }
 0x2ef   : >> { %2088 = vst.msk [vmem:[#allocation3 + $0x38] sm:$0xf] %vm2080_vm4, %v1999_v63 }
 0x2f0   : >> { %v2009_v17 = vpop.permute.xlu0 %2008  ;;  %2022 = vrot.lane.b32.xlu1 %v6268_v3, %s7908_s22 }
 0x2f1   : >> { %2093 = vst.msk [vmem:[#allocation3 + $0x60] sm:$0xf] %vm2080_vm4, %v2009_v17  ;;  %v1627_v17 = vld [vmem:[#allocation2 + $0x1c8] sm:$0xff] }
 0x2f2   : >> { %v1754_v59 = vpop.permute.xlu1 %1753  ;;  %3310 = vrot.lane.b32.xlu0 %v6147_v15, %s7910_s29  ;;  %v9260_v9 = vpack.c.bf16 %v1627_v17, %v1627_v17  ;;  %v2119_v17 = vld [vmem:[#allocation2 + $0x87] sm:$0xff] }
 0x2f3   : >> { %1837 = vst.msk [vmem:[#allocation3 + $0x68] sm:$0xf] %vm1823_vm2, %v1754_v59 }
 0x2f4   : >> { %v1760_v58 = vpop.permute.xlu0 %1759  ;;  %1777 = vrot.lane.b32.xlu1 %v6148_v34, %s7907_s21  ;;  %v7084_v14 = vld [vmem:[#allocation3 + $0x20] ss:$8 sps:$4 sm:$0xff]  }
 0x2f5   : >> { %1840 = vst.msk [vmem:[#allocation3 + $0x80] sm:$0xf] %vm1823_vm2, %v1760_v58  ;;  %3947 = vmatmul.mubr.bf16.gmra.mxu0 %v7084_v14 }
 0x2f6   : >> { %v2011_v37 = vpop.permute.xlu1 %2010  ;;  %2285 = vrot.lane.b32.xlu0 %v8893_v50, %s7912_s12 }
 0x2f7   : >> { %2094 = vst.msk [vmem:[#allocation3 + $0x68] sm:$0xf] %vm2080_vm4, %v2011_v37 }
 0x2f8   : >> { %v3038_v55 = vpop.permute.xlu0 %3037  ;;  %3055 = vrot.lane.b32.xlu1 %v8909_v49, %s7909_s28 }
 0x2fa   : >> { %v1750_v20 = vpop.permute.xlu1 %1749  ;;  %2542 = vrot.lane.b32.xlu0 %v6147_v15, %s7913_s13 }
 0x2fb   : >> { %1835 = vst.msk [vmem:[#allocation3 + $0x58] sm:$0xf] %vm1823_vm2, %v1750_v20 }
 0x2fc   : >> { %v3295_v36 = vpop.permute.xlu0 %3294  ;;  %3312 = vrot.lane.b32.xlu1 %v6148_v34, %s7910_s29 }
 0x2fe   : >> { %v1762_v50 = vpop.permute.xlu1 %1761  ;;  %1771 = vrot.lane.b32.xlu0 %v6145_v24, %s7907_s21 }
 0x2ff   : >> { %1841 = vst.msk [vmem:[#allocation3 + $0x88] sm:$0xf] %vm1823_vm2, %v1762_v50  ;;  %v9283_v50 = vpack.c.bf16 %v1628_v4, %v1628_v4  ;;  %v1630_v4 = vld [vmem:[#allocation2 + $0x1f0] sm:$0xff] }
 0x300   : >> { %v2270_v19 = vpop.permute.xlu0 %2269  ;;  %2287 = vrot.lane.b32.xlu1 %v8909_v49, %s7912_s12  ;;  %v1622_v49 = vld [vmem:[#allocation2 + $0x170] sm:$0xff] }
 0x301   : >> { %v6146_v40 = vpack.c.bf16 %v1622_v49, %v1622_v49 }
 0x302   : >> { %v9220_v11 = vpop.permute.xlu1 %3039  ;;  %3049 = vrot.lane.b32.xlu0 %v8897_v27, %s7909_s28 }
 0x304   : >> { %v2527_v56 = vpop.permute.xlu0 %2526  ;;  %2544 = vrot.lane.b32.xlu1 %v6148_v34, %s7913_s13  ;;  %v2648_v34 = vld [vmem:[#allocation2 + $0x171] sm:$0xff] }
 0x305   : >> { %v6272_v14 = vpack.c.bf16 %v2648_v34, %v2648_v34 }
 0x306   : >> { %v9225_v43 = vpop.permute.xlu1 %3296  ;;  %3306 = vrot.lane.b32.xlu0 %v6145_v24, %s7910_s29 }
 0x308   : >> { %v1756_v42 = vpop.permute.xlu0 %1755  ;;  %2801 = vrot.lane.b32.xlu1 %v8902_v10, %s7914_s14 }
 0x309   : >> { %1838 = vst.msk [vmem:[#allocation3 + $0x70] sm:$0xf] %vm1823_vm2, %v1756_v42 }
 0x30a   : >> { %v9231_v16 = vpop.permute.xlu1 %2271  ;;  %2281 = vrot.lane.b32.xlu0 %v8897_v27, %s7912_s12 }
 0x30c   : >> { %v2266_v18 = vpop.permute.xlu0 %2265  ;;  %2034 = vrot.lane.b32.xlu1 %v8902_v10, %s7908_s22  ;;  %v2647_v10 = vld [vmem:[#allocation2 + $0x169] sm:$0xff] }
 0x30d   : >> { %2350 = vst.msk [vmem:[#allocation3 + $0x60] sm:$0xf] %vm2337_vm5, %v2266_v18  ;;  %v6271_v44 = vpack.c.bf16 %v2647_v10, %v2647_v10  ;;  %v1626_v18 = vld [vmem:[#allocation2 + $0x1b0] sm:$0xff] }
 0x30e   : >> { %v9238_v53 = vpop.permute.xlu1 %2528  ;;  %2538 = vrot.lane.b32.xlu0 %v6145_v24, %s7913_s13 }
 0x310   : >> { %v2523_v1 = vpop.permute.xlu0 %2522  ;;  %1773 = vrot.lane.b32.xlu1 %v6146_v40, %s7907_s21 }
 0x311   : >> { %2607 = vst.msk [vmem:[#allocation3 + $0x60] sm:$0xf] %vm2594_vm6, %v2523_v1 }
 0x312   : >> { %v2786_v27 = vpop.permute.xlu1 %2785  ;;  %2799 = vrot.lane.b32.xlu0 %v6273_v30, %s7914_s14 }
 0x314   : >> { %v2784_v15 = vpop.permute.xlu0 %2783  ;;  %3051 = vrot.lane.b32.xlu1 %v8922_v39, %s7909_s28 }
 0x316   : >> { %v2019_v12 = vpop.permute.xlu1 %2018  ;;  %2032 = vrot.lane.b32.xlu0 %v6273_v30, %s7908_s22 }
 0x317   : >> { %2098 = vst.msk [vmem:[#allocation3 + $0x88] sm:$0xf] %vm2080_vm4, %v2019_v12 }
 0x318   : >> { %v2017_v3 = vpop.permute.xlu0 %2016  ;;  %3308 = vrot.lane.b32.xlu1 %v6146_v40, %s7910_s29 }
 0x319   : >> { %2097 = vst.msk [vmem:[#allocation3 + $0x80] sm:$0xf] %vm2080_vm4, %v2017_v3  ;;  %v1629_v3 = vld [vmem:[#allocation2 + $0x1e8] sm:$0xff] }
 0x31a   : >> { %v1758_v63 = vpop.permute.xlu1 %1757  ;;  %2795 = vrot.lane.b32.xlu0 %v6271_v44, %s7914_s14 }
 0x31b   : >> { %1839 = vst.msk [vmem:[#allocation3 + $0x78] sm:$0xf] %vm1823_vm2, %v1758_v63 }
 0x31c   : >> { %v2780_v51 = vpop.permute.xlu0 %2779  ;;  %2283 = vrot.lane.b32.xlu1 %v8922_v39, %s7912_s12 }
 0x31d   : >> { %2864 = vst.msk [vmem:[#allocation3 + $0x60] sm:$0xf] %vm2851_vm7, %v2780_v51  ;;  %v9338_v51 = vpack.c.bf16 %v1629_v3, %v1629_v3  ;;  %v2634_v3 = vld [vmem:[#allocation2 + $0x91] sm:$0xff] }
 0x31e   : >> { %3122 = vst.msk [vmem:[#allocation3 + $0x60] sm:$0xf] %vm3109_vm8, %v3038_v55  ;;  %v2268_v59 = vpop.permute.xlu1 %2267  ;;  %2028 = vrot.lane.b32.xlu0 %v6271_v44, %s7908_s22 }
 0x31f   : >> { %3379 = vst.msk [vmem:[#allocation3 + $0x60] sm:$0xf] %vm3366_vm9, %v3295_v36  ;;  %v1625_v36 = vld [vmem:[#allocation2 + $0x1a8] sm:$0xff] }
 0x320   : >> { %2351 = vst.msk [vmem:[#allocation3 + $0x68] sm:$0xf] %vm2337_vm5, %v2268_v59  ;;  %v2013_v58 = vpop.permute.xlu0 %2012  ;;  %2540 = vrot.lane.b32.xlu1 %v6146_v40, %s7913_s13  ;;  %v6150_v40 = vpack.c.bf16 %v1626_v18, %v1626_v18  ;;  %v7088_v18 = vld [vmem:[#allocation3 + $0x74] ss:$8 sps:$4 sm:$0xff]  }
 0x321   : >> { %2095 = vst.msk [vmem:[#allocation3 + $0x70] sm:$0xf] %vm2080_vm4, %v2013_v58  ;;  %v2120_v58 = vld [vmem:[#allocation2 + $0x8f] sm:$0xff] }
 0x322   : >> { %2352 = vst.msk [vmem:[#allocation3 + $0x70] sm:$0xf] %vm2337_vm5, %v2270_v19  ;;  %v2525_v39 = vpop.permute.xlu1 %2524  ;;  %1783 = vrot.lane.b32.xlu0 %v9260_v9, %s7907_s21 }
 0x323   : >> { %2609 = vst.msk [vmem:[#allocation3 + $0x70] sm:$0xf] %vm2594_vm6, %v2527_v56  ;;  %2608 = vst.msk [vmem:[#allocation3 + $0x68] sm:$0xf] %vm2594_vm6, %v2525_v39 }
 0x324   : >> { %2866 = vst.msk [vmem:[#allocation3 + $0x70] sm:$0xf] %vm2851_vm7, %v2784_v15  ;;  %v1768_v37 = vpop.permute.xlu0 %1767  ;;  %2797 = vrot.lane.b32.xlu1 %v6272_v14, %s7914_s14 }
 0x325   : >> { %1844 = vst.msk [vmem:[#allocation3 + $0xa0] sm:$0xf] %vm1823_vm2, %v1768_v37 }
 0x326   : >> { %v2782_v55 = vpop.permute.xlu1 %2781  ;;  %3061 = vrot.lane.b32.xlu0 %v8998_v41, %s7909_s28 }
 0x327   : >> { %2865 = vst.msk [vmem:[#allocation3 + $0x68] sm:$0xf] %vm2851_vm7, %v2782_v55  ;;  %v6194_v55 = vpack.c.bf16 %v2120_v58, %v2120_v58 }
 0x328   : >> { %3123 = vst.msk [vmem:[#allocation3 + $0x68] sm:$0xf] %vm3109_vm8, %v9220_v11  ;;  %v9276_v20 = vpop.permute.xlu0 %3045  ;;  %2030 = vrot.lane.b32.xlu1 %v6272_v14, %s7908_s22  ;;  %v6149_v11 = vpack.c.bf16 %v1625_v36, %v1625_v36  ;;  %v2376_v14 = vld [vmem:[#allocation2 + $0x88] sm:$0xff] }
 0x329   : >> { %3380 = vst.msk [vmem:[#allocation3 + $0x68] sm:$0xf] %vm3366_vm9, %v9225_v43 }
 0x32a   : >> { %v2015_v24 = vpop.permute.xlu1 %2014  ;;  %3318 = vrot.lane.b32.xlu0 %v9260_v9, %s7910_s29 }
 0x32b   : >> { %2096 = vst.msk [vmem:[#allocation3 + $0x78] sm:$0xf] %vm2080_vm4, %v2015_v24  ;;  %v6225_v24 = vpack.c.bf16 %v2376_v14, %v2376_v14  ;;  %v3149_v14 = vld [vmem:[#allocation2 + $0xb0] sm:$0xff] }
 0x32c   : >> { %2353 = vst.msk [vmem:[#allocation3 + $0x78] sm:$0xf] %vm2337_vm5, %v9231_v16  ;;  %v9288_v19 = vpop.permute.xlu0 %3302  ;;  %1785 = vrot.lane.b32.xlu1 %v9283_v50, %s7907_s21  ;;  %v7087_v16 = vld [vmem:[#allocation3 + $0x64] ss:$8 sps:$4 sm:$0xff]  }
 0x32d   : >> { %2610 = vst.msk [vmem:[#allocation3 + $0x78] sm:$0xf] %vm2594_vm6, %v9238_v53  ;;  %6023 = vmatprep.mubr.msk.bf16.mxu1 %vm451_vm0, %v7087_v16 }
 0x32e   : >> { %2867 = vst.msk [vmem:[#allocation3 + $0x78] sm:$0xf] %vm2851_vm7, %v2786_v27  ;;  %v1770_v56 = vpop.permute.xlu1 %1769  ;;  %1779 = vrot.lane.b32.xlu0 %v6149_v11, %s7907_s21 }
 0x32f   : >> { %1845 = vst.msk [vmem:[#allocation3 + $0xa8] sm:$0xf] %vm1823_vm2, %v1770_v56  ;;  %v2633_v56 = vld [vmem:[#allocation2 + $0x89] sm:$0xff] }
 0x330   : >> { %v9297_v43 = vpop.permute.xlu0 %2277  ;;  %3063 = vrot.lane.b32.xlu1 %v9006_v2, %s7909_s28  ;;  %v7085_v42 = vld [vmem:[#allocation3 + $0x60] ss:$8 sps:$4 sm:$0xff]  }
 0x331   : >> { %3979 = vmatmul.mubr.bf16.vlgmr.msra.gmra.mxu1 %v7085_v42 }
 0x332   : >> { %v9301_v49 = vpop.permute.xlu1 %3047  ;;  %3057 = vrot.lane.b32.xlu0 %v9008_v7, %s7909_s28  ;;  %6024 = vmatprep.mubr.msk.bf16.mxu1 %vm451_vm0, %v7088_v18  ;;  %v2635_v18 = vld [vmem:[#allocation2 + $0xa9] sm:$0xff] }
 0x334   : >> { %v9306_v31 = vpop.permute.xlu0 %2534  ;;  %3320 = vrot.lane.b32.xlu1 %v9283_v50, %s7910_s29 }
 0x336   : >> { %v9310_v53 = vpop.permute.xlu1 %3304  ;;  %3314 = vrot.lane.b32.xlu0 %v6149_v11, %s7910_s29 }
 0x338   : >> { %v1764_v1 = vpop.permute.xlu0 %1763  ;;  %1781 = vrot.lane.b32.xlu1 %v6150_v40, %s7907_s21 }
 0x339   : >> { %1842 = vst.msk [vmem:[#allocation3 + $0x90] sm:$0xf] %vm1823_vm2, %v1764_v1 }
 0x33a   : >> { %v9315_v30 = vpop.permute.xlu1 %2279  ;;  %2289 = vrot.lane.b32.xlu0 %v9008_v7, %s7912_s12 }
 0x33c   : >> { %v3042_v27 = vpop.permute.xlu0 %3041  ;;  %3059 = vrot.lane.b32.xlu1 %v9010_v61, %s7909_s28 }
 0x33d   : >> { %3124 = vst.msk [vmem:[#allocation3 + $0x70] sm:$0xf] %vm3109_vm8, %v3042_v27 }
 0x33e   : >> { %v9322_v15 = vpop.permute.xlu1 %2536  ;;  %2546 = vrot.lane.b32.xlu0 %v6149_v11, %s7913_s13  ;;  %v9359_v11 = vpack.c.bf16 %v1630_v4, %v1630_v4  ;;  %v6322_v4 = vpack.c.bf16 %v3149_v14, %v3149_v14 }
 0x340   : >> { %v3299_v10 = vpop.permute.xlu0 %3298  ;;  %3316 = vrot.lane.b32.xlu1 %v6150_v40, %s7910_s29 }
 0x341   : >> { %3381 = vst.msk [vmem:[#allocation3 + $0x70] sm:$0xf] %vm3366_vm9, %v3299_v10 }
 0x342   : >> { %v9327_v12 = vpop.permute.xlu1 %2793  ;;  %2803 = vrot.lane.b32.xlu0 %v8994_v29, %s7914_s14 }
 0x344   : >> { %v2274_v7 = vpop.permute.xlu0 %2273  ;;  %2291 = vrot.lane.b32.xlu1 %v9010_v61, %s7912_s12 }
 0x345   : >> { %2354 = vst.msk [vmem:[#allocation3 + $0x80] sm:$0xf] %vm2337_vm5, %v2274_v7 }
 0x346   : >> { %v2027_v44 = vpop.permute.xlu1 %2026  ;;  %2036 = vrot.lane.b32.xlu0 %v8994_v29, %s7908_s22  ;;  %v6193_v29 = vpack.c.bf16 %v2119_v17, %v2119_v17  ;;  %v7090_v17 = vld [vmem:[#allocation3 + $0x84] ss:$8 sps:$4 sm:$0xff]  }
 0x347   : >> { %2102 = vst.msk [vmem:[#allocation3 + $0xa8] sm:$0xf] %vm2080_vm4, %v2027_v44 }
 0x348   : >> { %v2531_v63 = vpop.permute.xlu0 %2530  ;;  %2548 = vrot.lane.b32.xlu1 %v6150_v40, %s7913_s13  ;;  %v3605_v42 = vld [vmem:[#allocation3 + $0x70] sm:$0xff] }
 0x349   : >> { %2611 = vst.msk [vmem:[#allocation3 + $0x80] sm:$0xf] %vm2594_vm6, %v2531_v63  ;;  %v2377_v40 = vld [vmem:[#allocation2 + $0x90] sm:$0xff] }
 0x34a   : >> { %v1766_v59 = vpop.permute.xlu1 %1765  ;;  %1787 = vrot.lane.b32.xlu0 %v9338_v51, %s7907_s21  ;;  %v2654_v63 = vld [vmem:[#allocation2 + $0x1d1] sm:$0xff] }
 0x34b   : >> { %1843 = vst.msk [vmem:[#allocation3 + $0x98] sm:$0xf] %vm1823_vm2, %v1766_v59  ;;  %v3148_v59 = vld [vmem:[#allocation2 + $0xa8] sm:$0xff] }
 0x34c   : >> { %v2792_v61 = vpop.permute.xlu0 %2791  ;;  %2805 = vrot.lane.b32.xlu1 %v8996_v47, %s7914_s14 }
 0x34e   : >> { %v3044_v34 = vpop.permute.xlu1 %3043  ;;  %2253 = vrot.lane.b32.xlu0 %v6193_v29, %s7912_s12  ;;  %v6321_v29 = vpack.c.bf16 %v3148_v59, %v3148_v59  ;;  %v2913_v59 = vld [vmem:[#allocation2 + $0x207] sm:$0xff] }
 0x34f   : >> { %3125 = vst.msk [vmem:[#allocation3 + $0x78] sm:$0xf] %vm3109_vm8, %v3044_v34  ;;  %v9511_v14 = vpack.c.bf16 %v2913_v59, %v2913_v59 }
 0x350   : >> { %v2025_v39 = vpop.permute.xlu0 %2024  ;;  %2038 = vrot.lane.b32.xlu1 %v8996_v47, %s7908_s22 }
 0x351   : >> { %2101 = vst.msk [vmem:[#allocation3 + $0xa0] sm:$0xf] %vm2080_vm4, %v2025_v39 }
 0x352   : >> { %v3301_v37 = vpop.permute.xlu1 %3300  ;;  %2293 = vrot.lane.b32.xlu0 %v8998_v41, %s7912_s12 }
 0x353   : >> { %3382 = vst.msk [vmem:[#allocation3 + $0x78] sm:$0xf] %vm3366_vm9, %v3301_v37 }
 0x354   : >> { %v2788_v36 = vpop.permute.xlu0 %2787  ;;  %2255 = vrot.lane.b32.xlu1 %v6194_v55, %s7912_s12 }
 0x355   : >> { %2868 = vst.msk [vmem:[#allocation3 + $0x80] sm:$0xf] %vm2851_vm7, %v2788_v36 }
 0x356   : >> { %3126 = vst.msk [vmem:[#allocation3 + $0x80] sm:$0xf] %vm3109_vm8, %v9276_v20  ;;  %v2276_v47 = vpop.permute.xlu1 %2275  ;;  %2510 = vrot.lane.b32.xlu0 %v6225_v24, %s7913_s13 }
 0x357   : >> { %3383 = vst.msk [vmem:[#allocation3 + $0x80] sm:$0xf] %vm3366_vm9, %v9288_v19 }
 0x358   : >> { %2355 = vst.msk [vmem:[#allocation3 + $0x88] sm:$0xf] %vm2337_vm5, %v2276_v47  ;;  %v2021_v41 = vpop.permute.xlu0 %2020  ;;  %1789 = vrot.lane.b32.xlu1 %v9359_v11, %s7907_s21 }
 0x359   : >> { %2099 = vst.msk [vmem:[#allocation3 + $0x90] sm:$0xf] %vm2080_vm4, %v2021_v41 }
 0x35a   : >> { %2356 = vst.msk [vmem:[#allocation3 + $0x90] sm:$0xf] %vm2337_vm5, %v9297_v43  ;;  %v2533_v20 = vpop.permute.xlu1 %2532  ;;  %2550 = vrot.lane.b32.xlu0 %v9260_v9, %s7913_s13  ;;  %v3606_v16 = vld [vmem:[#allocation3 + $0x78] sm:$0xff]  ;;  %v6257_v43 = vpack.c.bf16 %v2633_v56, %v2633_v56  ;;  %v2653_v9 = vld [vmem:[#allocation2 + $0x1c9] sm:$0xff] }
 0x35b   : >> { %2613 = vst.msk [vmem:[#allocation3 + $0x90] sm:$0xf] %vm2594_vm6, %v9306_v31  ;;  %2612 = vst.msk [vmem:[#allocation3 + $0x88] sm:$0xf] %vm2594_vm6, %v2533_v20  ;;  %v5990_v19 = vcombine.low %v3605_v42, %v3606_v16  ;;  %v6226_v31 = vpack.c.bf16 %v2377_v40, %v2377_v40  ;;  %v9466_v40 = vld [vmem:[%s9456_s18] ss:$0 sm:$0xff] }
 0x35c   : >> { %2870 = vst.msk [vmem:[#allocation3 + $0x90] sm:$0xf] %vm2851_vm7, %v2792_v61  ;;  %v1776_v1 = vpop.permute.xlu0 %1775  ;;  %2295 = vrot.lane.b32.xlu1 %v9006_v2, %s7912_s12  ;;  %v6277_v2 = vpack.c.bf16 %v2653_v9, %v2653_v9 }
 0x35d   : >> { %1848 = vst.msk [vmem:[#allocation3 + $0xc0] sm:$0xf] %vm1823_vm2, %v1776_v1  ;;  %3987 = vmatmul.mubr.bf16.gmra.mxu1 %v5990_v19 }
 0x35e   : >> { %v2790_v27 = vpop.permute.xlu1 %2789  ;;  %2767 = vrot.lane.b32.xlu0 %v6257_v43, %s7914_s14  ;;  %6025 = vmatprep.mubr.msk.bf16.mxu1 %vm451_vm0, %v7090_v17 }
 0x35f   : >> { %2869 = vst.msk [vmem:[#allocation3 + $0x88] sm:$0xf] %vm2851_vm7, %v2790_v27  ;;  %v2893_v27 = vld [vmem:[#allocation2 + $0xc7] sm:$0xff] }
 0x360   : >> { %3127 = vst.msk [vmem:[#allocation3 + $0x88] sm:$0xf] %vm3109_vm8, %v9301_v49  ;;  %v9383_v10 = vpop.permute.xlu0 %3053  ;;  %2512 = vrot.lane.b32.xlu1 %v6226_v31, %s7913_s13 }
 0x361   : >> { %3384 = vst.msk [vmem:[#allocation3 + $0x88] sm:$0xf] %vm3366_vm9, %v9310_v53  ;;  %v6258_v53 = vpack.c.bf16 %v2634_v3, %v2634_v3  ;;  %v7093_v3 = vld [vmem:[#allocation3 + $0x94] ss:$8 sps:$4 sm:$0xff]  }
 0x362   : >> { %v2023_v7 = vpop.permute.xlu1 %2022  ;;  %2807 = vrot.lane.b32.xlu0 %v6277_v2, %s7914_s14 }
 0x363   : >> { %2100 = vst.msk [vmem:[#allocation3 + $0x98] sm:$0xf] %vm2080_vm4, %v2023_v7 }
 0x364   : >> { %2357 = vst.msk [vmem:[#allocation3 + $0x98] sm:$0xf] %vm2337_vm5, %v9315_v30  ;;  %v9392_v44 = vpop.permute.xlu0 %3310  ;;  %2552 = vrot.lane.b32.xlu1 %v9283_v50, %s7913_s13 }
 0x365   : >> { %2614 = vst.msk [vmem:[#allocation3 + $0x98] sm:$0xf] %vm2594_vm6, %v9322_v15  ;;  %v6278_v15 = vpack.c.bf16 %v2654_v63, %v2654_v63 }
 0x366   : >> { %2871 = vst.msk [vmem:[#allocation3 + $0x98] sm:$0xf] %vm2851_vm7, %v9327_v12  ;;  %v1778_v49 = vpop.permute.xlu1 %1777  ;;  %3025 = vrot.lane.b32.xlu0 %v8754_v25, %s7909_s28 }
 0x367   : >> { %1849 = vst.msk [vmem:[#allocation3 + $0xc8] sm:$0xf] %vm1823_vm2, %v1778_v49 }
 0x368   : >> { %v9403_v30 = vpop.permute.xlu0 %2285  ;;  %2769 = vrot.lane.b32.xlu1 %v6258_v53, %s7914_s14  ;;  %v7092_v50 = vld [vmem:[#allocation3 + $0x80] ss:$8 sps:$4 sm:$0xff]  }
 0x369   : >> { %3995 = vmatmul.mubr.bf16.gmra.mxu1 %v7092_v50 }
 0x36a   : >> { %v9406_v61 = vpop.permute.xlu1 %3055  ;;  %3065 = vrot.lane.b32.xlu0 %v9089_v32, %s7909_s28  ;;  %6026 = vmatprep.mubr.msk.bf16.mxu1 %vm451_vm0, %v7093_v3 }
 0x36c   : >> { %v9411_v12 = vpop.permute.xlu0 %2542  ;;  %2809 = vrot.lane.b32.xlu1 %v6278_v15, %s7914_s14 }
 0x36e   : >> { %v9414_v34 = vpop.permute.xlu1 %3312  ;;  %3282 = vrot.lane.b32.xlu0 %v6321_v29, %s7910_s29 }
 0x370   : >> { %v1772_v58 = vpop.permute.xlu0 %1771  ;;  %3027 = vrot.lane.b32.xlu1 %v8789_v28, %s7909_s28 }
 0x371   : >> { %1846 = vst.msk [vmem:[#allocation3 + $0xb0] sm:$0xf] %vm1823_vm2, %v1772_v58 }
 0x372   : >> { %v9420_v39 = vpop.permute.xlu1 %2287  ;;  %3322 = vrot.lane.b32.xlu0 %v9338_v51, %s7910_s29 }
 0x374   : >> { %v3050_v37 = vpop.permute.xlu0 %3049  ;;  %3067 = vrot.lane.b32.xlu1 %v9091_v38, %s7909_s28 }
 0x375   : >> { %3128 = vst.msk [vmem:[#allocation3 + $0x90] sm:$0xf] %vm3109_vm8, %v3050_v37  ;;  %v3150_v37 = vld [vmem:[#allocation2 + $0xc8] sm:$0xff] }
 0x376   : >> { %v9427_v55 = vpop.permute.xlu1 %2544  ;;  %2000 = vrot.lane.b32.xlu0 %v6257_v43, %s7908_s22 }
 0x378   : >> { %v3307_v36 = vpop.permute.xlu0 %3306  ;;  %3284 = vrot.lane.b32.xlu1 %v6322_v4, %s7910_s29 }
 0x379   : >> { %3385 = vst.msk [vmem:[#allocation3 + $0x90] sm:$0xf] %vm3366_vm9, %v3307_v36  ;;  %v2894_v36 = vld [vmem:[#allocation2 + $0xcf] sm:$0xff] }
 0x37a   : >> { %v9432_v24 = vpop.permute.xlu1 %2801  ;;  %2040 = vrot.lane.b32.xlu0 %v6277_v2, %s7908_s22 }
 0x37c   : >> { %v2282_v47 = vpop.permute.xlu0 %2281  ;;  %3324 = vrot.lane.b32.xlu1 %v9359_v11, %s7910_s29 }
 0x37d   : >> { %2358 = vst.msk [vmem:[#allocation3 + $0xa0] sm:$0xf] %vm2337_vm5, %v2282_v47  ;;  %v9524_v47 = vpack.c.bf16 %v3150_v37, %v3150_v37 }
 0x37e   : >> { %v2035_v41 = vpop.permute.xlu1 %2034  ;;  %2257 = vrot.lane.b32.xlu0 %v8754_v25, %s7912_s12 }
 0x37f   : >> { %2106 = vst.msk [vmem:[#allocation3 + $0xc8] sm:$0xf] %vm2080_vm4, %v2035_v41 }
 0x380   : >> { %v2539_v56 = vpop.permute.xlu0 %2538  ;;  %2002 = vrot.lane.b32.xlu1 %v6258_v53, %s7908_s22  ;;  %v3609_v2 = vld [vmem:[#allocation3 + $0x90] sm:$0xff] }
 0x381   : >> { %2615 = vst.msk [vmem:[#allocation3 + $0xa0] sm:$0xf] %vm2594_vm6, %v2539_v56  ;;  %v2636_v53 = vld [vmem:[#allocation2 + $0xb1] sm:$0xff]  ;;  %v9532_v56 = vpack.c.bf16 %v2894_v36, %v2894_v36 }
 0x382   : >> { %v1774_v20 = vpop.permute.xlu1 %1773  ;;  %2297 = vrot.lane.b32.xlu0 %v9089_v32, %s7912_s12 }
 0x383   : >> { %1847 = vst.msk [vmem:[#allocation3 + $0xb8] sm:$0xf] %vm1823_vm2, %v1774_v20 }
 0x384   : >> { %v2800_v42 = vpop.permute.xlu0 %2799  ;;  %2042 = vrot.lane.b32.xlu1 %v6278_v15, %s7908_s22 }
 0x386   : >> { %v3052_v16 = vpop.permute.xlu1 %3051  ;;  %2514 = vrot.lane.b32.xlu0 %v6321_v29, %s7913_s13  ;;  %v9502_v29 = vpack.c.bf16 %v2636_v53, %v2636_v53 }
 0x387   : >> { %3129 = vst.msk [vmem:[#allocation3 + $0x98] sm:$0xf] %vm3109_vm8, %v3052_v16 }
 0x388   : >> { %v2033_v25 = vpop.permute.xlu0 %2032  ;;  %2259 = vrot.lane.b32.xlu1 %v8789_v28, %s7912_s12  ;;  %v9463_v28 = vpack.c.bf16 %v2635_v18, %v2635_v18  ;;  %v3151_v18 = vld [vmem:[#allocation2 + $0xd0] sm:$0xff] }
 0x389   : >> { %2105 = vst.msk [vmem:[#allocation3 + $0xc0] sm:$0xf] %vm2080_vm4, %v2033_v25 }
 0x38a   : >> { %v3309_v32 = vpop.permute.xlu1 %3308  ;;  %2554 = vrot.lane.b32.xlu0 %v9338_v51, %s7913_s13 }
 0x38b   : >> { %3386 = vst.msk [vmem:[#allocation3 + $0x98] sm:$0xf] %vm3366_vm9, %v3309_v32 }
 0x38c   : >> { %v2796_v19 = vpop.permute.xlu0 %2795  ;;  %2299 = vrot.lane.b32.xlu1 %v9091_v38, %s7912_s12 }
 0x38d   : >> { %2872 = vst.msk [vmem:[#allocation3 + $0xa0] sm:$0xf] %vm2851_vm7, %v2796_v19  ;;  %v3932_v51 = vpop.f32.mrf.mxu0 }
 0x38e   : >> { %3130 = vst.msk [vmem:[#allocation3 + $0xa0] sm:$0xf] %vm3109_vm8, %v9383_v10  ;;  %v2284_v1 = vpop.permute.xlu1 %2283  ;;  %2771 = vrot.lane.b32.xlu0 %v9463_v28, %s7914_s14  ;;  %v9477_v43 = vadd.f32 %v9466_v40, %v3932_v51 }
 0x38f   : >> { %3387 = vst.msk [vmem:[#allocation3 + $0xa0] sm:$0xf] %vm3366_vm9, %v9392_v44  ;;  %v3934_v9 = vpop.f32.mrf.mxu0 }
 0x390   : >> { %2359 = vst.msk [vmem:[#allocation3 + $0xa8] sm:$0xf] %vm2337_vm5, %v2284_v1  ;;  %v2029_v38 = vpop.permute.xlu0 %2028  ;;  %2516 = vrot.lane.b32.xlu1 %v6322_v4, %s7913_s13  ;;  %v4059_v31 = vsub.f32 0.0, %v9477_v43  ;;  %v1886_v1 = vld [vmem:[#allocation2 + $0x1e9] sm:$0xff] }
 0x391   : >> { %2103 = vst.msk [vmem:[#allocation3 + $0xb0] sm:$0xf] %vm2080_vm4, %v2029_v38  ;;  %v3935_v44 = vpop.f32.mrf.mxu0  ;;  %v9554_v38 = vpack.c.bf16 %v3151_v18, %v3151_v18 }
 0x392   : >> { %2360 = vst.msk [vmem:[#allocation3 + $0xb0] sm:$0xf] %vm2337_vm5, %v9403_v30  ;;  %v2541_v10 = vpop.permute.xlu1 %2540  ;;  %2811 = vrot.lane.b32.xlu0 %v9084_v62, %s7914_s14  ;;  %v3610_v7 = vld [vmem:[#allocation3 + $0x98] sm:$0xff]  ;;  %v4091_v63 = vmul.f32 1.442695, %v4059_v31  ;;  %v9491_v17 = vadd.f32 %v9466_v40, %v3935_v44  ;;  %v9496_v62 = vpack.c.bf16 %v2893_v27, %v2893_v27  ;;  %v3171_v27 = vld [vmem:[#allocation2 + $0x210] sm:$0xff] }
 0x393   : >> { %2617 = vst.msk [vmem:[#allocation3 + $0xb0] sm:$0xf] %vm2594_vm6, %v9411_v12  ;;  %2616 = vst.msk [vmem:[#allocation3 + $0xa8] sm:$0xf] %vm2594_vm6, %v2541_v10  ;;  %v5994_v49 = vcombine.low %v3609_v2, %v3610_v7  ;;  %v3937_v50 = vpop.f32.mrf.mxu0  ;;  %v6185_v2 = vpack.c.bf16 %v1886_v1, %v1886_v1  ;;  %v7098_v1 = vld [vmem:[#allocation3 + $0xb4] ss:$8 sps:$4 sm:$0xff]  }
 0x394   : >> { %2874 = vst.msk [vmem:[#allocation3 + $0xb0] sm:$0xf] %vm2851_vm7, %v2800_v42  ;;  %v1784_v30 = vpop.permute.xlu0 %1783  ;;  %2556 = vrot.lane.b32.xlu1 %v9359_v11, %s7913_s13  ;;  %7245 = vpow2.f32 %v4091_v63  ;;  %v4060_v15 = vsub.f32 0.0, %v9491_v17 }
 0x395   : >> { %1852 = vst.msk [vmem:[#allocation3 + $0xe0] sm:$0xf] %vm1823_vm2, %v1784_v30  ;;  %4003 = vmatmul.mubr.bf16.gmra.mxu1 %v5994_v49 }
 0x396   : >> { %v2798_v12 = vpop.permute.xlu1 %2797  ;;  %3029 = vrot.lane.b32.xlu0 %v9496_v62, %s7909_s28  ;;  %v4093_v11 = vmul.f32 1.442695, %v4060_v15 }
 0x397   : >> { %2873 = vst.msk [vmem:[#allocation3 + $0xa8] sm:$0xf] %vm2851_vm7, %v2798_v12 }
 0x398   : >> { %3131 = vst.msk [vmem:[#allocation3 + $0xa8] sm:$0xf] %vm3109_vm8, %v9406_v61  ;;  %v9507_v58 = vpop.permute.xlu0 %3061  ;;  %2773 = vrot.lane.b32.xlu1 %v9502_v29, %s7914_s14  ;;  %7247 = vpow2.f32 %v4093_v11  ;;  %v1887_v11 = vld [vmem:[#allocation2 + $0x1f1] sm:$0xff] }
 0x399   : >> { %3388 = vst.msk [vmem:[#allocation3 + $0xa8] sm:$0xf] %vm3366_vm9, %v9414_v34  ;;  %v3170_v34 = vld [vmem:[#allocation2 + $0x208] sm:$0xff] }
 0x39a   : >> { %v2031_v4 = vpop.permute.xlu1 %2030  ;;  %3069 = vrot.lane.b32.xlu0 %v9511_v14, %s7909_s28 }
 0x39b   : >> { %2104 = vst.msk [vmem:[#allocation3 + $0xb8] sm:$0xf] %vm2080_vm4, %v2031_v4 }
 0x39c   : >> { %2361 = vst.msk [vmem:[#allocation3 + $0xb8] sm:$0xf] %vm2337_vm5, %v9420_v39  ;;  %v9520_v61 = vpop.permute.xlu0 %3318  ;;  %2813 = vrot.lane.b32.xlu1 %v9086_v8, %s7914_s14  ;;  %v2914_v39 = vld [vmem:[#allocation2 + $0x20f] sm:$0xff]  ;;  %v9537_v8 = vpack.c.bf16 %v3170_v34, %v3170_v34 }
 0x39d   : >> { %2618 = vst.msk [vmem:[#allocation3 + $0xb8] sm:$0xf] %vm2594_vm6, %v9427_v55  ;;  %v7095_v55 = vld [vmem:[#allocation3 + $0xa4] ss:$8 sps:$4 sm:$0xff]   ;;  %v9545_v16 = vpack.c.bf16 %v2914_v39, %v2914_v39 }
 0x39e   : >> { %2875 = vst.msk [vmem:[#allocation3 + $0xb8] sm:$0xf] %vm2851_vm7, %v9432_v24  ;;  %v1786_v41 = vpop.permute.xlu1 %1785  ;;  %3286 = vrot.lane.b32.xlu0 %v9524_v47, %s7910_s29  ;;  %6027 = vmatprep.mubr.msk.bf16.mxu1 %vm451_vm0, %v7095_v55 }
 0x39f   : >> { %1853 = vst.msk [vmem:[#allocation3 + $0xe8] sm:$0xf] %vm1823_vm2, %v1786_v41  ;;  %v6186_v41 = vpack.c.bf16 %v1887_v11, %v1887_v11 }
 0x3a0   : >> { %v1780_v20 = vpop.permute.xlu0 %1779  ;;  %3031 = vrot.lane.b32.xlu1 %v9532_v56, %s7909_s28  ;;  %v7097_v42 = vld [vmem:[#allocation3 + $0xa0] ss:$8 sps:$4 sm:$0xff]  }
 0x3a1   : >> { %1850 = vst.msk [vmem:[#allocation3 + $0xd0] sm:$0xf] %vm1823_vm2, %v1780_v20  ;;  %v7246_v25 = vpop.eup %7245  ;;  %4011 = vmatmul.mubr.bf16.gmra.mxu1 %v7097_v42 }
 0x3a2   : >> { %v9540_v24 = vpop.permute.xlu1 %3063  ;;  %3326 = vrot.lane.b32.xlu0 %v9537_v8, %s7910_s29  ;;  %v4155_v32 = vadd.f32 1.0, %v7246_v25  ;;  %6028 = vmatprep.mubr.msk.bf16.mxu1 %vm451_vm0, %v7098_v1 }
 0x3a4   : >> { %v3058_v19 = vpop.permute.xlu0 %3057  ;;  %3071 = vrot.lane.b32.xlu1 %v9545_v16, %s7909_s28  ;;  %7249 = vrcp.f32 %v4155_v32 }
 0x3a5   : >> { %3132 = vst.msk [vmem:[#allocation3 + $0xb0] sm:$0xf] %vm3109_vm8, %v3058_v19  ;;  %v7248_v9 = vpop.eup %7247 }
 0x3a6   : >> { %v9550_v51 = vpop.permute.xlu1 %3320  ;;  %2004 = vrot.lane.b32.xlu0 %v9463_v28, %s7908_s22  ;;  %v4156_v31 = vadd.f32 1.0, %v7248_v9  ;;  %v9563_v28 = vpack.c.bf16 %v3171_v27, %v3171_v27 }
 0x3a8   : >> { %v3315_v10 = vpop.permute.xlu0 %3314  ;;  %3288 = vrot.lane.b32.xlu1 %v9554_v38, %s7910_s29  ;;  %7251 = vrcp.f32 %v4156_v31 }
 0x3a9   : >> { %3389 = vst.msk [vmem:[#allocation3 + $0xb0] sm:$0xf] %vm3366_vm9, %v3315_v10  ;;  %v3940_v7 = vpop.f32.mrf.mxu0 }
 0x3aa   : >> { %v1782_v3 = vpop.permute.xlu1 %1781  ;;  %v9560_v44 = vadd.f32 %v9466_v40, %v3940_v7  ;;  %2044 = vrot.lane.b32.xlu0 %v6185_v2, %s7908_s22  ;;  %v2657_v7 = vld [vmem:[#allocation2 + $0x209] sm:$0xff] }
 0x3ab   : >> { %1851 = vst.msk [vmem:[#allocation3 + $0xd8] sm:$0xf] %vm1823_vm2, %v1782_v3  ;;  %v3942_v49 = vpop.f32.mrf.mxu0 }
 0x3ac   : >> { %v4061_v53 = vsub.f32 0.0, %v9560_v44  ;;  %v2290_v63 = vpop.permute.xlu0 %2289  ;;  %3328 = vrot.lane.b32.xlu1 %v9563_v28, %s7910_s29 }
 0x3ad   : >> { %2362 = vst.msk [vmem:[#allocation3 + $0xc0] sm:$0xf] %vm2337_vm5, %v2290_v63  ;;  %v3943_v30 = vpop.f32.mrf.mxu0 }
 0x3ae   : >> { %v4095_v50 = vmul.f32 1.442695, %v4061_v53  ;;  %v3060_v59 = vpop.permute.xlu1 %3059  ;;  %v9571_v15 = vadd.f32 %v9466_v40, %v3943_v30  ;;  %2261 = vrot.lane.b32.xlu0 %v9496_v62, %s7912_s12  ;;  %v6281_v30 = vpack.c.bf16 %v2657_v7, %v2657_v7 }
 0x3af   : >> { %3133 = vst.msk [vmem:[#allocation3 + $0xb8] sm:$0xf] %vm3109_vm8, %v3060_v59  ;;  %v3945_v12 = vpop.f32.mrf.mxu0  ;;  %v2895_v59 = vld [vmem:[#allocation2 + $0xe7] sm:$0xff] }
 0x3b0   : >> { %7253 = vpow2.f32 %v4095_v50  ;;  %v4062_v37 = vsub.f32 0.0, %v9571_v15  ;;  %v2547_v4 = vpop.permute.xlu0 %2546  ;;  %2006 = vrot.lane.b32.xlu1 %v9502_v29, %s7908_s22 }
 0x3b1   : >> { %2619 = vst.msk [vmem:[#allocation3 + $0xc0] sm:$0xf] %vm2594_vm6, %v2547_v4  ;;  %v7250_v62 = vpop.eup %7249  ;;  %v6293_v4 = vpack.c.bf16 %v2895_v59, %v2895_v59 }
 0x3b2   : >> { %v4097_v36 = vmul.f32 1.442695, %v4062_v37  ;;  %v3317_v34 = vpop.permute.xlu1 %3316  ;;  %2301 = vrot.lane.b32.xlu0 %v9511_v14, %s7912_s12  ;;  %v4219_v39 = vmul.f32 %v7250_v62, %v9477_v43  ;;  %v2915_v37 = vld [vmem:[#allocation2 + $0x227] sm:$0xff] }
 0x3b3   : >> { %3390 = vst.msk [vmem:[#allocation3 + $0xb8] sm:$0xf] %vm3366_vm9, %v3317_v34  ;;  %v6313_v34 = vpack.c.bf16 %v2915_v37, %v2915_v37 }
 0x3b4   : >> { %7255 = vpow2.f32 %v4097_v36  ;;  %v2804_v20 = vpop.permute.xlu0 %2803  ;;  %2046 = vrot.lane.b32.xlu1 %v6186_v41, %s7908_s22  ;;  %v9587_v45 = vadd.f32 %v7900_v45, %v4219_v39   ;;  %v2658_v41 = vld [vmem:[#allocation2 + $0x211] sm:$0xff]  ;;  %v7100_v39 = vld [vmem:[#allocation3 + $0xc4] ss:$8 sps:$4 sm:$0xff]  }
 0x3b5   : >> { %2876 = vst.msk [vmem:[#allocation3 + $0xc0] sm:$0xf] %vm2851_vm7, %v2804_v20  ;;  %v7252_v14 = vpop.eup %7251  ;;  %v3948_v43 = vpop.f32.mrf.mxu0 }
 0x3b6   : >> { %10603 = vst [vmem:[#allocation19_spill] sm:$0xff] %v9587_v45  ;;  %3134 = vst.msk [vmem:[#allocation3 + $0xc0] sm:$0xf] %vm3109_vm8, %v9507_v58  ;;  %v2292_v29 = vpop.permute.xlu1 %2291  ;;  %2518 = vrot.lane.b32.xlu0 %v9524_v47, %s7913_s13  ;;  %v4220_v42 = vmul.f32 %v7252_v14, %v9491_v17  ;;  %v9598_v18 = vadd.f32 %v9466_v40, %v3948_v43  ;;  %v2637_v58 = vld [vmem:[#allocation2 + $0xc9] sm:$0xff]  ;;  %v6282_v14 = vpack.c.bf16 %v2658_v41, %v2658_v41 }
 0x3b7   : >> { %3391 = vst.msk [vmem:[#allocation3 + $0xc0] sm:$0xf] %vm3366_vm9, %v9520_v61  ;;  %v3950_v45 = vpop.f32.mrf.mxu0  ;;  %v3613_v17 = vld [vmem:[#allocation3 + $0xb0] sm:$0xff]  ;;  %v6261_v10 = vpack.c.bf16 %v2637_v58, %v2637_v58 }
 0x3b8   : >> { %2363 = vst.msk [vmem:[#allocation3 + $0xc8] sm:$0xf] %vm2337_vm5, %v2292_v29  ;;  %v2037_v25 = vpop.permute.xlu0 %2036  ;;  %2263 = vrot.lane.b32.xlu1 %v9532_v56, %s7912_s12  ;;  %v9604_v0 = vadd.f32 %v7896_v0, %v4220_v42   ;;  %v4063_v61 = vsub.f32 0.0, %v9598_v18  ;;  %v2896_v43 = vld [vmem:[#allocation2 + $0xef] sm:$0xff] }
 0x3b9   : >> { %2107 = vst.msk [vmem:[#allocation3 + $0xd0] sm:$0xf] %vm2080_vm4, %v2037_v25  ;;  %v3951_v9 = vpop.f32.mrf.mxu0  ;;  %v3172_v42 = vld [vmem:[#allocation2 + $0x228] sm:$0xff] }
 0x3ba   : >> { %10604 = vst [vmem:[#allocation20_spill] sm:$0xff] %v9604_v0  ;;  %v2549_v32 = vpop.permute.xlu1 %2548  ;;  %2558 = vrot.lane.b32.xlu0 %v9537_v8, %s7913_s13  ;;  %v3614_v19 = vld [vmem:[#allocation3 + $0xb8] sm:$0xff]  ;;  %v4099_v27 = vmul.f32 1.442695, %v4063_v61  ;;  %v9611_v31 = vadd.f32 %v9466_v40, %v3951_v9  ;;  %v6345_v1 = vpack.c.bf16 %v3172_v42, %v3172_v42  ;;  %v3429_v9 = vld [vmem:[#allocation2 + $0x229] sm:$0xff] }
 0x3bb   : >> { %2620 = vst.msk [vmem:[#allocation3 + $0xc8] sm:$0xf] %vm2594_vm6, %v2549_v32  ;;  %v5998_v56 = vcombine.low %v3613_v17, %v3614_v19  ;;  %v3953_v8 = vpop.f32.mrf.mxu0  ;;  %v6294_v17 = vpack.c.bf16 %v2896_v43, %v2896_v43  ;;  %v2916_v19 = vld [vmem:[#allocation2 + $0x22f] sm:$0xff] }
 0x3bc   : >> { %2303 = vrot.lane.b32.xlu1 %v9545_v16, %s7912_s12  ;;  %v1788_v0 = vpop.permute.xlu0 %1787  ;;  %7257 = vpow2.f32 %v4099_v27  ;;  %v4064_v49 = vsub.f32 0.0, %v9611_v31 }
 0x3bd   : >> { %v7254_v2 = vpop.eup %7253  ;;  %1854 = vst.msk [vmem:[#allocation3 + $0xf0] sm:$0xf] %vm1823_vm2, %v1788_v0  ;;  %4019 = vmatmul.mubr.bf16.gmra.mxu1 %v5998_v56  ;;  %v3430_v56 = vld [vmem:[#allocation2 + $0x231] sm:$0xff] }
 0x3be   : >> { %v4157_v3 = vadd.f32 1.0, %v7254_v2  ;;  %v2806_v53 = vpop.permute.xlu1 %2805  ;;  %2775 = vrot.lane.b32.xlu0 %v6261_v10, %s7914_s14  ;;  %v4101_v16 = vmul.f32 1.442695, %v4064_v49  ;;  %6029 = vmatprep.mubr.msk.bf16.mxu1 %vm451_vm0, %v7100_v39  ;;  %v6377_v10 = vpack.c.bf16 %v3429_v9, %v3429_v9  ;;  %v6378_v2 = vpack.c.bf16 %v3430_v56, %v3430_v56 }
 0x3bf   : >> { %2877 = vst.msk [vmem:[#allocation3 + $0xc8] sm:$0xf] %vm2851_vm7, %v2806_v53  ;;  %v6314_v53 = vpack.c.bf16 %v2916_v19, %v2916_v19 }
 0x3c0   : >> { %7259 = vrcp.f32 %v4157_v3  ;;  %3135 = vst.msk [vmem:[#allocation3 + $0xc8] sm:$0xf] %vm3109_vm8, %v9540_v24  ;;  %2520 = vrot.lane.b32.xlu1 %v9554_v38, %s7913_s13  ;;  %v2254_v63 = vpop.permute.xlu0 %2253  ;;  %v2638_v24 = vld [vmem:[#allocation2 + $0xd1] sm:$0xff] }
 0x3c1   : >> { %v7256_v50 = vpop.eup %7255  ;;  %3392 = vst.msk [vmem:[#allocation3 + $0xc8] sm:$0xf] %vm3366_vm9, %v9550_v51  ;;  %7261 = vpow2.f32 %v4101_v16  ;;  %v6262_v36 = vpack.c.bf16 %v2638_v24, %v2638_v24 }
 0x3c2   : >> { %2344 = vst.msk [vmem:[#allocation3 + $0x30] sm:$0xf] %vm2337_vm5, %v2254_v63  ;;  %v4158_v12 = vadd.f32 1.0, %v7256_v50  ;;  %v2039_v11 = vpop.permute.xlu1 %2038  ;;  %2815 = vrot.lane.b32.xlu0 %v6281_v30, %s7914_s14  ;;  %v3173_v50 = vld [vmem:[#allocation2 + $0x230] sm:$0xff] }
 0x3c3   : >> { %2108 = vst.msk [vmem:[#allocation3 + $0xd8] sm:$0xf] %vm2080_vm4, %v2039_v11  ;;  %v6346_v24 = vpack.c.bf16 %v3173_v50, %v3173_v50 }
 0x3c4   : >> { %7263 = vrcp.f32 %v4158_v12  ;;  %2560 = vrot.lane.b32.xlu1 %v9563_v28, %s7913_s13  ;;  %v2294_v38 = vpop.permute.xlu0 %2293  ;;  %v3152_v28 = vld [vmem:[#allocation2 + $0xe8] sm:$0xff]  ;;  %3589 = vst.msk [vmem:[#allocation3 + $0xf4] sm:$0xf] %vm1566_vm3, %v6377_v10  ;;  %3590 = vst.msk [vmem:[#allocation3 + $0xfc] sm:$0xf] %vm1566_vm3, %v6378_v2 }
 0x3c5   : >> { %2364 = vst.msk [vmem:[#allocation3 + $0xd0] sm:$0xf] %vm2337_vm5, %v2294_v38  ;;  %v6325_v61 = vpack.c.bf16 %v3152_v28, %v3152_v28 }
 0x3c6   : >> { %v2256_v51 = vpop.permute.xlu1 %2255  ;;  %3033 = vrot.lane.b32.xlu0 %v6293_v4, %s7909_s28 }
 0x3c7   : >> { %2345 = vst.msk [vmem:[#allocation3 + $0x38] sm:$0xf] %vm2337_vm5, %v2256_v51 }
 0x3c8   : >> { %2777 = vrot.lane.b32.xlu1 %v6262_v36, %s7914_s14  ;;  %v2511_v62 = vpop.permute.xlu0 %2510  ;;  %v7102_v20 = vld [vmem:[#allocation3 + $0xc0] ss:$8 sps:$4 sm:$0xff]  }
 0x3c9   : >> { %2601 = vst.msk [vmem:[#allocation3 + $0x30] sm:$0xf] %vm2594_vm6, %v2511_v62  ;;  %v7258_v25 = vpop.eup %7257  ;;  %4027 = vmatmul.mubr.bf16.gmra.mxu1 %v7102_v20 }
 0x3ca   : >> { %v1790_v29 = vpop.permute.xlu1 %1789  ;;  %3073 = vrot.lane.b32.xlu0 %v6313_v34, %s7909_s28  ;;  %v4159_v45 = vadd.f32 1.0, %v7258_v25 }
 0x3cb   : >> { %1855 = vst.msk [vmem:[#allocation3 + $0xf8] sm:$0xf] %vm1823_vm2, %v1790_v29 }
 0x3cc   : >> { %2817 = vrot.lane.b32.xlu1 %v6282_v14, %s7914_s14  ;;  %v2551_v58 = vpop.permute.xlu0 %2550  ;;  %7265 = vrcp.f32 %v4159_v45  ;;  %v7103_v45 = vld [vmem:[#allocation3 + $0x34] ss:$8 sps:$4 sm:$0xff]  }
 0x3cd   : >> { %v7260_v32 = vpop.eup %7259  ;;  %2621 = vst.msk [vmem:[#allocation3 + $0xd0] sm:$0xf] %vm2594_vm6, %v2551_v58  ;;  %6020 = vmatprep.mubr.msk.bf16.mxu0 %vm451_vm0, %v7103_v45 }
 0x3ce   : >> { %v4221_v27 = vmul.f32 %v7260_v32, %v9560_v44  ;;  %v2296_v0 = vpop.permute.xlu1 %2295  ;;  %3290 = vrot.lane.b32.xlu0 %v6325_v61, %s7910_s29  ;;  %v7262_v8 = vpop.eup %7261 }
 0x3cf   : >> { %2365 = vst.msk [vmem:[#allocation3 + $0xd8] sm:$0xf] %vm2337_vm5, %v2296_v0  ;;  %v4160_v3 = vadd.f32 1.0, %v7262_v8  ;;  %v7105_v0 = vld [vmem:[#allocation3 + $0xd4] ss:$8 sps:$4 sm:$0xff]  }
 0x3d0   : >> { %v9645_v33 = vadd.f32 %v7892_v33, %v4221_v27   ;;  %3035 = vrot.lane.b32.xlu1 %v6294_v17, %s7909_s28  ;;  %v2768_v49 = vpop.permute.xlu0 %2767  ;;  %6030 = vmatprep.mubr.msk.bf16.mxu1 %vm451_vm0, %v7105_v0 }
 0x3d1   : >> { %v7264_v44 = vpop.eup %7263  ;;  %2858 = vst.msk [vmem:[#allocation3 + $0x30] sm:$0xf] %vm2851_vm7, %v2768_v49  ;;  %7267 = vrcp.f32 %v4160_v3 }
 0x3d2   : >> { %v10605_v7 = vmov %v9645_v33  ;;  %v4222_v16 = vmul.f32 %v7264_v44, %v9571_v15  ;;  %v2513_v63 = vpop.permute.xlu1 %2512  ;;  %3330 = vrot.lane.b32.xlu0 %v6345_v1, %s7910_s29  ;;  %v3153_v33 = vld [vmem:[#allocation2 + $0xf0] sm:$0xff] }
 0x3d3   : >> { %2602 = vst.msk [vmem:[#allocation3 + $0x38] sm:$0xf] %vm2594_vm6, %v2513_v63  ;;  %v6326_v11 = vpack.c.bf16 %v3153_v33, %v3153_v33 }
 0x3d4   : >> { %v9655_v57 = vadd.f32 %v7888_v57, %v4222_v16   ;;  %3075 = vrot.lane.b32.xlu1 %v6314_v53, %s7909_s28  ;;  %v2808_v30 = vpop.permute.xlu0 %2807 }
 0x3d5   : >> { %2878 = vst.msk [vmem:[#allocation3 + $0xd0] sm:$0xf] %vm2851_vm7, %v2808_v30 }
 0x3d6   : >> { %v10606_v12 = vmov %v9655_v57  ;;  %v2553_v59 = vpop.permute.xlu1 %2552 }
 0x3d7   : >> { %2622 = vst.msk [vmem:[#allocation3 + $0xd8] sm:$0xf] %vm2594_vm6, %v2553_v59 }
 0x3d8   : >> { %3292 = vrot.lane.b32.xlu1 %v6326_v11, %s7910_s29  ;;  %v3026_v15 = vpop.permute.xlu0 %3025 }
 0x3d9   : >> { %3116 = vst.msk [vmem:[#allocation3 + $0x30] sm:$0xf] %vm3109_vm8, %v3026_v15  ;;  %v7266_v38 = vpop.eup %7265 }
 0x3da   : >> { %v2770_v37 = vpop.permute.xlu1 %2769  ;;  %v4223_v57 = vmul.f32 %v7266_v38, %v9598_v18 }
 0x3db   : >> { %2859 = vst.msk [vmem:[#allocation3 + $0x38] sm:$0xf] %vm2851_vm7, %v2770_v37 }
 0x3dc   : >> { %3332 = vrot.lane.b32.xlu1 %v6346_v24, %s7910_s29  ;;  %v3066_v4 = vpop.permute.xlu0 %3065  ;;  %v9667_v21 = vadd.f32 %v7884_v21, %v4223_v57  }
 0x3dd   : >> { %3136 = vst.msk [vmem:[#allocation3 + $0xd0] sm:$0xf] %vm3109_vm8, %v3066_v4 }
 0x3de   : >> { %v10607_v36 = vmov %v9667_v21  ;;  %v2810_v51 = vpop.permute.xlu1 %2809  ;;  %v7268_v34 = vpop.eup %7267 }
 0x3df   : >> { %2879 = vst.msk [vmem:[#allocation3 + $0xd8] sm:$0xf] %vm2851_vm7, %v2810_v51  ;;  %v4224_v41 = vmul.f32 %v7268_v34, %v9611_v31 }
 0x3e0   : >> { %v3283_v62 = vpop.permute.xlu0 %3282 }
 0x3e1   : >> { %3373 = vst.msk [vmem:[#allocation3 + $0x30] sm:$0xf] %vm3366_vm9, %v3283_v62  ;;  %v9673_v52 = vadd.f32 %v7880_v52, %v4224_v41  }
 0x3e2   : >> { %v3028_v18 = vpop.permute.xlu1 %3027 }
 0x3e3   : >> { %v10608_v39 = vmov %v9673_v52  ;;  %3117 = vst.msk [vmem:[#allocation3 + $0x38] sm:$0xf] %vm3109_vm8, %v3028_v18 }
 0x3e4   : >> { %v3323_v20 = vpop.permute.xlu0 %3322 }
 0x3e5   : >> { %3393 = vst.msk [vmem:[#allocation3 + $0xd0] sm:$0xf] %vm3366_vm9, %v3323_v20 }
 0x3e6   : >> { %v3068_v28 = vpop.permute.xlu1 %3067 }
 0x3e7   : >> { %3137 = vst.msk [vmem:[#allocation3 + $0xd8] sm:$0xf] %vm3109_vm8, %v3068_v28 }
 0x3e8   : >> { %v2001_v21 = vpop.permute.xlu0 %2000  ;;  %v3597_v42 = vld [vmem:[#allocation3 + $0x30] sm:$0xff] }
 0x3e9   : >> { %2089 = vst.msk [vmem:[#allocation3 + $0x40] sm:$0xf] %vm2080_vm4, %v2001_v21 }
 0x3ea   : >> { %v3285_v29 = vpop.permute.xlu1 %3284 }
 0x3eb   : >> { %3374 = vst.msk [vmem:[#allocation3 + $0x38] sm:$0xf] %vm3366_vm9, %v3285_v29 }
 0x3ec   : >> { %v2041_v31 = vpop.permute.xlu0 %2040  ;;  %v3617_v56 = vld [vmem:[#allocation3 + $0xd0] sm:$0xff] }
 0x3ed   : >> { %2109 = vst.msk [vmem:[#allocation3 + $0xe0] sm:$0xf] %vm2080_vm4, %v2041_v31 }
 0x3ee   : >> { %v3325_v14 = vpop.permute.xlu1 %3324 }
 0x3ef   : >> { %3394 = vst.msk [vmem:[#allocation3 + $0xd8] sm:$0xf] %vm3366_vm9, %v3325_v14 }
 0x3f0   : >> { %v2258_v52 = vpop.permute.xlu0 %2257 }
 0x3f1   : >> { %2346 = vst.msk [vmem:[#allocation3 + $0x40] sm:$0xf] %vm2337_vm5, %v2258_v52  ;;  %v3980_v58 = vpop.f32.mrf.mxu1 }
 0x3f2   : >> { %v2003_v43 = vpop.permute.xlu1 %2002  ;;  %v3598_v25 = vld [vmem:[#allocation3 + $0x38] sm:$0xff]  ;;  %v3981_v32 = vadd.f32 %v9466_v40, %v3980_v58 }
 0x3f3   : >> { %2090 = vst.msk [vmem:[#allocation3 + $0x48] sm:$0xf] %vm2080_vm4, %v2003_v43  ;;  %v5982_v61 = vcombine.low %v3597_v42, %v3598_v25  ;;  %v3982_v19 = vpop.f32.mrf.mxu1 }
 0x3f4   : >> { %v2298_v17 = vpop.permute.xlu0 %2297  ;;  %v4071_v1 = vsub.f32 0.0, %v3981_v32 }
 0x3f5   : >> { %2366 = vst.msk [vmem:[#allocation3 + $0xe0] sm:$0xf] %vm2337_vm5, %v2298_v17  ;;  %3955 = vmatmul.mubr.bf16.gmra.mxu0 %v5982_v61  ;;  %v3983_v10 = vpop.f32.mrf.mxu1 }
 0x3f6   : >> { %v2043_v9 = vpop.permute.xlu1 %2042  ;;  %v3618_v27 = vld [vmem:[#allocation3 + $0xd8] sm:$0xff]  ;;  %v4115_v8 = vmul.f32 1.442695, %v4071_v1  ;;  %v3984_v3 = vadd.f32 %v9466_v40, %v3983_v10  ;;  %v7107_v10 = vld [vmem:[#allocation3 + $0x44] ss:$8 sps:$4 sm:$0xff]  }
 0x3f7   : >> { %2110 = vst.msk [vmem:[#allocation3 + $0xe8] sm:$0xf] %vm2080_vm4, %v2043_v9  ;;  %v6002_v2 = vcombine.low %v3617_v56, %v3618_v27  ;;  %v3985_v53 = vpop.f32.mrf.mxu1  ;;  %6021 = vmatprep.mubr.msk.bf16.mxu0 %vm451_vm0, %v7107_v10 }
 0x3f8   : >> { %v2515_v49 = vpop.permute.xlu0 %2514  ;;  %7269 = vpow2.f32 %v4115_v8  ;;  %v4072_v44 = vsub.f32 0.0, %v3984_v3 }
 0x3f9   : >> { %2603 = vst.msk [vmem:[#allocation3 + $0x40] sm:$0xf] %vm2594_vm6, %v2515_v49  ;;  %4035 = vmatmul.mubr.bf16.gmra.mxu1 %v6002_v2 }
 0x3fa   : >> { %v2260_v16 = vpop.permute.xlu1 %2259  ;;  %v4117_v63 = vmul.f32 1.442695, %v4072_v44 }
 0x3fb   : >> { %2347 = vst.msk [vmem:[#allocation3 + $0x48] sm:$0xf] %vm2337_vm5, %v2260_v16 }
 0x3fc   : >> { %v2555_v33 = vpop.permute.xlu0 %2554  ;;  %7271 = vpow2.f32 %v4117_v63 }
 0x3fd   : >> { %2623 = vst.msk [vmem:[#allocation3 + $0xe0] sm:$0xf] %vm2594_vm6, %v2555_v33  ;;  %v7109_v33 = vld [vmem:[#allocation3 + $0xe4] ss:$8 sps:$4 sm:$0xff]  }
 0x3fe   : >> { %v2300_v30 = vpop.permute.xlu1 %2299  ;;  %6031 = vmatprep.mubr.msk.bf16.mxu1 %vm451_vm0, %v7109_v33  ;;  %v7111_v33 = vld [vmem:[#allocation3 + $0x54] ss:$8 sps:$4 sm:$0xff]  }
 0x3ff   : >> { %2367 = vst.msk [vmem:[#allocation3 + $0xe8] sm:$0xf] %vm2337_vm5, %v2300_v30 }
 0x400   : >> { %v2772_v50 = vpop.permute.xlu0 %2771 }
 0x401   : >> { %2860 = vst.msk [vmem:[#allocation3 + $0x40] sm:$0xf] %vm2851_vm7, %v2772_v50 }
 0x402   : >> { %v2517_v59 = vpop.permute.xlu1 %2516 }
 0x403   : >> { %2604 = vst.msk [vmem:[#allocation3 + $0x48] sm:$0xf] %vm2594_vm6, %v2517_v59 }
 0x404   : >> { %v2812_v11 = vpop.permute.xlu0 %2811 }
 0x405   : >> { %2880 = vst.msk [vmem:[#allocation3 + $0xe0] sm:$0xf] %vm2851_vm7, %v2812_v11  ;;  %v7270_v24 = vpop.eup %7269 }
 0x406   : >> { %v2557_v15 = vpop.permute.xlu1 %2556  ;;  %v4167_v37 = vadd.f32 1.0, %v7270_v24 }
 0x407   : >> { %2624 = vst.msk [vmem:[#allocation3 + $0xe8] sm:$0xf] %vm2594_vm6, %v2557_v15 }
 0x408   : >> { %v3030_v38 = vpop.permute.xlu0 %3029  ;;  %7273 = vrcp.f32 %v4167_v37 }
 0x409   : >> { %3118 = vst.msk [vmem:[#allocation3 + $0x40] sm:$0xf] %vm3109_vm8, %v3030_v38  ;;  %v7272_v4 = vpop.eup %7271 }
 0x40a   : >> { %v2774_v57 = vpop.permute.xlu1 %2773  ;;  %v4168_v51 = vadd.f32 1.0, %v7272_v4 }
 0x40b   : >> { %2861 = vst.msk [vmem:[#allocation3 + $0x48] sm:$0xf] %vm2851_vm7, %v2774_v57 }
 0x40c   : >> { %v3070_v34 = vpop.permute.xlu0 %3069  ;;  %7275 = vrcp.f32 %v4168_v51 }
 0x40d   : >> { %3138 = vst.msk [vmem:[#allocation3 + $0xe0] sm:$0xf] %vm3109_vm8, %v3070_v34 }
 0x40e   : >> { %v2814_v41 = vpop.permute.xlu1 %2813 }
 0x40f   : >> { %2881 = vst.msk [vmem:[#allocation3 + $0xe8] sm:$0xf] %vm2851_vm7, %v2814_v41 }
 0x410   : >> { %v3287_v62 = vpop.permute.xlu0 %3286 }
 0x411   : >> { %3375 = vst.msk [vmem:[#allocation3 + $0x40] sm:$0xf] %vm3366_vm9, %v3287_v62 }
 0x412   : >> { %v3032_v18 = vpop.permute.xlu1 %3031 }
 0x413   : >> { %3119 = vst.msk [vmem:[#allocation3 + $0x48] sm:$0xf] %vm3109_vm8, %v3032_v18 }
 0x414   : >> { %v3327_v20 = vpop.permute.xlu0 %3326 }
 0x415   : >> { %3395 = vst.msk [vmem:[#allocation3 + $0xe0] sm:$0xf] %vm3366_vm9, %v3327_v20  ;;  %v7274_v21 = vpop.eup %7273 }
 0x416   : >> { %v3072_v28 = vpop.permute.xlu1 %3071  ;;  %v4231_v29 = vmul.f32 %v7274_v21, %v3981_v32 }
 0x417   : >> { %3139 = vst.msk [vmem:[#allocation3 + $0xe8] sm:$0xf] %vm3109_vm8, %v3072_v28 }
 0x418   : >> { %v2005_v31 = vpop.permute.xlu0 %2004  ;;  %v9708_v22 = vadd.f32 %v7852_v22, %v4231_v29   ;;  %v3599_v0 = vld [vmem:[#allocation3 + $0x40] sm:$0xff] }
 0x419   : >> { %2091 = vst.msk [vmem:[#allocation3 + $0x50] sm:$0xf] %vm2080_vm4, %v2005_v31  ;;  %v7276_v43 = vpop.eup %7275 }
 0x41a   : >> { %v10609_v14 = vmov %v9708_v22  ;;  %v3289_v52 = vpop.permute.xlu1 %3288  ;;  %v4232_v42 = vmul.f32 %v7276_v43, %v3984_v3 }
 0x41b   : >> { %3376 = vst.msk [vmem:[#allocation3 + $0x48] sm:$0xf] %vm3366_vm9, %v3289_v52 }
 0x41c   : >> { %v2045_v25 = vpop.permute.xlu0 %2044  ;;  %v9713_v46 = vadd.f32 %v7848_v46, %v4232_v42   ;;  %v3619_v16 = vld [vmem:[#allocation3 + $0xe0] sm:$0xff] }
 0x41d   : >> { %2111 = vst.msk [vmem:[#allocation3 + $0xf0] sm:$0xf] %vm2080_vm4, %v2045_v25  ;;  %v3988_v45 = vpop.f32.mrf.mxu1 }
 0x41e   : >> { %v10610_v58 = vmov %v9713_v46  ;;  %v9716_v61 = vadd.f32 %v9466_v40, %v3988_v45  ;;  %v3329_v32 = vpop.permute.xlu1 %3328 }
 0x41f   : >> { %3396 = vst.msk [vmem:[#allocation3 + $0xe8] sm:$0xf] %vm3366_vm9, %v3329_v32  ;;  %v3990_v17 = vpop.f32.mrf.mxu1 }
 0x420   : >> { %v4073_v22 = vsub.f32 0.0, %v9716_v61  ;;  %v2262_v19 = vpop.permute.xlu0 %2261 }
 0x421   : >> { %2348 = vst.msk [vmem:[#allocation3 + $0x50] sm:$0xf] %vm2337_vm5, %v2262_v19  ;;  %v3991_v1 = vpop.f32.mrf.mxu1 }
 0x422   : >> { %v4119_v9 = vmul.f32 1.442695, %v4073_v22  ;;  %v9722_v56 = vadd.f32 %v9466_v40, %v3991_v1  ;;  %v2007_v27 = vpop.permute.xlu1 %2006  ;;  %v3600_v46 = vld [vmem:[#allocation3 + $0x48] sm:$0xff] }
 0x423   : >> { %2092 = vst.msk [vmem:[#allocation3 + $0x58] sm:$0xf] %vm2080_vm4, %v2007_v27  ;;  %v3993_v2 = vpop.f32.mrf.mxu1  ;;  %v5984_v8 = vcombine.low %v3599_v0, %v3600_v46 }
 0x424   : >> { %7277 = vpow2.f32 %v4119_v9  ;;  %v4074_v3 = vsub.f32 0.0, %v9722_v56  ;;  %v2302_v49 = vpop.permute.xlu0 %2301 }
 0x425   : >> { %2368 = vst.msk [vmem:[#allocation3 + $0xf0] sm:$0xf] %vm2337_vm5, %v2302_v49  ;;  %3963 = vmatmul.mubr.bf16.gmra.mxu0 %v5984_v8 }
 0x426   : >> { %v4121_v53 = vmul.f32 1.442695, %v4074_v3  ;;  %v2047_v44 = vpop.permute.xlu1 %2046  ;;  %v3620_v63 = vld [vmem:[#allocation3 + $0xe8] sm:$0xff]  ;;  %6022 = vmatprep.mubr.msk.bf16.mxu0 %vm451_vm0, %v7111_v33 }
 0x427   : >> { %2112 = vst.msk [vmem:[#allocation3 + $0xf8] sm:$0xf] %vm2080_vm4, %v2047_v44  ;;  %v6004_v30 = vcombine.low %v3619_v16, %v3620_v63 }
 0x428   : >> { %7279 = vpow2.f32 %v4121_v53  ;;  %v2519_v50 = vpop.permute.xlu0 %2518 }
 0x429   : >> { %2605 = vst.msk [vmem:[#allocation3 + $0x50] sm:$0xf] %vm2594_vm6, %v2519_v50  ;;  %4043 = vmatmul.mubr.bf16.gmra.mxu1 %v6004_v30  ;;  %v3996_v11 = vpop.f32.mrf.mxu1 }
 0x42a   : >> { %v2264_v59 = vpop.permute.xlu1 %2263  ;;  %v3997_v15 = vadd.f32 %v9466_v40, %v3996_v11 }
 0x42b   : >> { %2349 = vst.msk [vmem:[#allocation3 + $0x58] sm:$0xf] %vm2337_vm5, %v2264_v59  ;;  %v3998_v37 = vpop.f32.mrf.mxu1 }
 0x42c   : >> { %v2559_v24 = vpop.permute.xlu0 %2558  ;;  %v4075_v38 = vsub.f32 0.0, %v3997_v15  ;;  %v7114_v37 = vld [vmem:[#allocation3 + $0xf4] ss:$8 sps:$4 sm:$0xff]  }
 0x42d   : >> { %2625 = vst.msk [vmem:[#allocation3 + $0xf0] sm:$0xf] %vm2594_vm6, %v2559_v24  ;;  %v3999_v4 = vpop.f32.mrf.mxu1  ;;  %6032 = vmatprep.mubr.msk.bf16.mxu1 %vm451_vm0, %v7114_v37 }
 0x42e   : >> { %v2304_v57 = vpop.permute.xlu1 %2303  ;;  %v4123_v51 = vmul.f32 1.442695, %v4075_v38  ;;  %v4000_v34 = vadd.f32 %v9466_v40, %v3999_v4 }
 0x42f   : >> { %2369 = vst.msk [vmem:[#allocation3 + $0xf8] sm:$0xf] %vm2337_vm5, %v2304_v57  ;;  %v4001_v18 = vpop.f32.mrf.mxu1 }
 0x430   : >> { %v2776_v41 = vpop.permute.xlu0 %2775  ;;  %7281 = vpow2.f32 %v4123_v51  ;;  %v4076_v28 = vsub.f32 0.0, %v4000_v34 }
 0x431   : >> { %v7278_v62 = vpop.eup %7277  ;;  %2862 = vst.msk [vmem:[#allocation3 + $0x50] sm:$0xf] %vm2851_vm7, %v2776_v41 }
 0x432   : >> { %v4169_v20 = vadd.f32 1.0, %v7278_v62  ;;  %v2521_v21 = vpop.permute.xlu1 %2520  ;;  %v4125_v29 = vmul.f32 1.442695, %v4076_v28 }
 0x433   : >> { %2606 = vst.msk [vmem:[#allocation3 + $0x58] sm:$0xf] %vm2594_vm6, %v2521_v21 }
 0x434   : >> { %7283 = vrcp.f32 %v4169_v20  ;;  %v2816_v31 = vpop.permute.xlu0 %2815 }
 0x435   : >> { %v7280_v52 = vpop.eup %7279  ;;  %2882 = vst.msk [vmem:[#allocation3 + $0xf0] sm:$0xf] %vm2851_vm7, %v2816_v31  ;;  %7285 = vpow2.f32 %v4125_v29  ;;  %v9770_v31 = vld [vmem:[%s9456_s18] ss:$0 sm:$0xff] }
 0x436   : >> { %v4170_v43 = vadd.f32 1.0, %v7280_v52  ;;  %v2561_v42 = vpop.permute.xlu1 %2560 }
 0x437   : >> { %2626 = vst.msk [vmem:[#allocation3 + $0xf8] sm:$0xf] %vm2594_vm6, %v2561_v42 }
 0x438   : >> { %7287 = vrcp.f32 %v4170_v43  ;;  %v3034_v25 = vpop.permute.xlu0 %3033 }
 0x439   : >> { %3120 = vst.msk [vmem:[#allocation3 + $0x50] sm:$0xf] %vm3109_vm8, %v3034_v25 }
 0x43a   : >> { %v2778_v45 = vpop.permute.xlu1 %2777 }
 0x43b   : >> { %2863 = vst.msk [vmem:[#allocation3 + $0x58] sm:$0xf] %vm2851_vm7, %v2778_v45 }
 0x43c   : >> { %v3074_v32 = vpop.permute.xlu0 %3073 }
 0x43d   : >> { %3140 = vst.msk [vmem:[#allocation3 + $0xf0] sm:$0xf] %vm3109_vm8, %v3074_v32  ;;  %v7282_v22 = vpop.eup %7281 }
 0x43e   : >> { %v2818_v17 = vpop.permute.xlu1 %2817  ;;  %v4171_v19 = vadd.f32 1.0, %v7282_v22 }
 0x43f   : >> { %2883 = vst.msk [vmem:[#allocation3 + $0xf8] sm:$0xf] %vm2851_vm7, %v2818_v17 }
 0x440   : >> { %v3291_v1 = vpop.permute.xlu0 %3290  ;;  %7289 = vrcp.f32 %v4171_v19 }
 0x441   : >> { %v7284_v9 = vpop.eup %7283  ;;  %3377 = vst.msk [vmem:[#allocation3 + $0x50] sm:$0xf] %vm3366_vm9, %v3291_v1 }
 0x442   : >> { %v4233_v27 = vmul.f32 %v7284_v9, %v9716_v61  ;;  %v3036_v0 = vpop.permute.xlu1 %3035  ;;  %v7286_v46 = vpop.eup %7285 }
 0x443   : >> { %3121 = vst.msk [vmem:[#allocation3 + $0x58] sm:$0xf] %vm3109_vm8, %v3036_v0  ;;  %v4172_v2 = vadd.f32 1.0, %v7286_v46 }
 0x444   : >> { %v9748_v6 = vadd.f32 %v7844_v6, %v4233_v27   ;;  %v3331_v8 = vpop.permute.xlu0 %3330 }
 0x445   : >> { %v7288_v3 = vpop.eup %7287  ;;  %3397 = vst.msk [vmem:[#allocation3 + $0xf0] sm:$0xf] %vm3366_vm9, %v3331_v8  ;;  %7291 = vrcp.f32 %v4172_v2 }
 0x446   : >> { %v10611_v10 = vmov %v9748_v6  ;;  %v4234_v49 = vmul.f32 %v7288_v3, %v9722_v56  ;;  %v3076_v53 = vpop.permute.xlu1 %3075 }
 0x447   : >> { %3141 = vst.msk [vmem:[#allocation3 + $0xf8] sm:$0xf] %vm3109_vm8, %v3076_v53 }
 0x448   : >> { %v9754_v35 = vadd.f32 %v7840_v35, %v4234_v49  }
 0x44a   : >> { %v10612_v61 = vmov %v9754_v35  ;;  %v3293_v44 = vpop.permute.xlu1 %3292 }
 0x44b   : >> { %3378 = vst.msk [vmem:[#allocation3 + $0x58] sm:$0xf] %vm3366_vm9, %v3293_v44 }
 0x44d   : >> { %v7290_v63 = vpop.eup %7289 }
 0x44e   : >> { %v3333_v16 = vpop.permute.xlu1 %3332  ;;  %v4235_v6 = vmul.f32 %v7290_v63, %v3997_v15 }
 0x44f   : >> { %3398 = vst.msk [vmem:[#allocation3 + $0xf8] sm:$0xf] %vm3366_vm9, %v3333_v16 }
 0x450   : >> { %v9759_v54 = vadd.f32 %v7836_v54, %v4235_v6  }
 0x452   : >> { %v10613_v11 = vmov %v9759_v54  ;;  %v7113_v56 = vld [vmem:[#allocation3 + $0x50] ss:$8 sps:$4 sm:$0xff]   ;;  %v7292_v30 = vpop.eup %7291 }
 0x453   : >> { %v4236_v50 = vmul.f32 %v7292_v30, %v4000_v34  ;;  %3971 = vmatmul.mubr.bf16.gmra.mxu0 %v7113_v56 }
 0x455   : >> { %v4004_v59 = vpop.f32.mrf.mxu1  ;;  %v9763_v5 = vadd.f32 %v7832_v5, %v4236_v50  }
 0x456   : >> { %v4005_v35 = vadd.f32 %v9466_v40, %v4004_v59  ;;  %v7116_v38 = vld [vmem:[#allocation3 + $0xf0] ss:$8 sps:$4 sm:$0xff]  }
 0x457   : >> { %v10614_v24 = vmov %v9763_v5  ;;  %v4006_v57 = vpop.f32.mrf.mxu1  ;;  %4051 = vmatmul.mubr.bf16.gmra.mxu1 %v7116_v38 }
 0x458   : >> { %v4077_v15 = vsub.f32 0.0, %v4005_v35 }
 0x459   : >> { %v4007_v54 = vpop.f32.mrf.mxu1 }
 0x45a   : >> { %v4127_v4 = vmul.f32 1.442695, %v4077_v15  ;;  %v4008_v51 = vadd.f32 %v9466_v40, %v4007_v54 }
 0x45b   : >> { %v4009_v34 = vpop.f32.mrf.mxu1 }
 0x45c   : >> { %7293 = vpow2.f32 %v4127_v4  ;;  %v4078_v41 = vsub.f32 0.0, %v4008_v51 }
 0x45e   : >> { %v4129_v62 = vmul.f32 1.442695, %v4078_v41 }
 0x460   : >> { %7295 = vpow2.f32 %v4129_v62 }
 0x461   : >> { %v4012_v5 = vpop.f32.mrf.mxu1 }
 0x462   : >> { %v4013_v18 = vadd.f32 %v9466_v40, %v4012_v5 }
 0x463   : >> { %v4014_v20 = vpop.f32.mrf.mxu1 }
 0x464   : >> { %v4079_v28 = vsub.f32 0.0, %v4013_v18 }
 0x465   : >> { %v4015_v21 = vpop.f32.mrf.mxu1 }
 0x466   : >> { %v4131_v29 = vmul.f32 1.442695, %v4079_v28  ;;  %v4016_v52 = vadd.f32 %v9770_v31, %v4015_v21 }
 0x467   : >> { %v4017_v42 = vpop.f32.mrf.mxu1 }
 0x468   : >> { %7297 = vpow2.f32 %v4131_v29  ;;  %v4080_v45 = vsub.f32 0.0, %v4016_v52 }
 0x469   : >> { %v7294_v43 = vpop.eup %7293 }
 0x46a   : >> { %v4173_v25 = vadd.f32 1.0, %v7294_v43  ;;  %v4133_v32 = vmul.f32 1.442695, %v4080_v45 }
 0x46c   : >> { %7299 = vrcp.f32 %v4173_v25 }
 0x46d   : >> { %v7296_v17 = vpop.eup %7295  ;;  %7301 = vpow2.f32 %v4133_v32 }
 0x46e   : >> { %v4174_v22 = vadd.f32 1.0, %v7296_v17 }
 0x470   : >> { %7303 = vrcp.f32 %v4174_v22  ;;  %v10620_v22 = vld [vmem:[#allocation12_spill] sm:$0xff] }
 0x475   : >> { %v7298_v40 = vpop.eup %7297 }
 0x476   : >> { %v4175_v19 = vadd.f32 1.0, %v7298_v40 }
 0x478   : >> { %7305 = vrcp.f32 %v4175_v19 }
 0x479   : >> { %v7300_v1 = vpop.eup %7299 }
 0x47a   : >> { %v4237_v9 = vmul.f32 %v7300_v1, %v4005_v35  ;;  %v7302_v27 = vpop.eup %7301 }
 0x47b   : >> { %v4176_v0 = vadd.f32 1.0, %v7302_v27 }
 0x47c   : >> { %v9774_v23 = vadd.f32 %v7828_v23, %v4237_v9   ;;  %v10622_v9 = vld [vmem:[#allocation11_spill] sm:$0xff] }
 0x47d   : >> { %v7304_v46 = vpop.eup %7303  ;;  %v4020_v8 = vpop.f32.mrf.mxu1  ;;  %7307 = vrcp.f32 %v4176_v0 }
 0x47e   : >> { %v10615_v2 = vmov %v9774_v23  ;;  %v4238_v3 = vmul.f32 %v7304_v46, %v4008_v51  ;;  %v4021_v49 = vadd.f32 %v9770_v31, %v4020_v8 }
 0x47f   : >> { %v4022_v53 = vpop.f32.mrf.mxu1 }
 0x480   : >> { %v9778_v60 = vadd.f32 %v7824_v60, %v4238_v3   ;;  %v4081_v44 = vsub.f32 0.0, %v4021_v49  ;;  %v10624_v3 = vld [vmem:[#allocation10_spill] sm:$0xff] }
 0x481   : >> { %v4023_v63 = vpop.f32.mrf.mxu1 }
 0x482   : >> { %v10616_v16 = vmov %v9778_v60  ;;  %v4135_v6 = vmul.f32 1.442695, %v4081_v44  ;;  %v4024_v33 = vadd.f32 %v9770_v31, %v4023_v63 }
 0x483   : >> { %v4025_v56 = vpop.f32.mrf.mxu1 }
 0x484   : >> { %7309 = vpow2.f32 %v4135_v6  ;;  %v4082_v30 = vsub.f32 0.0, %v4024_v33 }
 0x485   : >> { %v7306_v50 = vpop.eup %7305 }
 0x486   : >> { %v4137_v23 = vmul.f32 1.442695, %v4082_v30  ;;  %v4239_v59 = vmul.f32 %v7306_v50, %v4013_v18 }
 0x488   : >> { %7311 = vpow2.f32 %v4137_v23  ;;  %v9782_v26 = vadd.f32 %v7820_v26, %v4239_v59  }
 0x489   : >> { %v4028_v38 = vpop.f32.mrf.mxu1 }
 0x48a   : >> { %v10617_v37 = vmov %v9782_v26  ;;  %v7308_v35 = vpop.eup %7307  ;;  %v4029_v60 = vadd.f32 %v9770_v31, %v4028_v38 }
 0x48b   : >> { %v4240_v57 = vmul.f32 %v7308_v35, %v4016_v52  ;;  %v4030_v15 = vpop.f32.mrf.mxu1 }
 0x48c   : >> { %v4083_v54 = vsub.f32 0.0, %v4029_v60 }
 0x48d   : >> { %v9786_v48 = vadd.f32 %v7816_v48, %v4240_v57   ;;  %v4031_v4 = vpop.f32.mrf.mxu1 }
 0x48e   : >> { %v4139_v51 = vmul.f32 1.442695, %v4083_v54  ;;  %v4032_v41 = vadd.f32 %v9770_v31, %v4031_v4 }
 0x48f   : >> { %v10618_v34 = vmov %v9786_v48  ;;  %v4033_v5 = vpop.f32.mrf.mxu1 }
 0x490   : >> { %7313 = vpow2.f32 %v4139_v51  ;;  %v4084_v20 = vsub.f32 0.0, %v4032_v41 }
 0x491   : >> { %v7310_v62 = vpop.eup %7309 }
 0x492   : >> { %v4177_v18 = vadd.f32 1.0, %v7310_v62  ;;  %v4141_v26 = vmul.f32 1.442695, %v4084_v20 }
 0x494   : >> { %7315 = vrcp.f32 %v4177_v18 }
 0x495   : >> { %v7312_v28 = vpop.eup %7311  ;;  %7317 = vpow2.f32 %v4141_v26 }
 0x496   : >> { %v4178_v21 = vadd.f32 1.0, %v7312_v28 }
 0x498   : >> { %7319 = vrcp.f32 %v4178_v21 }
 0x49d   : >> { %v7314_v29 = vpop.eup %7313 }
 0x49e   : >> { %v4179_v52 = vadd.f32 1.0, %v7314_v29 }
 0x4a0   : >> { %7321 = vrcp.f32 %v4179_v52 }
 0x4a1   : >> { %v7316_v43 = vpop.eup %7315 }
 0x4a2   : >> { %v4241_v48 = vmul.f32 %v7316_v43, %v4021_v49  ;;  %v7318_v42 = vpop.eup %7317  ;;  %v10626_v43 = vld [vmem:[#allocation18_spill] sm:$0xff] }
 0x4a3   : >> { %v4180_v45 = vadd.f32 1.0, %v7318_v42 }
 0x4a4   : >> { %v9790_v13 = vadd.f32 %v7812_v13, %v4241_v48  }
 0x4a5   : >> { %v7320_v32 = vpop.eup %7319  ;;  %7323 = vrcp.f32 %v4180_v45 }
 0x4a6   : >> { %v10619_v25 = vmov %v9790_v13  ;;  %v4242_v17 = vmul.f32 %v7320_v32, %v4024_v33 }
 0x4a8   : >> { %v9793_v30 = vadd.f32 %v10620_v22, %v4242_v17   ;;  %v10628_v22 = vld [vmem:[#allocation17_spill] sm:$0xff] }
 0x4aa   : >> { %v10621_v40 = vmov %v9793_v30 }
 0x4ad   : >> { %v7322_v19 = vpop.eup %7321 }
 0x4ae   : >> { %v4243_v1 = vmul.f32 %v7322_v19, %v4029_v60 }
 0x4b0   : >> { %v9796_v59 = vadd.f32 %v10622_v9, %v4243_v1   ;;  %v10630_v9 = vld [vmem:[#allocation9_spill] sm:$0xff] }
 0x4b2   : >> { %v10623_v27 = vmov %v9796_v59  ;;  %v7324_v0 = vpop.eup %7323 }
 0x4b3   : >> { %v4244_v46 = vmul.f32 %v7324_v0, %v4032_v41 }
 0x4b5   : >> { %v3956_v8 = vpop.f32.mrf.mxu0  ;;  %v9799_v4 = vadd.f32 %v10624_v3, %v4244_v46   ;;  %v10632_v46 = vld [vmem:[#allocation8_spill] sm:$0xff] }
 0x4b6   : >> { %v3957_v13 = vadd.f32 %v9770_v31, %v3956_v8 }
 0x4b7   : >> { %v10625_v53 = vmov %v9799_v4  ;;  %v3958_v49 = vpop.f32.mrf.mxu0 }
 0x4b8   : >> { %v4065_v44 = vsub.f32 0.0, %v3957_v13 }
 0x4b9   : >> { %v3959_v63 = vpop.f32.mrf.mxu0  ;;  %v4036_v6 = vpop.f32.mrf.mxu1 }
 0x4ba   : >> { %v4103_v33 = vmul.f32 1.442695, %v4065_v44  ;;  %v3960_v56 = vadd.f32 %v9770_v31, %v3959_v63  ;;  %v4037_v30 = vadd.f32 %v9770_v31, %v4036_v6 }
 0x4bb   : >> { %v3961_v23 = vpop.f32.mrf.mxu0  ;;  %v4038_v50 = vpop.f32.mrf.mxu1 }
 0x4bc   : >> { %7325 = vpow2.f32 %v4103_v33  ;;  %v4066_v59 = vsub.f32 0.0, %v3960_v56  ;;  %v4085_v35 = vsub.f32 0.0, %v4037_v30 }
 0x4bd   : >> { %v4039_v38 = vpop.f32.mrf.mxu1 }
 0x4be   : >> { %v4105_v57 = vmul.f32 1.442695, %v4066_v59  ;;  %v4143_v60 = vmul.f32 1.442695, %v4085_v35  ;;  %v4040_v15 = vadd.f32 %v9770_v31, %v4039_v38 }
 0x4bf   : >> { %v4041_v54 = vpop.f32.mrf.mxu1 }
 0x4c0   : >> { %7327 = vpow2.f32 %v4105_v57  ;;  %v4086_v4 = vsub.f32 0.0, %v4040_v15 }
 0x4c1   : >> { %7329 = vpow2.f32 %v4143_v60 }
 0x4c2   : >> { %v4145_v51 = vmul.f32 1.442695, %v4086_v4 }
 0x4c4   : >> { %7331 = vpow2.f32 %v4145_v51 }
 0x4c9   : >> { %v7326_v41 = vpop.eup %7325 }
 0x4ca   : >> { %v4161_v62 = vadd.f32 1.0, %v7326_v41 }
 0x4cc   : >> { %7333 = vrcp.f32 %v4161_v62 }
 0x4cd   : >> { %v7328_v5 = vpop.eup %7327 }
 0x4ce   : >> { %v7330_v18 = vpop.eup %7329  ;;  %v4162_v20 = vadd.f32 1.0, %v7328_v5 }
 0x4cf   : >> { %v4181_v26 = vadd.f32 1.0, %v7330_v18 }
 0x4d0   : >> { %7335 = vrcp.f32 %v4162_v20 }
 0x4d1   : >> { %v7332_v28 = vpop.eup %7331  ;;  %7337 = vrcp.f32 %v4181_v26 }
 0x4d2   : >> { %v4182_v21 = vadd.f32 1.0, %v7332_v28 }
 0x4d4   : >> { %7339 = vrcp.f32 %v4182_v21 }
 0x4d9   : >> { %v7334_v29 = vpop.eup %7333 }
 0x4da   : >> { %v4225_v52 = vmul.f32 %v7334_v29, %v3957_v13 }
 0x4dc   : >> { %v9806_v50 = vadd.f32 %v10626_v43, %v4225_v52  }
 0x4dd   : >> { %v7336_v48 = vpop.eup %7335 }
 0x4de   : >> { %v10627_v42 = vmov %v9806_v50  ;;  %v7338_v45 = vpop.eup %7337  ;;  %v4226_v32 = vmul.f32 %v7336_v48, %v3960_v56  ;;  %v10634_v48 = vld [vmem:[#allocation16_spill] sm:$0xff] }
 0x4df   : >> { %v4245_v17 = vmul.f32 %v7338_v45, %v4037_v30 }
 0x4e0   : >> { %v9809_v20 = vadd.f32 %v10628_v22, %v4226_v32  }
 0x4e1   : >> { %v7340_v1 = vpop.eup %7339  ;;  %v9812_v56 = vadd.f32 %v10630_v9, %v4245_v17   ;;  %v10636_v9 = vld [vmem:[#allocation15_spill] sm:$0xff] }
 0x4e2   : >> { %v10629_v19 = vmov %v9809_v20  ;;  %v4246_v0 = vmul.f32 %v7340_v1, %v4040_v15 }
 0x4e3   : >> { %v10631_v8 = vmov %v9812_v56 }
 0x4e4   : >> { %v9815_v44 = vadd.f32 %v10632_v46, %v4246_v0   ;;  %v10638_v46 = vld [vmem:[#allocation7_spill] sm:$0xff] }
 0x4e5   : >> { %v3964_v49 = vpop.f32.mrf.mxu0 }
 0x4e6   : >> { %v10633_v3 = vmov %v9815_v44  ;;  %v3965_v13 = vadd.f32 %v9770_v31, %v3964_v49 }
 0x4e7   : >> { %v3966_v63 = vpop.f32.mrf.mxu0 }
 0x4e8   : >> { %v4067_v6 = vsub.f32 0.0, %v3965_v13  ;;  %v10640_v63 = vld [vmem:[#allocation6_spill] sm:$0xff] }
 0x4e9   : >> { %v3967_v33 = vpop.f32.mrf.mxu0  ;;  %v4044_v23 = vpop.f32.mrf.mxu1 }
 0x4ea   : >> { %v4107_v50 = vmul.f32 1.442695, %v4067_v6  ;;  %v3968_v30 = vadd.f32 %v9770_v31, %v3967_v33  ;;  %v4045_v59 = vadd.f32 %v9770_v31, %v4044_v23 }
 0x4eb   : >> { %v3969_v35 = vpop.f32.mrf.mxu0  ;;  %v4046_v38 = vpop.f32.mrf.mxu1 }
 0x4ec   : >> { %7341 = vpow2.f32 %v4107_v50  ;;  %v4068_v56 = vsub.f32 0.0, %v3968_v30  ;;  %v4087_v57 = vsub.f32 0.0, %v4045_v59 }
 0x4ed   : >> { %v4047_v60 = vpop.f32.mrf.mxu1 }
 0x4ee   : >> { %v4109_v15 = vmul.f32 1.442695, %v4068_v56  ;;  %v4147_v44 = vmul.f32 1.442695, %v4087_v57  ;;  %v4048_v54 = vadd.f32 %v9770_v31, %v4047_v60 }
 0x4ef   : >> { %v4049_v4 = vpop.f32.mrf.mxu1 }
 0x4f0   : >> { %7343 = vpow2.f32 %v4109_v15  ;;  %v4088_v51 = vsub.f32 0.0, %v4048_v54 }
 0x4f1   : >> { %7345 = vpow2.f32 %v4147_v44 }
 0x4f2   : >> { %v4149_v41 = vmul.f32 1.442695, %v4088_v51 }
 0x4f4   : >> { %7347 = vpow2.f32 %v4149_v41 }
 0x4f9   : >> { %v7342_v62 = vpop.eup %7341 }
 0x4fa   : >> { %v4163_v5 = vadd.f32 1.0, %v7342_v62 }
 0x4fc   : >> { %7349 = vrcp.f32 %v4163_v5 }
 0x4fd   : >> { %v7344_v18 = vpop.eup %7343 }
 0x4fe   : >> { %v7346_v20 = vpop.eup %7345  ;;  %v4164_v26 = vadd.f32 1.0, %v7344_v18 }
 0x4ff   : >> { %v4183_v28 = vadd.f32 1.0, %v7346_v20 }
 0x500   : >> { %7351 = vrcp.f32 %v4164_v26 }
 0x501   : >> { %v7348_v21 = vpop.eup %7347  ;;  %7353 = vrcp.f32 %v4183_v28 }
 0x502   : >> { %v4184_v29 = vadd.f32 1.0, %v7348_v21 }
 0x504   : >> { %7355 = vrcp.f32 %v4184_v29 }
 0x509   : >> { %v7350_v52 = vpop.eup %7349 }
 0x50a   : >> { %v4227_v43 = vmul.f32 %v7350_v52, %v3965_v13 }
 0x50c   : >> { %v9822_v51 = vadd.f32 %v10634_v48, %v4227_v43  }
 0x50d   : >> { %v7352_v45 = vpop.eup %7351 }
 0x50e   : >> { %v10635_v32 = vmov %v9822_v51  ;;  %v7354_v17 = vpop.eup %7353  ;;  %v4228_v22 = vmul.f32 %v7352_v45, %v3968_v30 }
 0x50f   : >> { %v4247_v1 = vmul.f32 %v7354_v17, %v4045_v59 }
 0x510   : >> { %v9825_v9 = vadd.f32 %v10636_v9, %v4228_v22  }
 0x511   : >> { %v7356_v0 = vpop.eup %7355  ;;  %v9828_v29 = vadd.f32 %v10638_v46, %v4247_v1   ;;  %v10642_v1 = vld [vmem:[#allocation14_spill] sm:$0xff] }
 0x512   : >> { %v10637_v38 = vmov %v9825_v9  ;;  %v4248_v49 = vmul.f32 %v7356_v0, %v4048_v54 }
 0x513   : >> { %v10639_v15 = vmov %v9828_v29  ;;  %v3972_v6 = vpop.f32.mrf.mxu0 }
 0x514   : >> { %v9831_v17 = vadd.f32 %v10640_v63, %v4248_v49   ;;  %v3973_v13 = vadd.f32 %v9770_v31, %v3972_v6  ;;  %v10644_v6 = vld [vmem:[#allocation13_spill] sm:$0xff] }
 0x515   : >> { %v3974_v33 = vpop.f32.mrf.mxu0 }
 0x516   : >> { %v10641_v62 = vmov %v9831_v17  ;;  %v4069_v23 = vsub.f32 0.0, %v3973_v13 }
 0x517   : >> { %v3975_v50 = vpop.f32.mrf.mxu0  ;;  %v4052_v35 = vpop.f32.mrf.mxu1 }
 0x518   : >> { %v4111_v30 = vmul.f32 1.442695, %v4069_v23  ;;  %v3976_v59 = vadd.f32 %v9770_v31, %v3975_v50  ;;  %v4053_v56 = vadd.f32 %v9770_v31, %v4052_v35  ;;  %v10646_v50 = vld [vmem:[#allocation5_spill] sm:$0xff] }
 0x519   : >> { %v3977_v57 = vpop.f32.mrf.mxu0  ;;  %v4054_v60 = vpop.f32.mrf.mxu1 }
 0x51a   : >> { %7357 = vpow2.f32 %v4111_v30  ;;  %v4070_v44 = vsub.f32 0.0, %v3976_v59  ;;  %v4089_v54 = vsub.f32 0.0, %v4053_v56  ;;  %v10648_v30 = vld [vmem:[#allocation4_spill] sm:$0xff]  ;;  %v10665_v60 = vmov %v10616_v16 }
 0x51b   : >> { %v4055_v4 = vpop.f32.mrf.mxu1  ;;  %v10681_v57 = vmov %v10606_v12 }
 0x51c   : >> { %v4113_v51 = vmul.f32 1.442695, %v4070_v44  ;;  %v4151_v41 = vmul.f32 1.442695, %v4089_v54  ;;  %v4056_v5 = vadd.f32 %v9770_v31, %v4055_v4  ;;  %v10657_v44 = vmov %v10633_v3 }
 0x51d   : >> { %v4057_v18 = vpop.f32.mrf.mxu1  ;;  %v10659_v4 = vmov %v10625_v53  ;;  %v10668_v54 = vmov %v10613_v11  ;;  %v4301_v44 = vld [vmem:[%s8036_s24 + $0x90] sm:$0xff] (%p9852_p4) }
 0x51e   : >> { %7359 = vpow2.f32 %v4113_v51  ;;  %v4090_v20 = vsub.f32 0.0, %v4056_v5  ;;  %v10676_v51 = vmov %v10635_v32  ;;  %v4302_v54 = vld [vmem:[%s8036_s24 + $0x98] sm:$0xff] (%p9852_p4)  ;;  %v4287_v4 = vld [vmem:[%s8036_s24 + $0x20] sm:$0xff] (%p9852_p4) }
 0x51f   : >> { %7361 = vpow2.f32 %v4151_v41  ;;  %v4324_v51 = vpack.c.bf16 (%p9852_p4), %v4302_v54, %v4301_v44  ;;  %v4313_v44 = vld [vmem:[%s8036_s24 + $0xf0] sm:$0xff] (%p9852_p4)  ;;  %v4314_v54 = vld [vmem:[%s8036_s24 + $0xf8] sm:$0xff] (%p9852_p4) }
 0x520   : >> { %v4153_v26 = vmul.f32 1.442695, %v4090_v20  ;;  %v10677_v20 = vmov %v10629_v19 }
 0x522   : >> { %7363 = vpow2.f32 %v4153_v26  ;;  %v10664_v26 = vmov %v10617_v37 }
 0x523   : > { %v4289_v26 = vld [vmem:[%s8036_s24 + $0x30] sm:$0xff] (%p9852_p4) }
 0x527   : >> { %v7358_v28 = vpop.eup %7357 }
 0x528   : >> { %v4165_v21 = vadd.f32 1.0, %v7358_v28 }
 0x52a   : >> { %7365 = vrcp.f32 %v4165_v21  ;;  %v10680_v21 = vmov %v10607_v36 }
 0x52b   : >> { %v7360_v29 = vpop.eup %7359  ;;  %v4290_v21 = vld [vmem:[%s8036_s24 + $0x38] sm:$0xff] (%p9852_p4) }
 0x52c   : >> { %v7362_v52 = vpop.eup %7361  ;;  %v4166_v43 = vadd.f32 1.0, %v7360_v29  ;;  %v10656_v29 = vmov %v10639_v15 }
 0x52d   : >> { %v4185_v48 = vadd.f32 1.0, %v7362_v52  ;;  %v10679_v52 = vmov %v10608_v39  ;;  %v4305_v29 = vld [vmem:[%s8036_s24 + $0xb0] sm:$0xff] (%p9852_p4) }
 0x52e   : >> { %7367 = vrcp.f32 %v4166_v43  ;;  %v4306_v52 = vld [vmem:[%s8036_s24 + $0xb8] sm:$0xff] (%p9852_p4) }
 0x52f   : >> { %v7364_v45 = vpop.eup %7363  ;;  %7369 = vrcp.f32 %v4185_v48  ;;  %v10663_v48 = vmov %v10618_v34 }
 0x530   : >> { %v4186_v17 = vadd.f32 1.0, %v7364_v45  ;;  %v10684_v45 = vld [vmem:[#allocation19_spill] sm:$0xff] }
 0x531   : > { %v4284_v45 = vld [vmem:[%s8036_s24 + $0x8] sm:$0xff] (%p9852_p4)  ;;  %v4291_v48 = vld [vmem:[%s8036_s24 + $0x40] sm:$0xff] (%p9852_p4) }
 0x532   : >> { %7371 = vrcp.f32 %v4186_v17  ;;  %v10655_v17 = vmov %v10641_v62 }
 0x533   : > { %v4292_v17 = vld [vmem:[%s8036_s24 + $0x48] sm:$0xff] (%p9852_p4) }
 0x537   : >> { %v7366_v22 = vpop.eup %7365 }
 0x538   : >> { %v4229_v31 = vmul.f32 %v7366_v22, %v3973_v13  ;;  %v10662_v13 = vmov %v10619_v25  ;;  %v10672_v22 = vmov %v10609_v14 }
 0x539   : > { %v4300_v13 = vld [vmem:[%s8036_s24 + $0x88] sm:$0xff] (%p9852_p4)  ;;  %v4307_v22 = vld [vmem:[%s8036_s24 + $0xc0] sm:$0xff] (%p9852_p4) }
 0x53a   : >> { %v9838_v49 = vadd.f32 %v10642_v1, %v4229_v31   ;;  %v7375_v31 = vld [vmem:[%s10563_s3] sm:$0xff] (%p9852_p4)  }
 0x53b   : >> { %v7368_v9 = vpop.eup %7367  ;;  %v4283_v1 = vld [vmem:[%s8036_s24] sm:$0xff] (%p9852_p4)  ;;  %6533 = vmatprep.subr.bf16.mxu0 (%p9852_p4), %v7375_v31  ;;  %6655 = vmatprep.subr.bf16.mxu1 (%p9852_p4), %v7375_v31 }
 0x53c   : >> { %v10643_v55 = vmov %v9838_v49  ;;  %v7370_v0 = vpop.eup %7369  ;;  %v4230_v46 = vmul.f32 %v7368_v9, %v3976_v59  ;;  %v10660_v59 = vmov %v10623_v27  ;;  %v10675_v9 = vmov %v10637_v38  ;;  %6534 = vmatpush3.bf16.msra.mxu0 (%p9852_p4), %v7375_v31  ;;  %6656 = vmatpush3.bf16.msra.mxu1 (%p9852_p4), %v7375_v31  ;;  %v4296_v31 = vld [vmem:[%s8036_s24 + $0x68] sm:$0xff] (%p9852_p4) }
 0x53d   : >> { %v4249_v63 = vmul.f32 %v7370_v0, %v4053_v56  ;;  %v10658_v56 = vmov %v10631_v8  ;;  %v10674_v49 = vmov %v10643_v55  ;;  %v10683_v0 = vld [vmem:[#allocation20_spill] sm:$0xff]  ;;  %v4285_v59 = vld [vmem:[%s8036_s24 + $0x10] sm:$0xff] (%p9852_p4) }
 0x53e   : >> { %v9841_v33 = vadd.f32 %v10644_v6, %v4230_v46   ;;  %v10670_v6 = vmov %v10611_v10  ;;  %v10671_v46 = vmov %v10610_v58  ;;  %v4315_v49 = vpack.c.bf16 (%p9852_p4), %v4284_v45, %v4283_v1  ;;  %v4286_v56 = vld [vmem:[%s8036_s24 + $0x18] sm:$0xff] (%p9852_p4)  ;;  %v4308_v9 = vld [vmem:[%s8036_s24 + $0xc8] sm:$0xff] (%p9852_p4)  ;;  %v4311_v1 = vld [vmem:[%s8036_s24 + $0xe0] sm:$0xff] (%p9852_p4) }
 0x53f   : >> { %v7372_v23 = vpop.eup %7371  ;;  %v9844_v18 = vadd.f32 %v10646_v50, %v4249_v63   ;;  %v10678_v50 = vmov %v10627_v42  ;;  %v4316_v60 = vpack.c.bf16 (%p9852_p4), %v4286_v56, %v4285_v59  ;;  %v4318_v0 = vpack.c.bf16 (%p9852_p4), %v4290_v21, %v4289_v26  ;;  %v4312_v45 = vld [vmem:[%s8036_s24 + $0xe8] sm:$0xff] (%p9852_p4) }
 0x540   : >> { %v10645_v28 = vmov %v9841_v33  ;;  %v4250_v35 = vmul.f32 %v7372_v23, %v4056_v5  ;;  %v10666_v23 = vmov %v10615_v2  ;;  %v10667_v5 = vmov %v10614_v24  ;;  %6535 = vmatprep.mubr.msk.bf16.mxu0 (%p9852_p4), %vm451_vm0, %v4315_v49  ;;  %v4309_v50 = vld [vmem:[%s8036_s24 + $0xd0] sm:$0xff] (%p9852_p4) }
 0x541   : >> { %v10647_v43 = vmov %v9844_v18  ;;  %v10673_v63 = vmov %v10645_v28  ;;  %v10682_v33 = vmov %v10605_v7  ;;  %903 = sbr.rel (!%p9852_p4) target bundleno = 298 (0x12a), region = 108  ;;  %v4303_v5 = vld [vmem:[%s8036_s24 + $0xa0] sm:$0xff] (%p9852_p4)  ;;  %6536 = vmatmul.mubr.msk.bf16.vlgmr.msra.gmra.mxu0 (%p9852_p4), %vm451_vm0, %v4316_v60  ;;  %v4326_v46 = vpack.c.bf16 (%p9852_p4), %v4306_v52, %v4305_v29  ;;  %v4294_v23 = vld [vmem:[%s8036_s24 + $0x58] sm:$0xff] (%p9852_p4) }
 0x542   : >> { %v9847_v41 = vadd.f32 %v10648_v30, %v4250_v35   ;;  %v10654_v18 = vmov %v10647_v43  ;;  %v10661_v30 = vmov %v10621_v40  ;;  %v10669_v35 = vmov %v10612_v61  ;;  %v4293_v33 = vld [vmem:[%s8036_s24 + $0x50] sm:$0xff] (%p9852_p4)  ;;  %v4298_v60 = vld [vmem:[%s8036_s24 + $0x78] sm:$0xff] (%p9852_p4) }
 0x543   : > { %v4304_v18 = vld [vmem:[%s8036_s24 + $0xa8] sm:$0xff] (%p9852_p4)  ;;  %v4319_v63 = vpack.c.bf16 (%p9852_p4), %v4292_v17, %v4291_v48  ;;  %v4327_v6 = vpack.c.bf16 (%p9852_p4), %v4308_v9, %v4307_v22  ;;  %v4310_v35 = vld [vmem:[%s8036_s24 + $0xd8] sm:$0xff] (%p9852_p4)  ;;  %v4295_v30 = vld [vmem:[%s8036_s24 + $0x60] sm:$0xff] (%p9852_p4)  ;;  %v4320_v49 = vpack.c.bf16 (%p9852_p4), %v4294_v23, %v4293_v33  ;;  %v4329_v56 = vpack.c.bf16 (%p9852_p4), %v4312_v45, %v4311_v1 }
 0x544   : >> { %10649 = vst [vmem:[#allocation21_spill] sm:$0xff] %v9847_v41  ;;  %v10652_v47 = vmov %v9847_v41  ;;  %v4325_v20 = vpack.c.bf16 (%p9852_p4), %v4304_v18, %v4303_v5  ;;  %v4321_v59 = vpack.c.bf16 (%p9852_p4), %v4296_v31, %v4295_v30  ;;  %v7376_v5 = vld [vmem:[%s10569_s9 + $0x8] sm:$0xff] (%p9852_p4)   ;;  %v10686_v18 = vld [vmem:[#allocation19_spill] sm:$0xff] (%p9852_p4)  ;;  %v4748_v26 = vpack.c.bf16 (%p9852_p4), %v10606_v12, %v10605_v7 }
 0x545   : >> { %v10653_v41 = vmov %v10652_v47  ;;  %v4299_v47 = vld [vmem:[%s8036_s24 + $0x80] sm:$0xff] (%p9852_p4)  ;;  %6567 = vmatprep.subr.bf16.mxu1 (%p9852_p4), %v7376_v5  ;;  %v4749_v21 = vpack.c.bf16 (%p9852_p4), %v10608_v39, %v10607_v36  ;;  %v4750_v29 = vpack.c.bf16 (%p9852_p4), %v10629_v19, %v10627_v42  ;;  %v4751_v52 = vpack.c.bf16 (%p9852_p4), %v10637_v38, %v10635_v32 }
 0x546   : > { %v4323_v57 = vpack.c.bf16 %v4300_v13, %v4299_v47  ;;  %v4288_v41 = vld [vmem:[%s8036_s24 + $0x28] sm:$0xff]  ;;  %v4328_v13 = vpack.c.bf16 %v4310_v35, %v4309_v50  ;;  %v4752_v7 = vpack.c.bf16 %v10645_v28, %v10643_v55  ;;  %v4753_v12 = vpack.c.bf16 %v10610_v58, %v10609_v14 }
 0x547   : > { %v4317_v47 = vpack.c.bf16 %v4288_v41, %v4287_v4  ;;  %v7377_v41 = vld [vmem:[%s10569_s9] sm:$0xff]   ;;  %v4754_v36 = vpack.c.bf16 %v10612_v61, %v10611_v10  ;;  %v4755_v39 = vpack.c.bf16 %v10614_v24, %v10613_v11  ;;  %v4756_v55 = vpack.c.bf16 %v10616_v16, %v10615_v2 }
 0x548   : > { %6551 = vmatprep.mubr.msk.bf16.mxu1 %vm451_vm0, %v4323_v57  ;;  %v4297_v57 = vld [vmem:[%s8036_s24 + $0x70] sm:$0xff]  ;;  %6601 = vmatprep.subr.bf16.mxu0 %v7377_v41  ;;  %v4757_v14 = vpack.c.bf16 %v10618_v34, %v10617_v37  ;;  %v4758_v58 = vpack.c.bf16 %v10621_v40, %v10619_v25  ;;  %v4759_v10 = vpack.c.bf16 %v10625_v53, %v10623_v27  ;;  %v10066_v16 = vld [vmem:[%s10564_s4] ss:$0 sm:$0xff] }
 0x549   : > { %6552 = vmatmul.mubr.msk.bf16.vlgmr.msra.gmra.mxu1 %vm451_vm0, %v4324_v51  ;;  %6539 = vmatprep.mubr.msk.bf16.mxu0 %vm451_vm0, %v4317_v47  ;;  %v4322_v4 = vpack.c.bf16 %v4298_v60, %v4297_v57  ;;  %v4330_v51 = vpack.c.bf16 %v4314_v54, %v4313_v44  ;;  %v10687_v47 = vld [vmem:[#allocation20_spill] sm:$0xff]  ;;  %v4760_v61 = vpack.c.bf16 %v10633_v3, %v10631_v8 }
 0x54a   : > { %6555 = vmatprep.mubr.msk.bf16.mxu1 %vm451_vm0, %v4325_v20  ;;  %6540 = vmatmul.mubr.msk.bf16.gmra.mxu0 %vm451_vm0, %v4318_v0  ;;  %v4747_v20 = vpack.c.bf16 %v10687_v47, %v10686_v18  ;;  %v4761_v11 = vpack.c.bf16 %v10641_v62, %v10639_v15 }
 0x54b   : > { %6543 = vmatprep.mubr.msk.bf16.mxu0 %vm451_vm0, %v4319_v63  ;;  %6602 = vmatpush3.bf16.msra.mxu0 %v7377_v41  ;;  %v10688_v24 = vld [vmem:[#allocation21_spill] sm:$0xff] }
 0x54c   : > { %6568 = vmatpush3.bf16.msra.mxu1 %v7376_v5  ;;  %v4762_v2 = vpack.c.bf16 %v10688_v24, %v10647_v43 }
 0x551   : > { %6556 = vmatmul.mubr.msk.bf16.gmra.mxu1 %vm451_vm0, %v4326_v46 }
 0x552   : > { %6559 = vmatprep.mubr.msk.bf16.mxu1 %vm451_vm0, %v4327_v6  ;;  %6544 = vmatmul.mubr.msk.bf16.gmra.mxu0 %vm451_vm0, %v4320_v49 }
 0x553   : > { %6547 = vmatprep.mubr.msk.bf16.mxu0 %vm451_vm0, %v4321_v59 }
 0x559   : > { %6560 = vmatmul.mubr.msk.bf16.gmra.mxu1 %vm451_vm0, %v4328_v13 }
 0x55a   : > { %6563 = vmatprep.mubr.msk.bf16.mxu1 %vm451_vm0, %v4329_v56  ;;  %6548 = vmatmul.mubr.msk.bf16.gmra.mxu0 %vm451_vm0, %v4322_v4 }
 0x55b   : > { %6603 = vmatprep.mubr.msk.bf16.mxu0 %vm451_vm0, %v4747_v20 }
 0x561   : > { %6564 = vmatmul.mubr.msk.bf16.gmra.mxu1 %vm451_vm0, %v4330_v51 }
 0x562   : > { %6604 = vmatmul.mubr.msk.bf16.vlgmr.msra.gmra.mxu0 %vm451_vm0, %v4748_v26 }
 0x563   : > { %6607 = vmatprep.mubr.msk.bf16.mxu0 %vm451_vm0, %v4749_v21 }
 0x56a   : > { %6608 = vmatmul.mubr.msk.bf16.gmra.mxu0 %vm451_vm0, %v4750_v29 }
 0x56b   : > { %6611 = vmatprep.mubr.msk.bf16.mxu0 %vm451_vm0, %v4751_v52 }
 0x572   : > { %6612 = vmatmul.mubr.msk.bf16.gmra.mxu0 %vm451_vm0, %v4752_v7 }
 0x573   : > { %6615 = vmatprep.mubr.msk.bf16.mxu0 %vm451_vm0, %v4753_v12 }
 0x57a   : > { %6616 = vmatmul.mubr.msk.bf16.gmra.mxu0 %vm451_vm0, %v4754_v36 }
 0x57b   : > { %6619 = vmatprep.mubr.msk.bf16.mxu0 %vm451_vm0, %v4755_v39 }
 0x582   : > { %6620 = vmatmul.mubr.msk.bf16.gmra.mxu0 %vm451_vm0, %v4756_v55 }
 0x583   : > { %6623 = vmatprep.mubr.msk.bf16.mxu0 %vm451_vm0, %v4757_v14 }
 0x58a   : > { %6624 = vmatmul.mubr.msk.bf16.gmra.mxu0 %vm451_vm0, %v4758_v58 }
 0x58b   : > { %6627 = vmatprep.mubr.msk.bf16.mxu0 %vm451_vm0, %v4759_v10 }
 0x592   : > { %6628 = vmatmul.mubr.msk.bf16.gmra.mxu0 %vm451_vm0, %v4760_v61 }
 0x593   : > { %6631 = vmatprep.mubr.msk.bf16.mxu0 %vm451_vm0, %v4761_v11 }
 0x59a   : > { %6632 = vmatmul.mubr.msk.bf16.gmra.mxu0 %vm451_vm0, %v4762_v2 }
 0x601   : > { %v6537_v37 = vpop.f32.mrf.mxu0 }
 0x602   : > { %v10071_v25 = vadd.f32 %v6537_v37, %v10066_v16 }
 0x603   : > { %v4428_v40 = vpop.f32.mrf.mxu0 }
 0x604   : > { %v4557_v53 = vsub.f32 0.0, %v10071_v25  ;;  %v10077_v42 = vadd.f32 %v10066_v16, %v4428_v40 }
 0x605   : > { %v6538_v19 = vpop.f32.mrf.mxu0 }
 0x606   : > { %v4591_v8 = vmul.f32 1.442695, %v4557_v53  ;;  %v4555_v3 = vsub.f32 0.0, %v10077_v42  ;;  %v10083_v38 = vadd.f32 %v6538_v19, %v10066_v16 }
 0x607   : > { %v4431_v15 = vpop.f32.mrf.mxu0 }
 0x608   : > { %v4587_v62 = vmul.f32 1.442695, %v4555_v3  ;;  %v10086_v28 = vadd.f32 %v10066_v16, %v4431_v15  ;;  %7378 = vpow2.f32 %v4591_v8  ;;  %v4558_v43 = vsub.f32 0.0, %v10083_v38 }
 0x609   : > { %v10068_v34 = vpop.f32.mrf.mxu1 }
 0x60a   : > { %v6541_v48 = vpop.f32.mrf.mxu0  ;;  %7380 = vpow2.f32 %v4587_v62  ;;  %v4556_v17 = vsub.f32 0.0, %v10086_v28  ;;  %v4593_v0 = vmul.f32 1.442695, %v4558_v43  ;;  %v10141_v62 = vadd.f32 %v10068_v34, %v10066_v16 }
 0x60b   : > { %v10073_v27 = vpop.f32.mrf.mxu1  ;;  %v10091_v9 = vadd.f32 %v6541_v48, %v10066_v16 }
 0x60c   : > { %v4444_v46 = vpop.f32.mrf.mxu0  ;;  %v4589_v63 = vmul.f32 1.442695, %v4556_v17  ;;  %7382 = vpow2.f32 %v4593_v0  ;;  %v10124_v10 = vadd.f32 %v10066_v16, %v10073_v27 }
 0x60d   : > { %v10080_v32 = vpop.f32.mrf.mxu1  ;;  %v4561_v6 = vsub.f32 0.0, %v10091_v9  ;;  %v10095_v33 = vadd.f32 %v10066_v16, %v4444_v46 }
 0x60e   : > { %v6542_v23 = vpop.f32.mrf.mxu0  ;;  %7384 = vpow2.f32 %v4589_v63  ;;  %v4571_v43 = vsub.f32 0.0, %v10124_v10  ;;  %v10146_v48 = vadd.f32 %v10080_v32, %v10066_v16 }
 0x60f   : > { %v4495_v22 = vpop.f32.mrf.mxu1  ;;  %v4599_v50 = vmul.f32 1.442695, %v4561_v6  ;;  %v4559_v30 = vsub.f32 0.0, %v10095_v33  ;;  %v10101_v31 = vadd.f32 %v6542_v23, %v10066_v16 }
 0x610   : > { %v4447_v1 = vpop.f32.mrf.mxu0  ;;  %v10131_v40 = vadd.f32 %v10066_v16, %v4495_v22 }
 0x611   : > { %v10097_v35 = vpop.f32.mrf.mxu1  ;;  %v4595_v45 = vmul.f32 1.442695, %v4559_v30  ;;  %v10104_v49 = vadd.f32 %v10066_v16, %v4447_v1  ;;  %v4562_v13 = vsub.f32 0.0, %v10101_v31  ;;  %7386 = vpow2.f32 %v4599_v50 }
 0x612   : > { %v6545_v59 = vpop.f32.mrf.mxu0  ;;  %v4572_v63 = vsub.f32 0.0, %v10131_v40  ;;  %v4619_v30 = vmul.f32 1.442695, %v4571_v43 }
 0x613   : > { %v10107_v56 = vpop.f32.mrf.mxu1  ;;  %v4560_v57 = vsub.f32 0.0, %v10104_v49  ;;  %7388 = vpow2.f32 %v4595_v45  ;;  %v4601_v60 = vmul.f32 1.442695, %v4562_v13  ;;  %v10115_v36 = vadd.f32 %v6545_v59, %v10066_v16 }
 0x614   : > { %v4460_v44 = vpop.f32.mrf.mxu0  ;;  %v4573_v13 = vsub.f32 0.0, %v10141_v62 }
 0x615   : > { %v4597_v54 = vmul.f32 1.442695, %v4560_v57  ;;  %7390 = vpow2.f32 %v4601_v60  ;;  %v7379_v51 = vpop.eup %7378  ;;  %v10110_v41 = vpop.f32.mrf.mxu1  ;;  %v10120_v55 = vadd.f32 %v10066_v16, %v4460_v44  ;;  %v4565_v24 = vsub.f32 0.0, %v10115_v36 }
 0x616   : > { %v6546_v4 = vpop.f32.mrf.mxu0  ;;  %v4653_v26 = vadd.f32 1.0, %v7379_v51  ;;  %v4574_v44 = vsub.f32 0.0, %v10146_v48 }
 0x617   : > { %v7381_v5 = vpop.eup %7380  ;;  %7392 = vpow2.f32 %v4597_v54  ;;  %v10112_v21 = vpop.f32.mrf.mxu1  ;;  %v10128_v2 = vadd.f32 %v6546_v4, %v10066_v16  ;;  %v4563_v19 = vsub.f32 0.0, %v10120_v55  ;;  %v4607_v0 = vmul.f32 1.442695, %v4565_v24 }
 0x618   : > { %v4651_v18 = vadd.f32 1.0, %v7381_v5  ;;  %v4463_v47 = vpop.f32.mrf.mxu0  ;;  %v4621_v54 = vmul.f32 1.442695, %v4572_v63 }
 0x619   : > { %v7383_v20 = vpop.eup %7382  ;;  %v10117_v39 = vpop.f32.mrf.mxu1  ;;  %v10137_v27 = vadd.f32 %v10066_v16, %v4463_v47  ;;  %v4566_v46 = vsub.f32 0.0, %v10128_v2  ;;  %v4603_v6 = vmul.f32 1.442695, %v4563_v19 }
 0x61a   : > { %v4654_v29 = vadd.f32 1.0, %v7383_v20  ;;  %7394 = vrcp.f32 %v4651_v18  ;;  %v6549_v7 = vpop.f32.mrf.mxu0  ;;  %v10167_v18 = vadd.f32 %v10097_v35, %v10066_v16 }
 0x61b   : > { %v7385_v52 = vpop.eup %7384  ;;  %v10134_v8 = vpop.f32.mrf.mxu1  ;;  %v10153_v34 = vadd.f32 %v6549_v7, %v10066_v16  ;;  %v4564_v32 = vsub.f32 0.0, %v10137_v27  ;;  %v4609_v59 = vmul.f32 1.442695, %v4566_v46  ;;  %v10176_v7 = vadd.f32 %v10066_v16, %v10107_v56 }
 0x61c   : > { %7396 = vrcp.f32 %v4654_v29  ;;  %v4652_v12 = vadd.f32 1.0, %v7385_v52  ;;  %v4476_v61 = vpop.f32.mrf.mxu0 }
 0x61d   : > { %7398 = vrcp.f32 %v4653_v26  ;;  %v10150_v23 = vpop.f32.mrf.mxu1  ;;  %v10157_v50 = vadd.f32 %v10066_v16, %v4476_v61  ;;  %v4569_v51 = vsub.f32 0.0, %v10153_v34  ;;  %v4605_v47 = vmul.f32 1.442695, %v4564_v32 }
 0x61e   : > { %v7387_v14 = vpop.eup %7386  ;;  %7400 = vrcp.f32 %v4652_v12  ;;  %v6550_v17 = vpop.f32.mrf.mxu0  ;;  %v10180_v12 = vadd.f32 %v10066_v16, %v10112_v21  ;;  %v4575_v43 = vsub.f32 0.0, %v10176_v7 }
 0x61f   : > { %v4657_v53 = vadd.f32 1.0, %v7387_v14  ;;  %v10161_v57 = vadd.f32 %v6550_v17, %v10066_v16  ;;  %v4527_v4 = vpop.f32.mrf.mxu1  ;;  %v4567_v20 = vsub.f32 0.0, %v10157_v50  ;;  %v4615_v56 = vmul.f32 1.442695, %v4569_v51 }
 0x620   : > { %v7389_v58 = vpop.eup %7388  ;;  %v4479_v1 = vpop.f32.mrf.mxu0  ;;  %v4576_v19 = vsub.f32 0.0, %v10180_v12 }
 0x621   : > { %v4655_v11 = vadd.f32 1.0, %v7389_v58  ;;  %v10171_v26 = vadd.f32 %v10066_v16, %v4479_v1  ;;  %v4570_v58 = vsub.f32 0.0, %v10161_v57  ;;  %v4611_v21 = vmul.f32 1.442695, %v4567_v20 }
 0x622   : > { %v7391_v37 = vpop.eup %7390 }
 0x623   : > { %v4658_v3 = vadd.f32 1.0, %v7391_v37  ;;  %7402 = vrcp.f32 %v4655_v11  ;;  %v10190_v11 = vpop.f32.mrf.mxu1  ;;  %v4568_v24 = vsub.f32 0.0, %v10171_v26  ;;  %v4623_v37 = vmul.f32 1.442695, %v4573_v13 }
 0x624   : > { %v7393_v15 = vpop.eup %7392  ;;  %v10203_v13 = vadd.f32 %v10066_v16, %v4527_v4 }
 0x625   : > { %7404 = vrcp.f32 %v4658_v3  ;;  %v4656_v22 = vadd.f32 1.0, %v7393_v15  ;;  %v4617_v3 = vmul.f32 1.442695, %v4570_v58  ;;  %v4625_v15 = vmul.f32 1.442695, %v4574_v44  ;;  %v4540_v17 = vpop.f32.mrf.mxu1 }
 0x626   : > { %7406 = vrcp.f32 %v4657_v53  ;;  %v4577_v53 = vsub.f32 0.0, %v10167_v18  ;;  %v4613_v46 = vmul.f32 1.442695, %v4568_v24  ;;  %v4627_v44 = vmul.f32 1.442695, %v4575_v43 }
 0x627   : > { %7408 = vrcp.f32 %v4656_v22  ;;  %v7395_v45 = vpop.eup %7394  ;;  %v4580_v20 = vsub.f32 0.0, %v10203_v13 }
 0x628   : > { %7410 = vpow2.f32 %v4607_v0  ;;  %v4715_v35 = vmul.f32 %v7395_v45, %v10077_v42 }
 0x629   : > { %v7397_v60 = vpop.eup %7396  ;;  %7412 = vpow2.f32 %v4603_v6  ;;  %v4631_v6 = vmul.f32 1.442695, %v4577_v53  ;;  %v4637_v24 = vmul.f32 1.442695, %v4580_v20 }
 0x62a   : > { %v7399_v5 = vpop.eup %7398  ;;  %7414 = vpow2.f32 %v4619_v30  ;;  %v4718_v52 = vmul.f32 %v7397_v60, %v10083_v38  ;;  %v10188_v38 = vadd.f32 %v10110_v41, %v10066_v16  ;;  %v4629_v30 = vmul.f32 1.442695, %v4576_v19 }
 0x62b   : > { %v7401_v29 = vpop.eup %7400  ;;  %7416 = vpow2.f32 %v4609_v59  ;;  %v4717_v61 = vmul.f32 %v7399_v5, %v10071_v25 }
 0x62c   : > { %v4716_v14 = vmul.f32 %v7401_v29, %v10086_v28  ;;  %7418 = vpow2.f32 %v4621_v54  ;;  %v4578_v0 = vsub.f32 0.0, %v10188_v38  ;;  %v6566_v54 = vpop.f32.mrf.mxu1 }
 0x62d   : > { %7420 = vpow2.f32 %v4605_v47  ;;  %v4766_v28 = vpack.c.bf16 %v4718_v52, %v4717_v61 }
 0x62e   : > { %v4765_v42 = vpack.c.bf16 %v4716_v14, %v4715_v35  ;;  %7422 = vpow2.f32 %v4615_v56  ;;  %v4633_v5 = vmul.f32 1.442695, %v4578_v0  ;;  %v4543_v52 = vpop.f32.mrf.mxu1  ;;  %v10216_v56 = vadd.f32 %v10150_v23, %v10066_v16 }
 0x62f   : > { %7424 = vpow2.f32 %v4611_v21 }
 0x630   : > { %v7403_v25 = vpop.eup %7402  ;;  %6569 = vmatprep.mubr.msk.bf16.mxu1 %vm451_vm0, %v4765_v42  ;;  %7426 = vpow2.f32 %v4623_v37  ;;  %v10219_v42 = vadd.f32 %v10066_v16, %v4543_v52 }
 0x631   : > { %6570 = vmatmul.mubr.msk.bf16.vlgmr.msra.gmra.mxu1 %vm451_vm0, %v4766_v28  ;;  %v4719_v1 = vmul.f32 %v7403_v25, %v10095_v33  ;;  %7428 = vpow2.f32 %v4617_v3  ;;  %v10223_v28 = vadd.f32 %v10117_v39, %v10066_v16  ;;  %v10226_v25 = vadd.f32 %v10066_v16, %v4540_v17 }
 0x632   : > { %v7405_v41 = vpop.eup %7404  ;;  %7430 = vpow2.f32 %v4625_v15  ;;  %v4582_v3 = vsub.f32 0.0, %v10216_v56  ;;  %v4584_v43 = vsub.f32 0.0, %v10219_v42 }
 0x633   : > { %v7407_v22 = vpop.eup %7406  ;;  %v4722_v32 = vmul.f32 %v7405_v41, %v10101_v31  ;;  %v10208_v31 = vadd.f32 %v10066_v16, %v10134_v8  ;;  %7432 = vpow2.f32 %v4613_v46  ;;  %v4581_v39 = vsub.f32 0.0, %v10223_v28 }
 0x634   : > { %v7409_v63 = vpop.eup %7408  ;;  %v4721_v60 = vmul.f32 %v7407_v22, %v10091_v9  ;;  %7434 = vpow2.f32 %v4631_v6 }
 0x635   : > { %v4720_v45 = vmul.f32 %v7409_v63, %v10104_v49  ;;  %v7411_v59 = vpop.eup %7410  ;;  %7436 = vpow2.f32 %v4629_v30  ;;  %v4579_v8 = vsub.f32 0.0, %v10208_v31  ;;  %v4583_v63 = vsub.f32 0.0, %v10226_v25 }
 0x636   : > { %v7413_v51 = vpop.eup %7412  ;;  %v4768_v47 = vpack.c.bf16 %v4722_v32, %v4721_v60  ;;  %7438 = vpow2.f32 %v4627_v44  ;;  %v4661_v29 = vadd.f32 1.0, %v7411_v59  ;;  %v4641_v32 = vmul.f32 1.442695, %v4582_v3 }
 0x637   : > { %v4767_v33 = vpack.c.bf16 %v4720_v45, %v4719_v1  ;;  %v4659_v49 = vadd.f32 1.0, %v7413_v51  ;;  %v7415_v4 = vpop.eup %7414  ;;  %7440 = vpow2.f32 %v4633_v5  ;;  %v4635_v19 = vmul.f32 1.442695, %v4579_v8 }
 0x638   : > { %v7417_v9 = vpop.eup %7416  ;;  %v4667_v61 = vadd.f32 1.0, %v7415_v4  ;;  %v10233_v30 = vadd.f32 %v6566_v54, %v10066_v16  ;;  %v4645_v59 = vmul.f32 1.442695, %v4584_v43  ;;  %v4639_v44 = vmul.f32 1.442695, %v4581_v39 }
 0x639   : > { %6573 = vmatprep.mubr.msk.bf16.mxu1 %vm451_vm0, %v4767_v33  ;;  %v7419_v35 = vpop.eup %7418  ;;  %v4662_v14 = vadd.f32 1.0, %v7417_v9  ;;  %7442 = vrcp.f32 %v4659_v49  ;;  %v10237_v51 = vadd.f32 %v10190_v11, %v10066_v16  ;;  %v4643_v33 = vmul.f32 1.442695, %v4583_v63 }
 0x63a   : > { %6574 = vmatmul.mubr.msk.bf16.gmra.mxu1 %vm451_vm0, %v4768_v47  ;;  %v7421_v58 = vpop.eup %7420  ;;  %v4668_v37 = vadd.f32 1.0, %v7419_v35  ;;  %v4586_v54 = vsub.f32 0.0, %v10233_v30 }
 0x63b   : > { %7444 = vrcp.f32 %v4662_v14  ;;  %v4660_v21 = vadd.f32 1.0, %v7421_v58  ;;  %v7423_v53 = vpop.eup %7422  ;;  %v4585_v52 = vsub.f32 0.0, %v10237_v51 }
 0x63c   : > { %7446 = vrcp.f32 %v4661_v29  ;;  %v7425_v23 = vpop.eup %7424  ;;  %v4665_v0 = vadd.f32 1.0, %v7423_v53  ;;  %v4649_v14 = vmul.f32 1.442695, %v4586_v54 }
 0x63d   : > { %7448 = vrcp.f32 %v4660_v21  ;;  %v7427_v41 = vpop.eup %7426  ;;  %v4663_v15 = vadd.f32 1.0, %v7425_v23  ;;  %v4647_v53 = vmul.f32 1.442695, %v4585_v52 }
 0x63e   : > { %7450 = vrcp.f32 %v4667_v61  ;;  %v7429_v22 = vpop.eup %7428  ;;  %v4669_v29 = vadd.f32 1.0, %v7427_v41 }
 0x63f   : > { %7452 = vpow2.f32 %v4637_v24  ;;  %v7431_v46 = vpop.eup %7430  ;;  %v4666_v17 = vadd.f32 1.0, %v7429_v22 }
 0x640   : > { %7454 = vrcp.f32 %v4668_v37  ;;  %v7433_v6 = vpop.eup %7432  ;;  %v4670_v47 = vadd.f32 1.0, %v7431_v46 }
 0x641   : > { %7456 = vpow2.f32 %v4635_v19  ;;  %v7435_v1 = vpop.eup %7434  ;;  %v4664_v45 = vadd.f32 1.0, %v7433_v6 }
 0x642   : > { %7458 = vrcp.f32 %v4663_v15  ;;  %v7437_v60 = vpop.eup %7436 }
 0x643   : > { %7460 = vrcp.f32 %v4666_v17  ;;  %v7439_v5 = vpop.eup %7438  ;;  %v4672_v20 = vadd.f32 1.0, %v7437_v60 }
 0x644   : > { %7462 = vrcp.f32 %v4665_v0  ;;  %v7441_v49 = vpop.eup %7440  ;;  %v4671_v8 = vadd.f32 1.0, %v7439_v5 }
 0x645   : > { %7464 = vrcp.f32 %v4664_v45  ;;  %v4674_v41 = vadd.f32 1.0, %v7441_v49 }
 0x646   : > { %7466 = vpow2.f32 %v4641_v32  ;;  %v7443_v4 = vpop.eup %7442 }
 0x647   : > { %7468 = vpow2.f32 %v4645_v59  ;;  %v4723_v61 = vmul.f32 %v7443_v4, %v10120_v55  ;;  %v4673_v55 = vadd.f32 1.0, %v7435_v1 }
 0x648   : > { %v7445_v9 = vpop.eup %7444  ;;  %7470 = vpow2.f32 %v4639_v44 }
 0x649   : > { %v7447_v35 = vpop.eup %7446  ;;  %7472 = vpow2.f32 %v4643_v33  ;;  %v4726_v11 = vmul.f32 %v7445_v9, %v10128_v2 }
 0x64a   : > { %v7449_v16 = vpop.eup %7448  ;;  %7474 = vrcp.f32 %v4670_v47  ;;  %v4725_v37 = vmul.f32 %v7447_v35, %v10115_v36 }
 0x64b   : > { %v7451_v58 = vpop.eup %7450  ;;  %7476 = vrcp.f32 %v4672_v20  ;;  %v4724_v21 = vmul.f32 %v7449_v16, %v10137_v27 }
 0x64c   : > { %v7453_v24 = vpop.eup %7452  ;;  %7478 = vrcp.f32 %v4669_v29  ;;  %v4770_v15 = vpack.c.bf16 %v4726_v11, %v4725_v37  ;;  %v4731_v59 = vmul.f32 %v7451_v58, %v10124_v10 }
 0x64d   : > { %v7455_v19 = vpop.eup %7454  ;;  %7480 = vrcp.f32 %v4671_v8  ;;  %v4769_v23 = vpack.c.bf16 %v4724_v21, %v4723_v61  ;;  %v4676_v43 = vadd.f32 1.0, %v7453_v24 }
 0x64e   : > { %v7457_v3 = vpop.eup %7456  ;;  %7482 = vpow2.f32 %v4649_v14  ;;  %v4732_v63 = vmul.f32 %v7455_v19, %v10131_v40 }
 0x64f   : > { %v7459_v2 = vpop.eup %7458  ;;  %6577 = vmatprep.mubr.msk.bf16.mxu1 %vm451_vm0, %v4769_v23  ;;  %7484 = vpow2.f32 %v4647_v53  ;;  %v4675_v39 = vadd.f32 1.0, %v7457_v3 }
 0x650   : > { %v7461_v22 = vpop.eup %7460  ;;  %6578 = vmatmul.mubr.msk.bf16.gmra.mxu1 %vm451_vm0, %v4770_v15  ;;  %7486 = vrcp.f32 %v4674_v41  ;;  %v4727_v17 = vmul.f32 %v7459_v2, %v10157_v50  ;;  %v4773_v40 = vpack.c.bf16 %v4732_v63, %v4731_v59 }
 0x651   : > { %v7463_v27 = vpop.eup %7462  ;;  %v4730_v0 = vmul.f32 %v7461_v22, %v10161_v57  ;;  %7488 = vrcp.f32 %v4676_v43 }
 0x652   : > { %v7465_v36 = vpop.eup %7464  ;;  %7490 = vrcp.f32 %v4673_v55  ;;  %v4729_v1 = vmul.f32 %v7463_v27, %v10153_v34 }
 0x653   : > { %v7467_v46 = vpop.eup %7466  ;;  %v4728_v6 = vmul.f32 %v7465_v36, %v10171_v26  ;;  %7492 = vrcp.f32 %v4675_v39 }
 0x654   : > { %v7469_v32 = vpop.eup %7468  ;;  %v4678_v5 = vadd.f32 1.0, %v7467_v46  ;;  %v4772_v57 = vpack.c.bf16 %v4730_v0, %v4729_v1 }
 0x655   : > { %v7471_v45 = vpop.eup %7470  ;;  %v4771_v60 = vpack.c.bf16 %v4728_v6, %v4727_v17  ;;  %v4680_v49 = vadd.f32 1.0, %v7469_v32  ;;  %v10288_v32 = vld [vmem:[%s10570_s10] ss:$0 sm:$0xff] }
 0x656   : > { %v7473_v44 = vpop.eup %7472  ;;  %v4677_v47 = vadd.f32 1.0, %v7471_v45  ;;  %7494 = vrcp.f32 %v4678_v5 }
 0x657   : > { %v7475_v33 = vpop.eup %7474  ;;  %6581 = vmatprep.mubr.msk.bf16.mxu1 %vm451_vm0, %v4771_v60  ;;  %v4679_v54 = vadd.f32 1.0, %v7473_v44  ;;  %7496 = vrcp.f32 %v4680_v49 }
 0x658   : > { %v7477_v50 = vpop.eup %7476  ;;  %6582 = vmatmul.mubr.msk.bf16.gmra.mxu1 %vm451_vm0, %v4772_v57  ;;  %v4734_v10 = vmul.f32 %v7475_v33, %v10146_v48  ;;  %7498 = vrcp.f32 %v4677_v47 }
 0x659   : > { %v7479_v26 = vpop.eup %7478  ;;  %6585 = vmatprep.mubr.msk.bf16.mxu1 %vm451_vm0, %v4773_v40  ;;  %v4736_v20 = vmul.f32 %v7477_v50, %v10180_v12  ;;  %7500 = vrcp.f32 %v4679_v54 }
 0x65a   : > { %v7481_v34 = vpop.eup %7480  ;;  %v4733_v9 = vmul.f32 %v7479_v26, %v10141_v62 }
 0x65b   : > { %v7483_v4 = vpop.eup %7482  ;;  %v4735_v52 = vmul.f32 %v7481_v34, %v10176_v7 }
 0x65c   : > { %v7485_v29 = vpop.eup %7484  ;;  %v4682_v35 = vadd.f32 1.0, %v7483_v4  ;;  %v4774_v8 = vpack.c.bf16 %v4734_v10, %v4733_v9 }
 0x65d   : > { %v7487_v16 = vpop.eup %7486  ;;  %v4775_v11 = vpack.c.bf16 %v4736_v20, %v4735_v52  ;;  %v4681_v58 = vadd.f32 1.0, %v7485_v29 }
 0x65e   : > { %v7489_v14 = vpop.eup %7488  ;;  %v4738_v61 = vmul.f32 %v7487_v16, %v10188_v38  ;;  %7502 = vrcp.f32 %v4682_v35 }
 0x65f   : > { %v7491_v48 = vpop.eup %7490  ;;  %v4740_v62 = vmul.f32 %v7489_v14, %v10203_v13  ;;  %7504 = vrcp.f32 %v4681_v58 }
 0x660   : > { %6586 = vmatmul.mubr.msk.bf16.gmra.mxu1 %vm451_vm0, %v4774_v8  ;;  %v7493_v12 = vpop.eup %7492  ;;  %v4737_v7 = vmul.f32 %v7491_v48, %v10167_v18 }
 0x661   : > { %6589 = vmatprep.mubr.msk.bf16.mxu1 %vm451_vm0, %v4775_v11  ;;  %v4739_v21 = vmul.f32 %v7493_v12, %v10208_v31 }
 0x662   : > { %v4776_v24 = vpack.c.bf16 %v4738_v61, %v4737_v7 }
 0x663   : > { %v7495_v37 = vpop.eup %7494  ;;  %v4777_v53 = vpack.c.bf16 %v4740_v62, %v4739_v21 }
 0x664   : > { %v7497_v19 = vpop.eup %7496  ;;  %v4742_v38 = vmul.f32 %v7495_v37, %v10216_v56  ;;  %v6605_v56 = vpop.f32.mrf.mxu0 }
 0x665   : > { %v7499_v23 = vpop.eup %7498  ;;  %v4744_v41 = vmul.f32 %v7497_v19, %v10219_v42 }
 0x666   : > { %v7501_v3 = vpop.eup %7500  ;;  %v4741_v13 = vmul.f32 %v7499_v23, %v10223_v28  ;;  %v5086_v42 = vpop.f32.mrf.mxu0 }
 0x667   : > { %v4743_v18 = vmul.f32 %v7501_v3, %v10226_v25 }
 0x668   : > { %6590 = vmatmul.mubr.msk.bf16.gmra.mxu1 %vm451_vm0, %v4776_v24  ;;  %v4778_v15 = vpack.c.bf16 %v4742_v38, %v4741_v13  ;;  %v6606_v28 = vpop.f32.mrf.mxu0 }
 0x669   : > { %6593 = vmatprep.mubr.msk.bf16.mxu1 %vm451_vm0, %v4777_v53  ;;  %v4779_v2 = vpack.c.bf16 %v4744_v41, %v4743_v18 }
 0x66a   : > { %v5089_v39 = vpop.f32.mrf.mxu0 }
 0x66b   : > { %v7503_v31 = vpop.eup %7502 }
 0x66c   : > { %v7505_v43 = vpop.eup %7504  ;;  %v4746_v22 = vmul.f32 %v7503_v31, %v10233_v30  ;;  %v6609_v25 = vpop.f32.mrf.mxu0 }
 0x66d   : > { %v4745_v55 = vmul.f32 %v7505_v43, %v10237_v51 }
 0x66e   : > { %v5102_v36 = vpop.f32.mrf.mxu0 }
 0x66f   : > { %v4780_v27 = vpack.c.bf16 %v4746_v22, %v4745_v55 }
 0x670   : > { %6594 = vmatmul.mubr.msk.bf16.gmra.mxu1 %vm451_vm0, %v4778_v15  ;;  %v6610_v0 = vpop.f32.mrf.mxu0 }
 0x671   : > { %6597 = vmatprep.mubr.msk.bf16.mxu1 %vm451_vm0, %v4779_v2 }
 0x672   : > { %v5105_v46 = vpop.f32.mrf.mxu0 }
 0x674   : > { %v10277_v63 = vpop.f32.mrf.mxu0 }
 0x676   : > { %v10279_v17 = vpop.f32.mrf.mxu0 }
 0x678   : > { %6598 = vmatmul.mubr.msk.bf16.gmra.mxu1 %vm451_vm0, %v4780_v27  ;;  %v10281_v6 = vpop.f32.mrf.mxu0 }
 0x67a   : > { %v10283_v30 = vpop.f32.mrf.mxu0 }
 0x67c   : > { %v10293_v44 = vpop.f32.mrf.mxu0 }
 0x67e   : > { %v10303_v34 = vpop.f32.mrf.mxu0 }
 0x680   : > { %v10310_v11 = vpop.f32.mrf.mxu0 }
 0x682   : > { %v10323_v53 = vpop.f32.mrf.mxu0 }
 0x684   : > { %v10330_v18 = vpop.f32.mrf.mxu0 }
 0x686   : > { %v10332_v43 = vpop.f32.mrf.mxu0 }
 0x6f1   : > { %v6571_v51 = vpop.f32.mrf.mxu1 }
 0x6f2   : > { %v5095_v1 = vadd.f32 %v6605_v56, %v6571_v51 }
 0x6f3   : > { %v4871_v45 = vpop.f32.mrf.mxu1 }
 0x6f4   : > { %v10291_v59 = vadd.f32 %v10288_v32, %v5095_v1  ;;  %v5087_v60 = vadd.f32 %v5086_v42, %v4871_v45  ;;  %v10334_v42 = vpop.f32.mrf.mxu0 }
 0x6f5   : > { %v6572_v5 = vpop.f32.mrf.mxu1 }
 0x6f6   : > { %v5254_v57 = vsub.f32 0.0, %v10291_v59  ;;  %v10297_v33 = vadd.f32 %v10288_v32, %v5087_v60  ;;  %v5098_v49 = vadd.f32 %v6606_v28, %v6572_v5 }
 0x6f7   : > { %v4874_v40 = vpop.f32.mrf.mxu1 }
 0x6f8   : > { %v5288_v50 = vmul.f32 1.442695, %v5254_v57  ;;  %v5252_v47 = vsub.f32 0.0, %v10297_v33  ;;  %v10301_v26 = vadd.f32 %v10288_v32, %v5098_v49  ;;  %v5090_v54 = vadd.f32 %v5089_v39, %v4874_v40 }
 0x6fa   : > { %v6575_v10 = vpop.f32.mrf.mxu1  ;;  %7506 = vpow2.f32 %v5288_v50  ;;  %v5284_v4 = vmul.f32 1.442695, %v5252_v47  ;;  %v5255_v20 = vsub.f32 0.0, %v10301_v26  ;;  %v10307_v9 = vadd.f32 %v10288_v32, %v5090_v54 }
 0x6fb   : > { %v5111_v29 = vadd.f32 %v6609_v25, %v6575_v10 }
 0x6fc   : > { %v4887_v52 = vpop.f32.mrf.mxu1  ;;  %7508 = vpow2.f32 %v5284_v4  ;;  %v5290_v35 = vmul.f32 1.442695, %v5255_v20  ;;  %v5253_v8 = vsub.f32 0.0, %v10307_v9 }
 0x6fd   : > { %v5103_v16 = vadd.f32 %v5102_v36, %v4887_v52  ;;  %v10313_v14 = vadd.f32 %v10288_v32, %v5111_v29  ;;  %v10336_v36 = vpop.f32.mrf.mxu0 }
 0x6fe   : > { %v6576_v58 = vpop.f32.mrf.mxu1  ;;  %7510 = vpow2.f32 %v5290_v35  ;;  %v5286_v48 = vmul.f32 1.442695, %v5253_v8 }
 0x6ff   : > { %v10316_v12 = vadd.f32 %v10288_v32, %v5103_v16  ;;  %v5114_v61 = vadd.f32 %v6610_v0, %v6576_v58  ;;  %v5258_v62 = vsub.f32 0.0, %v10313_v14  ;;  %v10343_v50 = vpop.f32.mrf.mxu0 }
 0x700   : > { %v4890_v7 = vpop.f32.mrf.mxu1  ;;  %7512 = vpow2.f32 %v5286_v48 }
 0x701   : > { %v5256_v21 = vsub.f32 0.0, %v10316_v12  ;;  %v10321_v24 = vadd.f32 %v10288_v32, %v5114_v61  ;;  %v5106_v37 = vadd.f32 %v5105_v46, %v4890_v7  ;;  %v5296_v19 = vmul.f32 1.442695, %v5258_v62  ;;  %v10352_v16 = vpop.f32.mrf.mxu0 }
 0x703   : > { %v5292_v23 = vmul.f32 1.442695, %v5256_v21  ;;  %v5259_v3 = vsub.f32 0.0, %v10321_v24  ;;  %v10327_v38 = vadd.f32 %v10288_v32, %v5106_v37  ;;  %7514 = vpow2.f32 %v5296_v19 }
 0x705   : > { %7516 = vpow2.f32 %v5292_v23  ;;  %v5298_v41 = vmul.f32 1.442695, %v5259_v3  ;;  %v5257_v13 = vsub.f32 0.0, %v10327_v38 }
 0x707   : > { %7518 = vpow2.f32 %v5298_v41  ;;  %v5294_v15 = vmul.f32 1.442695, %v5257_v13  ;;  %v7507_v31 = vpop.eup %7506  ;;  %v10373_v41 = vpop.f32.mrf.mxu0 }
 0x708   : > { %v5350_v2 = vadd.f32 1.0, %v7507_v31 }
 0x709   : > { %7520 = vpow2.f32 %v5294_v15  ;;  %v7509_v22 = vpop.eup %7508 }
 0x70a   : > { %7522 = vrcp.f32 %v5350_v2  ;;  %v5348_v55 = vadd.f32 1.0, %v7509_v22 }
 0x70b   : > { %v7511_v27 = vpop.eup %7510 }
 0x70c   : > { %7524 = vrcp.f32 %v5348_v55  ;;  %v5351_v56 = vadd.f32 1.0, %v7511_v27 }
 0x70d   : > { %v7513_v28 = vpop.eup %7512 }
 0x70e   : > { %7526 = vrcp.f32 %v5351_v56  ;;  %v5349_v39 = vadd.f32 1.0, %v7513_v28 }
 0x710   : > { %v7515_v25 = vpop.eup %7514  ;;  %7528 = vrcp.f32 %v5349_v39  ;;  %v6579_v51 = vpop.f32.mrf.mxu1 }
 0x711   : > { %v5354_v46 = vadd.f32 1.0, %v7515_v25  ;;  %v5127_v45 = vadd.f32 %v10277_v63, %v6579_v51 }
 0x712   : > { %v7517_v0 = vpop.eup %7516  ;;  %v4903_v5 = vpop.f32.mrf.mxu1 }
 0x713   : > { %v5352_v1 = vadd.f32 1.0, %v7517_v0  ;;  %7530 = vrcp.f32 %v5354_v46  ;;  %v10340_v49 = vadd.f32 %v10288_v32, %v5127_v45  ;;  %v5119_v40 = vadd.f32 %v10279_v17, %v4903_v5  ;;  %v10391_v0 = vpop.f32.mrf.mxu0 }
 0x714   : > { %v7519_v60 = vpop.eup %7518  ;;  %v6580_v54 = vpop.f32.mrf.mxu1 }
 0x715   : > { %7532 = vrcp.f32 %v5352_v1  ;;  %v5355_v57 = vadd.f32 1.0, %v7519_v60  ;;  %v5262_v4 = vsub.f32 0.0, %v10340_v49  ;;  %v10347_v63 = vadd.f32 %v10288_v32, %v5119_v40 }
 0x716   : > { %v7521_v47 = vpop.eup %7520  ;;  %v5130_v29 = vadd.f32 %v10281_v6, %v6580_v54  ;;  %v4906_v52 = vpop.f32.mrf.mxu1 }
 0x717   : > { %7534 = vrcp.f32 %v5355_v57  ;;  %v5353_v10 = vadd.f32 1.0, %v7521_v47  ;;  %v7523_v20 = vpop.eup %7522  ;;  %v5304_v17 = vmul.f32 1.442695, %v5262_v4  ;;  %v5260_v8 = vsub.f32 0.0, %v10347_v63  ;;  %v10406_v54 = vpop.f32.mrf.mxu0 }
 0x718   : > { %v5414_v35 = vmul.f32 %v7523_v20, %v10291_v59  ;;  %v10355_v48 = vadd.f32 %v10288_v32, %v5130_v29  ;;  %v5122_v61 = vadd.f32 %v10283_v30, %v4906_v52  ;;  %v6583_v62 = vpop.f32.mrf.mxu1 }
 0x719   : > { %7536 = vrcp.f32 %v5353_v10  ;;  %v7525_v58 = vpop.eup %7524  ;;  %v5300_v59 = vmul.f32 1.442695, %v5260_v8  ;;  %v5143_v7 = vadd.f32 %v10293_v44, %v6583_v62 }
 0x71a   : > { %5447 = vst.msk [vmem:[%s8041_s27 + $0x10] sm:$0xff] %vm5444_vm10, %v5414_v35  ;;  %v5412_v6 = vmul.f32 %v7525_v58, %v10297_v33  ;;  %7538 = vpow2.f32 %v5304_v17  ;;  %v5263_v37 = vsub.f32 0.0, %v10355_v48  ;;  %v10364_v19 = vadd.f32 %v10288_v32, %v5122_v61  ;;  %v4919_v23 = vpop.f32.mrf.mxu1 }
 0x71b   : > { %v7527_v21 = vpop.eup %7526  ;;  %7540 = vpow2.f32 %v5300_v59  ;;  %v10370_v3 = vadd.f32 %v10288_v32, %v5143_v7  ;;  %v5135_v33 = vadd.f32 %v10303_v34, %v4919_v23 }
 0x71c   : > { %5445 = vst.msk [vmem:[%s8041_s27] sm:$0xff] %vm5444_vm10, %v5412_v6  ;;  %v5415_v30 = vmul.f32 %v7527_v21, %v10301_v26  ;;  %v5306_v13 = vmul.f32 1.442695, %v5263_v37  ;;  %v5261_v15 = vsub.f32 0.0, %v10364_v19  ;;  %v6584_v31 = vpop.f32.mrf.mxu1  ;;  %v5182_v6 = vpop.f32.mrf.mxu0 }
 0x71d   : > { %v7529_v44 = vpop.eup %7528  ;;  %v5266_v26 = vsub.f32 0.0, %v10370_v3  ;;  %v10381_v22 = vadd.f32 %v10288_v32, %v5135_v33  ;;  %v5146_v55 = vadd.f32 %v10310_v11, %v6584_v31 }
 0x71e   : > { %5448 = vst.msk [vmem:[%s8041_s27 + $0x18] sm:$0xff] %vm5444_vm10, %v5415_v30  ;;  %v5413_v2 = vmul.f32 %v7529_v44, %v10307_v9  ;;  %7542 = vpow2.f32 %v5306_v13  ;;  %v5302_v34 = vmul.f32 1.442695, %v5261_v15  ;;  %v4922_v27 = vpop.f32.mrf.mxu1  ;;  %v6630_v31 = vpop.f32.mrf.mxu0 }
 0x71f   : > { %v5312_v28 = vmul.f32 1.442695, %v5266_v26  ;;  %v5264_v39 = vsub.f32 0.0, %v10381_v22  ;;  %v10388_v25 = vadd.f32 %v10288_v32, %v5146_v55  ;;  %v5138_v9 = vadd.f32 %v10323_v53, %v4922_v27 }
 0x720   : > { %v7531_v56 = vpop.eup %7530  ;;  %5446 = vst.msk [vmem:[%s8041_s27 + $0x8] sm:$0xff] %vm5444_vm10, %v5413_v2  ;;  %7544 = vpow2.f32 %v5302_v34  ;;  %v6587_v51 = vpop.f32.mrf.mxu1 }
 0x721   : > { %v5418_v11 = vmul.f32 %v7531_v56, %v10313_v14  ;;  %7546 = vpow2.f32 %v5312_v28  ;;  %v5308_v45 = vmul.f32 1.442695, %v5264_v39  ;;  %v5267_v60 = vsub.f32 0.0, %v10388_v25 }
 0x722   : > { %v7533_v46 = vpop.eup %7532  ;;  %v10399_v57 = vadd.f32 %v10288_v32, %v5138_v9  ;;  %v5159_v53 = vadd.f32 %v10330_v18, %v6587_v51  ;;  %v4935_v40 = vpop.f32.mrf.mxu1 }
 0x723   : > { %v5416_v1 = vmul.f32 %v7533_v46, %v10316_v12  ;;  %5451 = vst.msk [vmem:[%s8041_s27 + $0x30] sm:$0xff] %vm5444_vm10, %v5418_v11  ;;  %7548 = vpow2.f32 %v5308_v45  ;;  %v5314_v12 = vmul.f32 1.442695, %v5267_v60  ;;  %v5151_v47 = vadd.f32 %v10332_v43, %v4935_v40  ;;  %v5185_v60 = vpop.f32.mrf.mxu0 }
 0x724   : > { %v7535_v5 = vpop.eup %7534  ;;  %v5265_v4 = vsub.f32 0.0, %v10399_v57  ;;  %v10410_v20 = vadd.f32 %v10288_v32, %v5159_v53  ;;  %v6588_v29 = vpop.f32.mrf.mxu1 }
 0x725   : > { %5449 = vst.msk [vmem:[%s8041_s27 + $0x20] sm:$0xff] %vm5444_vm10, %v5416_v1  ;;  %v5419_v14 = vmul.f32 %v7535_v5, %v10321_v24  ;;  %7550 = vpow2.f32 %v5314_v12  ;;  %v10416_v24 = vadd.f32 %v10288_v32, %v5151_v47  ;;  %v5162_v52 = vadd.f32 %v10334_v42, %v6588_v29 }
 0x726   : > { %v7537_v10 = vpop.eup %7536  ;;  %v5310_v35 = vmul.f32 1.442695, %v5265_v4  ;;  %v5270_v17 = vsub.f32 0.0, %v10410_v20  ;;  %v4938_v8 = vpop.f32.mrf.mxu1 }
 0x727   : > { %5452 = vst.msk [vmem:[%s8041_s27 + $0x38] sm:$0xff] %vm5444_vm10, %v5419_v14  ;;  %v5417_v18 = vmul.f32 %v7537_v10, %v10327_v38  ;;  %v7539_v43 = vpop.eup %7538  ;;  %v5268_v61 = vsub.f32 0.0, %v10416_v24  ;;  %v10424_v62 = vadd.f32 %v10288_v32, %v5162_v52  ;;  %v5154_v38 = vadd.f32 %v10336_v36, %v4938_v8 }
 0x728   : > { %v5358_v58 = vadd.f32 1.0, %v7539_v43  ;;  %v7541_v59 = vpop.eup %7540  ;;  %7552 = vpow2.f32 %v5310_v35  ;;  %v5320_v7 = vmul.f32 1.442695, %v5270_v17  ;;  %v6591_v42 = vpop.f32.mrf.mxu1 }
 0x729   : > { %5450 = vst.msk [vmem:[%s8041_s27 + $0x28] sm:$0xff] %vm5444_vm10, %v5417_v18  ;;  %v5356_v21 = vadd.f32 1.0, %v7541_v59  ;;  %v5316_v37 = vmul.f32 1.442695, %v5268_v61  ;;  %v5271_v23 = vsub.f32 0.0, %v10424_v62  ;;  %v10429_v30 = vadd.f32 %v10288_v32, %v5154_v38  ;;  %v6633_v43 = vpop.f32.mrf.mxu0 }
 0x72a   : > { %7554 = vrcp.f32 %v5358_v58  ;;  %v5175_v33 = vadd.f32 %v10343_v50, %v6591_v42  ;;  %v4951_v44 = vpop.f32.mrf.mxu1 }
 0x72b   : > { %7556 = vpow2.f32 %v5320_v7  ;;  %v7543_v13 = vpop.eup %7542  ;;  %v5322_v36 = vmul.f32 1.442695, %v5271_v23  ;;  %v5167_v15 = vadd.f32 %v10352_v16, %v4951_v44  ;;  %v5269_v26 = vsub.f32 0.0, %v10429_v30  ;;  %v5198_v44 = vpop.f32.mrf.mxu0 }
 0x72c   : > { %7558 = vrcp.f32 %v5356_v21  ;;  %v5359_v2 = vadd.f32 1.0, %v7543_v13  ;;  %v10435_v55 = vadd.f32 %v10288_v32, %v5175_v33  ;;  %v6592_v34 = vpop.f32.mrf.mxu1 }
 0x72d   : > { %7560 = vpow2.f32 %v5316_v37  ;;  %v7545_v27 = vpop.eup %7544  ;;  %v10438_v56 = vadd.f32 %v10288_v32, %v5167_v15  ;;  %v5178_v50 = vadd.f32 %v10373_v41, %v6592_v34  ;;  %v5318_v16 = vmul.f32 1.442695, %v5269_v26 }
 0x72e   : > { %7562 = vpow2.f32 %v5322_v36  ;;  %v7547_v28 = vpop.eup %7546  ;;  %v5357_v39 = vadd.f32 1.0, %v7545_v27  ;;  %v5274_v9 = vsub.f32 0.0, %v10435_v55  ;;  %v4954_v46 = vpop.f32.mrf.mxu1 }
 0x72f   : > { %7564 = vrcp.f32 %v5359_v2  ;;  %v5362_v11 = vadd.f32 1.0, %v7547_v28  ;;  %v5272_v51 = vsub.f32 0.0, %v10438_v56  ;;  %v10444_v1 = vadd.f32 %v10288_v32, %v5178_v50 }
 0x730   : > { %v5170_v45 = vadd.f32 %v10391_v0, %v4954_v46  ;;  %v7549_v5 = vpop.eup %7548  ;;  %7566 = vrcp.f32 %v5357_v39  ;;  %v5328_v53 = vmul.f32 1.442695, %v5274_v9  ;;  %v6595_v41 = vpop.f32.mrf.mxu1 }
 0x731   : > { %7568 = vrcp.f32 %v5362_v11  ;;  %v5360_v40 = vadd.f32 1.0, %v7549_v5  ;;  %v5275_v14 = vsub.f32 0.0, %v10444_v1  ;;  %v5324_v47 = vmul.f32 1.442695, %v5272_v51 }
 0x732   : > { %v7551_v12 = vpop.eup %7550  ;;  %7570 = vpow2.f32 %v5318_v16  ;;  %v10449_v10 = vadd.f32 %v10288_v32, %v5170_v45  ;;  %v5191_v4 = vadd.f32 %v10406_v54, %v6595_v41  ;;  %v4967_v29 = vpop.f32.mrf.mxu1 }
 0x733   : > { %7572 = vrcp.f32 %v5360_v40  ;;  %v5363_v0 = vadd.f32 1.0, %v7551_v12  ;;  %v5330_v18 = vmul.f32 1.442695, %v5275_v14  ;;  %v5183_v52 = vadd.f32 %v5182_v6, %v4967_v29 }
 0x734   : > { %7574 = vpow2.f32 %v5328_v53  ;;  %v5273_v35 = vsub.f32 0.0, %v10449_v10  ;;  %v10454_v17 = vadd.f32 %v10288_v32, %v5191_v4  ;;  %v6596_v8 = vpop.f32.mrf.mxu1 }
 0x735   : > { %v7553_v58 = vpop.eup %7552  ;;  %7576 = vrcp.f32 %v5363_v0  ;;  %v10457_v61 = vadd.f32 %v10288_v32, %v5183_v52  ;;  %v5194_v38 = vadd.f32 %v6630_v31, %v6596_v8 }
 0x736   : > { %v5361_v59 = vadd.f32 1.0, %v7553_v58  ;;  %7578 = vpow2.f32 %v5324_v47  ;;  %v5326_v7 = vmul.f32 1.442695, %v5273_v35  ;;  %v5278_v6 = vsub.f32 0.0, %v10454_v17  ;;  %v4970_v42 = vpop.f32.mrf.mxu1 }
 0x737   : > { %v7555_v54 = vpop.eup %7554  ;;  %7580 = vpow2.f32 %v5330_v18  ;;  %v5276_v23 = vsub.f32 0.0, %v10457_v61  ;;  %v10463_v33 = vadd.f32 %v10288_v32, %v5194_v38  ;;  %v5186_v31 = vadd.f32 %v5185_v60, %v4970_v42 }
 0x738   : > { %v7557_v21 = vpop.eup %7556  ;;  %v5422_v37 = vmul.f32 %v7555_v54, %v10340_v49  ;;  %7582 = vrcp.f32 %v5361_v59  ;;  %v5336_v15 = vmul.f32 1.442695, %v5278_v6  ;;  %v6599_v2 = vpop.f32.mrf.mxu1 }
 0x739   : > { %v7559_v13 = vpop.eup %7558  ;;  %v5366_v36 = vadd.f32 1.0, %v7557_v21  ;;  %7584 = vpow2.f32 %v5326_v7  ;;  %v5332_v49 = vmul.f32 1.442695, %v5276_v23  ;;  %v5279_v27 = vsub.f32 0.0, %v10463_v33 }
 0x73a   : > { %v7561_v26 = vpop.eup %7560  ;;  %5455 = vst.msk [vmem:[%s8041_s27 + $0x50] sm:$0xff] %vm5444_vm10, %v5422_v37  ;;  %v5420_v34 = vmul.f32 %v7559_v13, %v10347_v63  ;;  %v10470_v39 = vadd.f32 %v10288_v32, %v5186_v31  ;;  %v5207_v16 = vadd.f32 %v6633_v43, %v6599_v2  ;;  %v4983_v9 = vpop.f32.mrf.mxu1 }
 0x73b   : > { %v7563_v50 = vpop.eup %7562  ;;  %7586 = vrcp.f32 %v5366_v36  ;;  %v5364_v28 = vadd.f32 1.0, %v7561_v26  ;;  %v5338_v51 = vmul.f32 1.442695, %v5279_v27  ;;  %v6634_v63 = vpop.f32.mrf.mxu0  ;;  %v5199_v45 = vadd.f32 %v5198_v44, %v4983_v9 }
 0x73c   : > { %v7565_v46 = vpop.eup %7564  ;;  %5453 = vst.msk [vmem:[%s8041_s27 + $0x40] sm:$0xff] %vm5444_vm10, %v5420_v34  ;;  %v5367_v11 = vadd.f32 1.0, %v7563_v50  ;;  %7588 = vpow2.f32 %v5336_v15  ;;  %v5277_v5 = vsub.f32 0.0, %v10470_v39  ;;  %v10477_v53 = vadd.f32 %v10288_v32, %v5207_v16  ;;  %v6600_v41 = vpop.f32.mrf.mxu1 }
 0x73d   : > { %v5423_v60 = vmul.f32 %v7565_v46, %v10355_v48  ;;  %7590 = vrcp.f32 %v5364_v28  ;;  %v7567_v40 = vpop.eup %7566  ;;  %v10480_v14 = vadd.f32 %v10288_v32, %v5199_v45  ;;  %v5210_v12 = vadd.f32 %v6634_v63, %v6600_v41  ;;  %v5201_v43 = vpop.f32.mrf.mxu0 }
 0x73e   : > { %7592 = vrcp.f32 %v5367_v11  ;;  %v7569_v47 = vpop.eup %7568  ;;  %v5421_v4 = vmul.f32 %v7567_v40, %v10364_v19  ;;  %v5334_v48 = vmul.f32 1.442695, %v5277_v5  ;;  %v5282_v29 = vsub.f32 0.0, %v10477_v53  ;;  %v4986_v0 = vpop.f32.mrf.mxu1 }
 0x73f   : > { %5456 = vst.msk [vmem:[%s8041_s27 + $0x58] sm:$0xff] %vm5444_vm10, %v5423_v60  ;;  %7594 = vpow2.f32 %v5332_v49  ;;  %v7571_v18 = vpop.eup %7570  ;;  %v5426_v52 = vmul.f32 %v7569_v47, %v10370_v3  ;;  %v5280_v35 = vsub.f32 0.0, %v10480_v14  ;;  %v10489_v8 = vadd.f32 %v10288_v32, %v5210_v12 }
 0x740   : > { %7596 = vpow2.f32 %v5338_v51  ;;  %v7573_v58 = vpop.eup %7572  ;;  %5454 = vst.msk [vmem:[%s8041_s27 + $0x48] sm:$0xff] %vm5444_vm10, %v5421_v4  ;;  %v5365_v19 = vadd.f32 1.0, %v7571_v18  ;;  %v5344_v38 = vmul.f32 1.442695, %v5282_v29  ;;  %v5202_v54 = vadd.f32 %v5201_v43, %v4986_v0 }
 0x741   : > { %7598 = vpow2.f32 %v5334_v48  ;;  %v7575_v59 = vpop.eup %7574  ;;  %5459 = vst.msk [vmem:[%s8041_s27 + $0x70] sm:$0xff] %vm5444_vm10, %v5426_v52  ;;  %v5424_v3 = vmul.f32 %v7573_v58, %v10381_v22  ;;  %v5340_v7 = vmul.f32 1.442695, %v5280_v35  ;;  %v5283_v6 = vsub.f32 0.0, %v10489_v8 }
 0x742   : > { %v7577_v42 = vpop.eup %7576  ;;  %7600 = vrcp.f32 %v5365_v19  ;;  %v5370_v21 = vadd.f32 1.0, %v7575_v59  ;;  %v10498_v37 = vadd.f32 %v10288_v32, %v5202_v54 }
 0x743   : > { %v7579_v23 = vpop.eup %7578  ;;  %5457 = vst.msk [vmem:[%s8041_s27 + $0x60] sm:$0xff] %vm5444_vm10, %v5424_v3  ;;  %v5427_v44 = vmul.f32 %v7577_v42, %v10388_v25  ;;  %7602 = vpow2.f32 %v5344_v38  ;;  %v5346_v36 = vmul.f32 1.442695, %v5283_v6 }
 0x744   : > { %v7581_v13 = vpop.eup %7580  ;;  %7604 = vrcp.f32 %v5370_v21  ;;  %v5368_v22 = vadd.f32 1.0, %v7579_v23  ;;  %v5281_v15 = vsub.f32 0.0, %v10498_v37 }
 0x745   : > { %v7583_v31 = vpop.eup %7582  ;;  %5460 = vst.msk [vmem:[%s8041_s27 + $0x78] sm:$0xff] %vm5444_vm10, %v5427_v44  ;;  %v5371_v2 = vadd.f32 1.0, %v7581_v13  ;;  %7606 = vpow2.f32 %v5340_v7 }
 0x746   : > { %v7585_v32 = vpop.eup %7584  ;;  %v5425_v26 = vmul.f32 %v7583_v31, %v10399_v57  ;;  %7608 = vrcp.f32 %v5368_v22  ;;  %v5342_v34 = vmul.f32 1.442695, %v5281_v15 }
 0x747   : > { %7610 = vrcp.f32 %v5371_v2  ;;  %v5369_v49 = vadd.f32 1.0, %v7585_v32 }
 0x748   : > { %v7587_v25 = vpop.eup %7586  ;;  %5458 = vst.msk [vmem:[%s8041_s27 + $0x68] sm:$0xff] %vm5444_vm10, %v5425_v26  ;;  %7612 = vpow2.f32 %v5346_v36 }
 0x749   : > { %v7589_v27 = vpop.eup %7588  ;;  %v5430_v50 = vmul.f32 %v7587_v25, %v10410_v20  ;;  %7614 = vrcp.f32 %v5369_v49 }
 0x74a   : > { %v7591_v28 = vpop.eup %7590  ;;  %v5374_v16 = vadd.f32 1.0, %v7589_v27  ;;  %7616 = vpow2.f32 %v5342_v34 }
 0x74b   : > { %v7593_v9 = vpop.eup %7592  ;;  %5463 = vst.msk [vmem:[%s8041_s27 + $0x90] sm:$0xff] %vm5444_vm10, %v5430_v50  ;;  %v5428_v57 = vmul.f32 %v7591_v28, %v10416_v24 }
 0x74c   : > { %v7595_v46 = vpop.eup %7594  ;;  %v5431_v11 = vmul.f32 %v7593_v9, %v10424_v62  ;;  %7618 = vrcp.f32 %v5374_v16 }
 0x74d   : > { %v7597_v51 = vpop.eup %7596  ;;  %5461 = vst.msk [vmem:[%s8041_s27 + $0x80] sm:$0xff] %vm5444_vm10, %v5428_v57  ;;  %v5372_v20 = vadd.f32 1.0, %v7595_v46 }
 0x74e   : > { %v7599_v63 = vpop.eup %7598  ;;  %5464 = vst.msk [vmem:[%s8041_s27 + $0x98] sm:$0xff] %vm5444_vm10, %v5431_v11  ;;  %v5375_v45 = vadd.f32 1.0, %v7597_v51 }
 0x74f   : > { %7620 = vrcp.f32 %v5372_v20  ;;  %v5373_v60 = vadd.f32 1.0, %v7599_v63  ;;  %v7601_v5 = vpop.eup %7600 }
 0x750   : > { %7622 = vrcp.f32 %v5375_v45  ;;  %v7603_v24 = vpop.eup %7602  ;;  %v5429_v41 = vmul.f32 %v7601_v5, %v10429_v30 }
 0x751   : > { %7624 = vrcp.f32 %v5373_v60  ;;  %v7605_v62 = vpop.eup %7604  ;;  %v5378_v40 = vadd.f32 1.0, %v7603_v24 }
 0x752   : > { %v7607_v12 = vpop.eup %7606  ;;  %5462 = vst.msk [vmem:[%s8041_s27 + $0x88] sm:$0xff] %vm5444_vm10, %v5429_v41  ;;  %v5434_v47 = vmul.f32 %v7605_v62, %v10435_v55 }
 0x753   : > { %v7609_v4 = vpop.eup %7608  ;;  %7626 = vrcp.f32 %v5378_v40  ;;  %v5376_v48 = vadd.f32 1.0, %v7607_v12 }
 0x754   : > { %v7611_v29 = vpop.eup %7610  ;;  %5467 = vst.msk [vmem:[%s8041_s27 + $0xb0] sm:$0xff] %vm5444_vm10, %v5434_v47  ;;  %v5432_v0 = vmul.f32 %v7609_v4, %v10438_v56 }
 0x755   : > { %v7613_v30 = vpop.eup %7612  ;;  %v5435_v18 = vmul.f32 %v7611_v29, %v10444_v1  ;;  %7628 = vrcp.f32 %v5376_v48 }
 0x756   : > { %v7615_v52 = vpop.eup %7614  ;;  %5465 = vst.msk [vmem:[%s8041_s27 + $0xa0] sm:$0xff] %vm5444_vm10, %v5432_v0  ;;  %v5379_v43 = vadd.f32 1.0, %v7613_v30 }
 0x757   : > { %v7617_v55 = vpop.eup %7616  ;;  %5468 = vst.msk [vmem:[%s8041_s27 + $0xb8] sm:$0xff] %vm5444_vm10, %v5435_v18  ;;  %v5433_v35 = vmul.f32 %v7615_v52, %v10449_v10 }
 0x758   : > { %7630 = vrcp.f32 %v5379_v43  ;;  %v5377_v56 = vadd.f32 1.0, %v7617_v55 }
 0x759   : > { %v7619_v58 = vpop.eup %7618  ;;  %5466 = vst.msk [vmem:[%s8041_s27 + $0xa8] sm:$0xff] %vm5444_vm10, %v5433_v35 }
 0x75a   : > { %v5438_v1 = vmul.f32 %v7619_v58, %v10454_v17  ;;  %7632 = vrcp.f32 %v5377_v56 }
 0x75c   : > { %v7621_v19 = vpop.eup %7620  ;;  %5471 = vst.msk [vmem:[%s8041_s27 + $0xd0] sm:$0xff] %vm5444_vm10, %v5438_v1 }
 0x75d   : > { %v7623_v38 = vpop.eup %7622  ;;  %v5436_v54 = vmul.f32 %v7621_v19, %v10457_v61 }
 0x75e   : > { %v7625_v59 = vpop.eup %7624  ;;  %v5439_v10 = vmul.f32 %v7623_v38, %v10463_v33 }
 0x75f   : > { %5469 = vst.msk [vmem:[%s8041_s27 + $0xc0] sm:$0xff] %vm5444_vm10, %v5436_v54  ;;  %v5437_v3 = vmul.f32 %v7625_v59, %v10470_v39 }
 0x760   : > { %5472 = vst.msk [vmem:[%s8041_s27 + $0xd8] sm:$0xff] %vm5444_vm10, %v5439_v10  ;;  %v7627_v17 = vpop.eup %7626 }
 0x761   : > { %5470 = vst.msk [vmem:[%s8041_s27 + $0xc8] sm:$0xff] %vm5444_vm10, %v5437_v3  ;;  %v5442_v7 = vmul.f32 %v7627_v17, %v10477_v53 }
 0x762   : > { %v7629_v6 = vpop.eup %7628 }
 0x763   : > { %5475 = vst.msk [vmem:[%s8041_s27 + $0xf0] sm:$0xff] %vm5444_vm10, %v5442_v7  ;;  %v5440_v61 = vmul.f32 %v7629_v6, %v10480_v14 }
 0x765   : > { %v7631_v42 = vpop.eup %7630  ;;  %5473 = vst.msk [vmem:[%s8041_s27 + $0xe0] sm:$0xff] %vm5444_vm10, %v5440_v61 }
 0x766   : > { %v5443_v33 = vmul.f32 %v7631_v42, %v10489_v8 }
 0x767   : > { %v7633_v21 = vpop.eup %7632 }
 0x768   : > { %5476 = vst.msk [vmem:[%s8041_s27 + $0xf8] sm:$0xff] %vm5444_vm10, %v5443_v33  ;;  %v5441_v39 = vmul.f32 %v7633_v21, %v10498_v37 }
 0x76a   : > { %5474 = vst.msk [vmem:[%s8041_s27 + $0xe8] sm:$0xff] %vm5444_vm10, %v5441_v39 }
 0x76b PF: > { %s21_s17 = sadd.s32 1, %s7772_s17  }
 0x76c   : > { %p18_p5 = scmp.ge.s32.totalorder %s21_s17, 4  }
 0x76e   :  { %20 = sbr.rel (!%p18_p5) target bundleno = 1 (0x1), region = 119 }

</bundles_post_ra>
